<compile_context>
chip_gen: v5e
topology: v5e:2x2
jax: 0.10.0
libtpu: 0.0.40
codegen_flags: <defaults>
</compile_context>

<pallas_src>
import functools

import jax
import jax.numpy as jnp
from jax import lax
from jax.experimental import pallas as pl
from jax.experimental.pallas import tpu as pltpu

DROPOUT_P = 0.2


def _hash_u32(x):
    """splitmix32-style finalizer over uint32 lanes (VPU integer ops only)."""
    x = x ^ (x >> 16)
    x = x * jnp.uint32(0x7FEB352D)
    x = x ^ (x >> 15)
    x = x * jnp.uint32(0x846CA68B)
    x = x ^ (x >> 16)
    return x


def _ffwd_kernel(seed_ref, x_ref, w1_ref, b1_ref, w2_ref, b2_ref, o_ref,
                 *, dropout_p, apply_dropout):
    # ---- Linear 1 (bf16 operands, f32 accumulation on the MXU) + ReLU ----
    x_bf = x_ref[...].astype(jnp.bfloat16)
    h = jnp.dot(x_bf, w1_ref[...], preferred_element_type=jnp.float32)
    h = jnp.maximum(h + b1_ref[...], 0.0)            # fused f32 epilogue (VPU)

    # ---- Linear 2 (cast activation to bf16 right before the dot) ----
    y = jnp.dot(h.astype(jnp.bfloat16), w2_ref[...],
                preferred_element_type=jnp.float32)
    y = y + b2_ref[...]                               # (TM, C) + (1, C)

    if apply_dropout:
        tm_blk, c_blk = y.shape
        # Global per-element counter so every row tile gets an independent mask.
        row = lax.broadcasted_iota(jnp.int32, y.shape, 0) + pl.program_id(0) * tm_blk
        col = lax.broadcasted_iota(jnp.int32, y.shape, 1)
        ctr = (row * c_blk + col).astype(jnp.uint32)   # nonnegative -> exact
        seed = seed_ref[0].astype(jnp.uint32) * jnp.uint32(0x9E3779B9)
        bits = _hash_u32(ctr ^ seed)
        # Integer-domain keep test: P(bits >= thr) = 1 - p.
        thr = jnp.uint32(min(int(round(dropout_p * 4294967296.0)), 0xFFFFFFFF))
        keep = bits >= thr
        y = jnp.where(keep, y * (1.0 / (1.0 - dropout_p)), 0.0)

    o_ref[...] = y.astype(o_ref.dtype)


def feed_forward(x, w1, b1, w2, b2, *, seed=0, dropout_p=DROPOUT_P,
                 training=True, tm=512, out_dtype=None):
    """x: (B, T, C) float32.  w1: (C, 4C), b1: (1, 4C), w2: (4C, C), b2: (1, C).
    Returns (B, T, C) in out_dtype (default: x.dtype)."""
    B, T, C = x.shape
    H = w1.shape[1]
    M = B * T
    out_dtype = x.dtype if out_dtype is None else out_dtype
    x2d = x.reshape(M, C)

    # Row-tile: default 512 (multiple of 256 for the v6e/v7x MXU), clamped to
    # the padded row count (multiple of 8 sublanes) for small inputs.
    tm = max(8, min(tm, -(-M // 8) * 8))
    m_pad = -(-M // tm) * tm
    if m_pad != M:
        x2d = jnp.pad(x2d, ((0, m_pad - M), (0, 0)))

    # Weights resident in VMEM as bf16 (half footprint, full MXU rate);
    # biases stay f32 for the epilogue.
    w1_bf = w1.astype(jnp.bfloat16)
    w2_bf = w2.astype(jnp.bfloat16)
    b1_f = b1.astype(jnp.float32).reshape(1, H)
    b2_f = b2.astype(jnp.float32).reshape(1, C)

    seed_arr = jnp.asarray([seed], dtype=jnp.int32)
    grid = (m_pad // tm,)

    kernel = functools.partial(
        _ffwd_kernel,
        dropout_p=float(dropout_p),
        apply_dropout=bool(training and dropout_p > 0.0),
    )

    # VMEM budget: resident weights/biases (pipeliner double-buffers them),
    # streamed x/out tiles (double-buffered), plus the (tm, H) f32 intermediate.
    # Cap at 48 MiB so we never request all of v7x's 64 MiB per-TC VMEM.
    out_itemsize = jnp.dtype(out_dtype).itemsize
    resident = 2 * ((C * H + H * C) * 2 + (H + C) * 4)
    streamed = 2 * (tm * C * 4) + 2 * (tm * C * out_itemsize)
    scratch = tm * H * 4
    needed = resident + streamed + scratch
    vmem_limit = int(min(max(2 * needed, 32 * 1024 * 1024), 48 * 1024 * 1024))

    cost = pl.CostEstimate(
        flops=4 * m_pad * C * H,                          # two (M,C,H) matmuls
        transcendentals=0,
        bytes_accessed=(m_pad * C * 4                     # x in
                        + m_pad * C * out_itemsize        # y out
                        + w1_bf.size * 2 + w2_bf.size * 2
                        + b1_f.size * 4 + b2_f.size * 4),
    )

    grid_spec = pltpu.PrefetchScalarGridSpec(
        num_scalar_prefetch=1,                            # seed -> SMEM
        grid=grid,
        in_specs=[
            pl.BlockSpec((tm, C), lambda i, s: (i, 0)),   # x tile (pipelined)
            pl.BlockSpec((C, H), lambda i, s: (0, 0)),    # w1 (resident)
            pl.BlockSpec((1, H), lambda i, s: (0, 0)),    # b1 (resident)
            pl.BlockSpec((H, C), lambda i, s: (0, 0)),    # w2 (resident)
            pl.BlockSpec((1, C), lambda i, s: (0, 0)),    # b2 (resident)
        ],
        out_specs=pl.BlockSpec((tm, C), lambda i, s: (i, 0)),
    )

    out2d = pl.pallas_call(
        kernel,
        out_shape=jax.ShapeDtypeStruct((m_pad, C), out_dtype),
        grid_spec=grid_spec,
        compiler_params=pltpu.CompilerParams(
            dimension_semantics=("parallel",),
            vmem_limit_bytes=vmem_limit,
        ),
        cost_estimate=cost,
    )(seed_arr, x2d, w1_bf, b1_f, w2_bf, b2_f)

    return out2d[:M].reshape(B, T, C)


def init_params(key, n_embed):
    """Deterministic init matching nn.Linear's U(-1/sqrt(in), 1/sqrt(in))."""
    hidden = 4 * n_embed
    k1, k2, k3, k4 = jax.random.split(key, 4)
    bound1 = 1.0 / jnp.sqrt(n_embed)
    bound2 = 1.0 / jnp.sqrt(hidden)
    w1 = jax.random.uniform(k1, (n_embed, hidden), jnp.float32, -bound1, bound1)
    b1 = jax.random.uniform(k2, (1, hidden), jnp.float32, -bound1, bound1)
    w2 = jax.random.uniform(k3, (hidden, n_embed), jnp.float32, -bound2, bound2)
    b2 = jax.random.uniform(k4, (1, n_embed), jnp.float32, -bound2, bound2)
    return w1, b1, w2, b2


if __name__ == "__main__":
    # Small shapes consistent with the module: n_embed=384, short sequence.
    B, T, n_embed = 2, 8, 384          # hidden = 4 * n_embed = 1536
    key = jax.random.PRNGKey(0)
    kx, kp = jax.random.split(key)

    x = jax.random.normal(kx, (B, T, n_embed), dtype=jnp.float32)
    w1, b1, w2, b2 = init_params(kp, n_embed)

    # Eval mode (dropout = identity): compare against a pure-JAX reference
    # that uses the same bf16-operand / f32-accumulation matmul recipe.
    out_eval = feed_forward(x, w1, b1, w2, b2, training=False)
    out_eval = jax.block_until_ready(out_eval)

    x2d = x.reshape(B * T, n_embed)
    ref_h = jnp.maximum(
        jnp.dot(x2d.astype(jnp.bfloat16), w1.astype(jnp.bfloat16),
                preferred_element_type=jnp.float32) + b1, 0.0)
    ref = jnp.dot(ref_h.astype(jnp.bfloat16), w2.astype(jnp.bfloat16),
                  preferred_element_type=jnp.float32) + b2
    ref = ref.reshape(B, T, n_embed)
    assert jnp.allclose(out_eval, ref, atol=1e-2, rtol=1e-2), "mismatch vs ref"

    # Training path (seeded in-kernel counter-hash dropout).
    out_train = feed_forward(x, w1, b1, w2, b2, seed=123, training=True)
    out_train = jax.block_until_ready(out_train)
    assert out_train.shape == (B, T, n_embed)
    assert bool(jnp.all(jnp.isfinite(out_train)))

    # Dropped fraction should be roughly p=0.2; kept entries equal eval / (1-p).
    drop_frac = float(jnp.mean((out_train == 0.0).astype(jnp.float32)))
    assert 0.05 < drop_frac < 0.40, f"dropout fraction looks wrong: {drop_frac}"
    kept = out_train != 0.0
    scaled = out_eval / (1.0 - DROPOUT_P)
    assert jnp.allclose(jnp.where(kept, out_train, 0.0),
                        jnp.where(kept, scaled, 0.0),
                        atol=1e-2, rtol=1e-2), "kept values not scaled by 1/(1-p)"

    print("KERNEL_OK")
</pallas_src>

<mosaic_0001>
module attributes {stable_mosaic.version = 11 : i64} {
  func.func @_ffwd_kernel(%arg0: i32, %arg1: memref<1xi32, #tpu.memory_space<smem>>, %arg2: memref<16x384xf32, #tpu.memory_space<vmem>>, %arg3: memref<384x1536xbf16, #tpu.memory_space<vmem>>, %arg4: memref<1x1536xf32, #tpu.memory_space<vmem>>, %arg5: memref<1536x384xbf16, #tpu.memory_space<vmem>>, %arg6: memref<1x384xf32, #tpu.memory_space<vmem>>, %arg7: memref<16x384xf32, #tpu.memory_space<vmem>>) attributes {dimension_semantics = [#tpu.dimension_semantics<parallel>], iteration_bounds = array<i64: 1>, scalar_prefetch = 1 : i64, scratch_operands = 0 : i64, tpu.core_type = #tpu.core_type<tc>, window_params = [{transform_indices = @transform_0, window_bounds = array<i64: 16, 384>}, {pipeline_mode = #tpu.pipeline_mode<synchronous>, transform_indices = @transform_1, window_bounds = array<i64: 384, 1536>}, {pipeline_mode = #tpu.pipeline_mode<synchronous>, transform_indices = @transform_2, window_bounds = array<i64: 1, 1536>}, {pipeline_mode = #tpu.pipeline_mode<synchronous>, transform_indices = @transform_3, window_bounds = array<i64: 1536, 384>}, {pipeline_mode = #tpu.pipeline_mode<synchronous>, transform_indices = @transform_4, window_bounds = array<i64: 1, 384>}, {transform_indices = @transform_5, window_bounds = array<i64: 16, 384>}]} {
    %c0 = arith.constant 0 : index
    %c0_0 = arith.constant 0 : index
    %0 = vector.load %arg2[%c0, %c0_0] : memref<16x384xf32, #tpu.memory_space<vmem>>, vector<16x384xf32>
    %1 = arith.truncf %0 : vector<16x384xf32> to vector<16x384xbf16>
    %c0_1 = arith.constant 0 : index
    %c0_2 = arith.constant 0 : index
    %2 = vector.load %arg3[%c0_1, %c0_2] : memref<384x1536xbf16, #tpu.memory_space<vmem>>, vector<384x1536xbf16>
    %cst = arith.constant dense<0.000000e+00> : vector<16x1536xf32>
    %3 = tpu.matmul %1, %2, %cst {dimension_numbers = #tpu.dot_dimension_numbers<[1], [0], [0], [1], [0, 0, 1, 1], [], []>} : vector<16x384xbf16>, vector<384x1536xbf16>, vector<16x1536xf32> -> vector<16x1536xf32>
    %c0_3 = arith.constant 0 : index
    %c0_4 = arith.constant 0 : index
    %4 = vector.load %arg4[%c0_3, %c0_4] : memref<1x1536xf32, #tpu.memory_space<vmem>>, vector<1x1536xf32>
    %5 = vector.broadcast %4 : vector<1x1536xf32> to vector<16x1536xf32>
    %6 = arith.addf %3, %5 : vector<16x1536xf32>
    %cst_5 = arith.constant 0.000000e+00 : f32
    %7 = vector.broadcast %cst_5 : f32 to vector<16x1536xf32>
    %8 = arith.maximumf %6, %7 : vector<16x1536xf32>
    %9 = arith.truncf %8 : vector<16x1536xf32> to vector<16x1536xbf16>
    %c0_6 = arith.constant 0 : index
    %c0_7 = arith.constant 0 : index
    %10 = vector.load %arg5[%c0_6, %c0_7] : memref<1536x384xbf16, #tpu.memory_space<vmem>>, vector<1536x384xbf16>
    %cst_8 = arith.constant dense<0.000000e+00> : vector<16x384xf32>
    %11 = tpu.matmul %9, %10, %cst_8 {dimension_numbers = #tpu.dot_dimension_numbers<[1], [0], [0], [1], [0, 0, 1, 1], [], []>} : vector<16x1536xbf16>, vector<1536x384xbf16>, vector<16x384xf32> -> vector<16x384xf32>
    %c0_9 = arith.constant 0 : index
    %c0_10 = arith.constant 0 : index
    %12 = vector.load %arg6[%c0_9, %c0_10] : memref<1x384xf32, #tpu.memory_space<vmem>>, vector<1x384xf32>
    %13 = vector.broadcast %12 : vector<1x384xf32> to vector<16x384xf32>
    %14 = arith.addf %11, %13 : vector<16x384xf32>
    %c0_11 = arith.constant 0 : index
    %c0_12 = arith.constant 0 : index
    %15 = vector.load %arg7[%c0_11, %c0_12] : memref<16x384xf32, #tpu.memory_space<vmem>>, vector<16x384xf32>
    tpu.vector_store %arg7[%c0_11, %c0_12], %14 {strides = array<i32>} : memref<16x384xf32, #tpu.memory_space<vmem>>, vector<16x384xf32>,
    return
  }
  func.func @transform_0(%arg0: i32, %arg1: memref<1xi32, #tpu.memory_space<smem>>) -> (i32, i32) {
    %c0_i32 = arith.constant 0 : i32
    %c0_i32_0 = arith.constant 0 : i32
    return %arg0, %c0_i32 : i32, i32
  }
  func.func @transform_1(%arg0: i32, %arg1: memref<1xi32, #tpu.memory_space<smem>>) -> (i32, i32) {
    %c0_i32 = arith.constant 0 : i32
    %c0_i32_0 = arith.constant 0 : i32
    %c0_i32_1 = arith.constant 0 : i32
    return %c0_i32, %c0_i32_0 : i32, i32
  }
  func.func @transform_2(%arg0: i32, %arg1: memref<1xi32, #tpu.memory_space<smem>>) -> (i32, i32) {
    %c0_i32 = arith.constant 0 : i32
    %c0_i32_0 = arith.constant 0 : i32
    %c0_i32_1 = arith.constant 0 : i32
    return %c0_i32, %c0_i32_0 : i32, i32
  }
  func.func @transform_3(%arg0: i32, %arg1: memref<1xi32, #tpu.memory_space<smem>>) -> (i32, i32) {
    %c0_i32 = arith.constant 0 : i32
    %c0_i32_0 = arith.constant 0 : i32
    %c0_i32_1 = arith.constant 0 : i32
    return %c0_i32, %c0_i32_0 : i32, i32
  }
  func.func @transform_4(%arg0: i32, %arg1: memref<1xi32, #tpu.memory_space<smem>>) -> (i32, i32) {
    %c0_i32 = arith.constant 0 : i32
    %c0_i32_0 = arith.constant 0 : i32
    %c0_i32_1 = arith.constant 0 : i32
    return %c0_i32, %c0_i32_0 : i32, i32
  }
  func.func @transform_5(%arg0: i32, %arg1: memref<1xi32, #tpu.memory_space<smem>>) -> (i32, i32) {
    %c0_i32 = arith.constant 0 : i32
    %c0_i32_0 = arith.constant 0 : i32
    return %arg0, %c0_i32 : i32, i32
  }
}

</mosaic_0001>

<bundles_post_ra>
// kernel: tpu_custom_call.1
= control target key start
LH: loop header
LB: loop body
LE: loop exit
PB: predicated region body
PF: predicated region fallthrough
CT: control target
= control target key end

     0   :  { %12 = vsyncpa [#allocation5], 0  ;;  %s8267_s0 = inlined_call_operand.<no memory space> [shape: s32[1], index: 0, kind: input, shape index: {}]   ;;  %s8268_s1 = inlined_call_operand.hbm [shape: f32[16,384], index: 1, kind: input, shape index: {}]   ;;  %s8269_s2 = inlined_call_operand.hbm [shape: bf16[384,1536], index: 2, kind: input, shape index: {}]   ;;  %s8270_s3 = inlined_call_operand.hbm [shape: f32[1,1536], index: 3, kind: input, shape index: {}]   ;;  %s8271_s4 = inlined_call_operand.hbm [shape: bf16[1536,384], index: 4, kind: input, shape index: {}]   ;;  %s8272_s5 = inlined_call_operand.hbm [shape: f32[1,384], index: 5, kind: input, shape index: {}]   ;;  %s8273_s6 = inlined_call_operand.hbm [shape: f32[16,384], index: 6, kind: output, shape index: {}]  }
   0x1   :  { %13 = vsyncpa [#allocation8], 0 }
   0x2   :  { %14 = vsyncpa [#allocation11], 0  ;;  %s33_s22 = sshll.u32 %s8269_s2, 4  ;;  %s34_s22 = int_to_ptr.hbm [resolvable:$true] %s33_s22 }
   0x3   :  { %15 = vsyncpa [#allocation6], 0  ;;  %s7905_s23 = smov [#allocation7]   ;;  %s57_s27 = sshll.u32 %s8271_s4, 4  ;;  %s58_s27 = int_to_ptr.hbm [resolvable:$true] %s57_s27 }
   0x4   :  { %s35_s24 = sshll.u32 %s7905_s23, 4  ;;  %s7906_s28 = smov 768   ;;  %s36_s24 = int_to_ptr.vmem [resolvable:$true] %s35_s24 }
   0x5   :  { %s7907_s29 = smov 48   ;;  %s7908_s30 = smov [#allocation10]  }
   0x6   :  { %41 = dma.hbm_to_vmem [thread:$0]  %s34_s22, 36864, %s36_s24, [#allocation8], %s7906_s28, %s7906_s28, %s7907_s29  }
   0x7   :  { %s59_s7 = sshll.u32 %s7908_s30, 4  ;;  %s7909_s8 = smov 192   ;;  %s60_s7 = int_to_ptr.vmem [resolvable:$true] %s59_s7 }
   0x8   :  { %s7910_s9 = smov 12   ;;  %s20_s11 = sshll.u32 %s8268_s1, 4  ;;  %s21_s11 = int_to_ptr.hbm [resolvable:$true] %s20_s11 }
   0x9   :  { %65 = dma.hbm_to_vmem [thread:$0]  %s58_s27, 36864, %s60_s7, [#allocation11], %s7909_s8, %s7909_s8, %s7910_s9  }
   0xa   :  { %s7911_s12 = smov [#allocation4]   ;;  %s47_s15 = sshll.u32 %s8270_s3, 4  ;;  %s48_s15 = int_to_ptr.hbm [resolvable:$true] %s47_s15 }
   0xb   :  { %s22_s13 = sshll.u32 %s7911_s12, 4  ;;  %s7912_s16 = smov 384   ;;  %s23_s13 = int_to_ptr.vmem [resolvable:$true] %s22_s13 }
   0xc   :  { %s7913_s17 = smov 24   ;;  %s7914_s18 = smov [#allocation9]  }
   0xd   :  { %28 = dma.hbm_to_vmem [thread:$0]  %s21_s11, 768, %s23_s13, [#allocation5], %s7912_s16, %s7912_s16, %s7913_s17  }
   0xe   :  { %s49_s19 = sshll.u32 %s7914_s18, 4  ;;  %s71_s1 = sshll.u32 %s8272_s5, 4  ;;  %s50_s19 = int_to_ptr.vmem [resolvable:$true] %s49_s19  ;;  %s72_s1 = int_to_ptr.hbm [resolvable:$true] %s71_s1 }
   0xf   :  { %52 = dma.hbm_to_vmem [thread:$0]  %s48_s15, 192, %s50_s19, [#allocation8]  }
  0x10   :  { %s7915_s21 = smov [#allocation12]  }
  0x11   :  { %s73_s22 = sshll.u32 %s7915_s21, 4  ;;  %s74_s22 = int_to_ptr.vmem [resolvable:$true] %s73_s22 }
  0x12   :  { %76 = dma.hbm_to_vmem [thread:$0]  %s72_s1, 48, %s74_s22, [#allocation11]  }
  0x13   :  { %7897 = dma.done.wait [#allocation5], 768  }
  0x14   :  { %7898 = vsyncadd [#allocation5], 4294966528 }
  0x15   :  { %7899 = dma.done.wait [#allocation8], 37056  }
  0x16   :  { %7900 = vsyncadd [#allocation8], 4294930240 }
  0x17   :  { %7901 = dma.done.wait [#allocation11], 36912  }
  0x18   :  { %7902 = vsyncadd [#allocation11], 4294930384  ;;  %v5199_v0 = vld [vmem:[#allocation7 + $0x2a0] sm:$0xf]  ;;  %v7255_v1 = vld [vmem:[#allocation7 + $0x2cc] sm:$0xf0] }
  0x19   :  { %v5583_v2 = vld [vmem:[#allocation7 + $0x5a0] sm:$0xf]  ;;  %v5200_v3 = vor.u32 %v7255_v1, %v5199_v0  ;;  %v7351_v4 = vld [vmem:[#allocation7 + $0x5cc] sm:$0xf0]  ;;  %v7249_v9 = vld [vmem:[#allocation7 + $0x2a4] sm:$0xf] }
  0x1a   :  { %v5967_v5 = vld [vmem:[#allocation7 + $0x8a0] sm:$0xf]  ;;  %v7447_v6 = vld [vmem:[#allocation7 + $0x8cc] sm:$0xf0]  ;;  %v5584_v7 = vor.u32 %v7351_v4, %v5583_v2  ;;  %v5201_v10 = vld [vmem:[#allocation7 + $0x2d0] sm:$0xf0] }
  0x1b   :  { %v5968_v8 = vor.u32 %v7447_v6, %v5967_v5  ;;  %v5151_v11 = vld [vmem:[#allocation7 + $0x240] sm:$0xf]  ;;  %1862 = vmatpush.bf16.msra.mxu0 %v5200_v3  ;;  %v5204_v12 = vor.u32 %v7249_v9, %v5201_v10  ;;  %v7243_v13 = vld [vmem:[#allocation7 + $0x26c] sm:$0xf0]  ;;  %v7237_v20 = vld [vmem:[#allocation7 + $0x244] sm:$0xf] }
  0x1c   :  { %v5535_v14 = vld [vmem:[#allocation7 + $0x540] sm:$0xf]  ;;  %v7339_v15 = vld [vmem:[#allocation7 + $0x56c] sm:$0xf0]  ;;  %1876 = vmatpush.bf16.msra.mxu1 %v5584_v7  ;;  %v5152_v16 = vor.u32 %v7243_v13, %v5151_v11  ;;  %v5153_v22 = vld [vmem:[#allocation7 + $0x270] sm:$0xf0] }
  0x1d   :  { %1890 = vmatpush.bf16.msra.mxu2 %v5968_v8  ;;  %v5536_v17 = vor.u32 %v7339_v15, %v5535_v14  ;;  %v5919_v18 = vld [vmem:[#allocation7 + $0x840] sm:$0xf]  ;;  %v7435_v19 = vld [vmem:[#allocation7 + $0x86c] sm:$0xf0]  ;;  %1904 = vmatpush.bf16.msra.mxu3 %v5204_v12  ;;  %v5156_v25 = vor.u32 %v7237_v20, %v5153_v22  ;;  %v7225_v31 = vld [vmem:[#allocation7 + $0x1e4] sm:$0xf] }
  0x1e   :  { %v5920_v21 = vor.u32 %v7435_v19, %v5919_v18  ;;  %v5103_v23 = vld [vmem:[#allocation7 + $0x1e0] sm:$0xf]  ;;  %v7231_v24 = vld [vmem:[#allocation7 + $0x20c] sm:$0xf0]  ;;  %v5105_v32 = vld [vmem:[#allocation7 + $0x210] sm:$0xf0] }
  0x1f   :  { %v5487_v26 = vld [vmem:[#allocation7 + $0x4e0] sm:$0xf]  ;;  %v7327_v27 = vld [vmem:[#allocation7 + $0x50c] sm:$0xf0]  ;;  %1863 = vmatpush.bf16.msra.mxu0 %v5152_v16  ;;  %v5104_v29 = vor.u32 %v7231_v24, %v5103_v23  ;;  %v5108_v38 = vor.u32 %v7225_v31, %v5105_v32  ;;  %v7213_v42 = vld [vmem:[#allocation7 + $0x184] sm:$0xf] }
  0x20   :  { %v5871_v28 = vld [vmem:[#allocation7 + $0x7e0] sm:$0xf]  ;;  %v7423_v30 = vld [vmem:[#allocation7 + $0x80c] sm:$0xf0]  ;;  %1877 = vmatpush.bf16.msra.mxu1 %v5536_v17  ;;  %v5488_v33 = vor.u32 %v7327_v27, %v5487_v26  ;;  %v5057_v43 = vld [vmem:[#allocation7 + $0x1b0] sm:$0xf0] }
  0x21   :  { %1891 = vmatpush.bf16.msra.mxu2 %v5920_v21  ;;  %v5872_v34 = vor.u32 %v7423_v30, %v5871_v28  ;;  %v5055_v35 = vld [vmem:[#allocation7 + $0x180] sm:$0xf]  ;;  %v7219_v36 = vld [vmem:[#allocation7 + $0x1ac] sm:$0xf0]  ;;  %1905 = vmatpush.bf16.msra.mxu3 %v5156_v25  ;;  %v5060_v50 = vor.u32 %v7213_v42, %v5057_v43  ;;  %v7201_v54 = vld [vmem:[#allocation7 + $0x124] sm:$0xf] }
  0x22   :  { %v5439_v37 = vld [vmem:[#allocation7 + $0x480] sm:$0xf]  ;;  %v7315_v39 = vld [vmem:[#allocation7 + $0x4ac] sm:$0xf0]  ;;  %v5056_v44 = vor.u32 %v7219_v36, %v5055_v35  ;;  %v5009_v55 = vld [vmem:[#allocation7 + $0x150] sm:$0xf0] }
  0x23   :  { %v5823_v40 = vld [vmem:[#allocation7 + $0x780] sm:$0xf]  ;;  %v7411_v41 = vld [vmem:[#allocation7 + $0x7ac] sm:$0xf0]  ;;  %1864 = vmatpush.bf16.msra.mxu0 %v5104_v29  ;;  %v5440_v45 = vor.u32 %v7315_v39, %v5439_v37  ;;  %v5012_v62 = vor.u32 %v7201_v54, %v5009_v55  ;;  %v7189_v2 = vld [vmem:[#allocation7 + $0xc4] sm:$0xf] }
  0x24   :  { %1878 = vmatpush.bf16.msra.mxu1 %v5488_v33  ;;  %v5824_v46 = vor.u32 %v7411_v41, %v5823_v40  ;;  %v5007_v47 = vld [vmem:[#allocation7 + $0x120] sm:$0xf]  ;;  %v7207_v48 = vld [vmem:[#allocation7 + $0x14c] sm:$0xf0]  ;;  %v4961_v3 = vld [vmem:[#allocation7 + $0xf0] sm:$0xf0] }
  0x25   :  { %1892 = vmatpush.bf16.msra.mxu2 %v5872_v34  ;;  %v5391_v49 = vld [vmem:[#allocation7 + $0x420] sm:$0xf]  ;;  %1906 = vmatpush.bf16.msra.mxu3 %v5108_v38  ;;  %v7303_v51 = vld [vmem:[#allocation7 + $0x44c] sm:$0xf0]  ;;  %v5008_v56 = vor.u32 %v7207_v48, %v5007_v47  ;;  %v4964_v10 = vor.u32 %v7189_v2, %v4961_v3  ;;  %v7177_v14 = vld [vmem:[#allocation7 + $0x64] sm:$0xf] }
  0x26   :  { %v5775_v52 = vld [vmem:[#allocation7 + $0x720] sm:$0xf]  ;;  %v7399_v53 = vld [vmem:[#allocation7 + $0x74c] sm:$0xf0]  ;;  %v5392_v57 = vor.u32 %v7303_v51, %v5391_v49  ;;  %v4913_v15 = vld [vmem:[#allocation7 + $0x90] sm:$0xf0] }
  0x27   :  { %1865 = vmatpush.bf16.msra.mxu0 %v5056_v44  ;;  %v5776_v58 = vor.u32 %v7399_v53, %v5775_v52  ;;  %v4959_v59 = vld [vmem:[#allocation7 + $0xc0] sm:$0xf]  ;;  %v7195_v60 = vld [vmem:[#allocation7 + $0xec] sm:$0xf0]  ;;  %v4916_v24 = vor.u32 %v7177_v14, %v4913_v15  ;;  %v7165_v26 = vld [vmem:[#allocation7 + $0x4] sm:$0xf] }
  0x28   :  { %1879 = vmatpush.bf16.msra.mxu1 %v5440_v45  ;;  %v5343_v61 = vld [vmem:[#allocation7 + $0x3c0] sm:$0xf]  ;;  %v7291_v63 = vld [vmem:[#allocation7 + $0x3ec] sm:$0xf0]  ;;  %v4960_v4 = vor.u32 %v7195_v60, %v4959_v59  ;;  %v4865_v27 = vld [vmem:[#allocation7 + $0x30] sm:$0xf0] }
  0x29   :  { %1893 = vmatpush.bf16.msra.mxu2 %v5824_v46  ;;  %1907 = vmatpush.bf16.msra.mxu3 %v5060_v50  ;;  %v5727_v0 = vld [vmem:[#allocation7 + $0x6c0] sm:$0xf]  ;;  %v7387_v1 = vld [vmem:[#allocation7 + $0x6ec] sm:$0xf0]  ;;  %v5344_v5 = vor.u32 %v7291_v63, %v5343_v61  ;;  %v7345_v28 = vld [vmem:[#allocation7 + $0x5a4] sm:$0xf]  ;;  %v4868_v39 = vor.u32 %v7165_v26, %v4865_v27 }
  0x2a   :  { %v5728_v6 = vor.u32 %v7387_v1, %v5727_v0  ;;  %v4911_v7 = vld [vmem:[#allocation7 + $0x60] sm:$0xf]  ;;  %v7183_v8 = vld [vmem:[#allocation7 + $0x8c] sm:$0xf0]  ;;  %v5585_v29 = vld [vmem:[#allocation7 + $0x5d0] sm:$0xf0] }
  0x2b   :  { %1866 = vmatpush.bf16.msra.mxu0 %v5008_v56  ;;  %v5295_v9 = vld [vmem:[#allocation7 + $0x360] sm:$0xf]  ;;  %v7279_v11 = vld [vmem:[#allocation7 + $0x38c] sm:$0xf0]  ;;  %v4912_v16 = vor.u32 %v7183_v8, %v4911_v7  ;;  %v7441_v30 = vld [vmem:[#allocation7 + $0x8a4] sm:$0xf]  ;;  %v5588_v40 = vor.u32 %v7345_v28, %v5585_v29 }
  0x2c   :  { %1880 = vmatpush.bf16.msra.mxu1 %v5392_v57  ;;  %v5679_v12 = vld [vmem:[#allocation7 + $0x660] sm:$0xf]  ;;  %v7375_v13 = vld [vmem:[#allocation7 + $0x68c] sm:$0xf0]  ;;  %v5296_v19 = vor.u32 %v7279_v11, %v5295_v9  ;;  %v5969_v32 = vld [vmem:[#allocation7 + $0x8d0] sm:$0xf0] }
  0x2d   :  { %1894 = vmatpush.bf16.msra.mxu2 %v5776_v58  ;;  %1908 = vmatpush.bf16.msra.mxu3 %v5012_v62  ;;  %v4863_v17 = vld [vmem:[#allocation7] sm:$0xf]  ;;  %v7171_v18 = vld [vmem:[#allocation7 + $0x2c] sm:$0xf0]  ;;  %v5680_v20 = vor.u32 %v7375_v13, %v5679_v12  ;;  %v5207_v33 = vld [vmem:[#allocation7 + $0x2a8] sm:$0xf]  ;;  %v5972_v42 = vor.u32 %v7441_v30, %v5969_v32 }
  0x2e   :  { %v5247_v21 = vld [vmem:[#allocation7 + $0x300] sm:$0xf]  ;;  %v7267_v22 = vld [vmem:[#allocation7 + $0x32c] sm:$0xf0]  ;;  %v4864_v31 = vor.u32 %v7171_v18, %v4863_v17  ;;  %v7256_v34 = vld [vmem:[#allocation7 + $0x2d4] sm:$0xf0] }
  0x2f   :  { %1867 = vmatpush.bf16.msra.mxu0 %v4960_v4  ;;  %v5631_v23 = vld [vmem:[#allocation7 + $0x600] sm:$0xf]  ;;  %v7363_v25 = vld [vmem:[#allocation7 + $0x62c] sm:$0xf0]  ;;  %v5248_v35 = vor.u32 %v7267_v22, %v5247_v21  ;;  %v5591_v37 = vld [vmem:[#allocation7 + $0x5a8] sm:$0xf]  ;;  %v5208_v43 = vor.u32 %v7256_v34, %v5207_v33 }
  0x30   :  { %1881 = vmatpush.bf16.msra.mxu1 %v5344_v5  ;;  %v5632_v36 = vor.u32 %v7363_v25, %v5631_v23  ;;  %v7352_v38 = vld [vmem:[#allocation7 + $0x5d4] sm:$0xf0]  ;;  %v7333_v41 = vld [vmem:[#allocation7 + $0x544] sm:$0xf]  ;;  %v5537_v44 = vld [vmem:[#allocation7 + $0x570] sm:$0xf0] }
  0x31   :  { %1895 = vmatpush.bf16.msra.mxu2 %v5728_v6  ;;  %1909 = vmatpush.bf16.msra.mxu3 %v4964_v10  ;;  %v7429_v45 = vld [vmem:[#allocation7 + $0x844] sm:$0xf]  ;;  %v5921_v46 = vld [vmem:[#allocation7 + $0x870] sm:$0xf0]  ;;  %v5592_v47 = vor.u32 %v7352_v38, %v5591_v37  ;;  %v5159_v48 = vld [vmem:[#allocation7 + $0x248] sm:$0xf]  ;;  %v5540_v54 = vor.u32 %v7333_v41, %v5537_v44 }
  0x32   :  { %v7244_v49 = vld [vmem:[#allocation7 + $0x274] sm:$0xf0]  ;;  %v5543_v50 = vld [vmem:[#allocation7 + $0x548] sm:$0xf]  ;;  %v97_v52 = vld [vmem:[#allocation4] sm:$0xff]  ;;  %v5924_v58 = vor.u32 %v7429_v45, %v5921_v46  ;;  %s7916_s3 = smov [#allocation13]  }
  0x33   :  { %1868 = vmatpush.bf16.msra.mxu0 %v4912_v16  ;;  %v7340_v51 = vld [vmem:[#allocation7 + $0x574] sm:$0xf0]  ;;  %v100_v53 = vld [vmem:[#allocation4 + $0x18] sm:$0xff]  ;;  %v7321_v55 = vld [vmem:[#allocation7 + $0x4e4] sm:$0xf]  ;;  %v5160_v59 = vor.u32 %v7244_v49, %v5159_v48  ;;  %s4844_s5 = sshll.u32 %s7916_s3, 4  ;;  %s4845_s5 = int_to_ptr.vmem [resolvable:$true] %s4844_s5 }
  0x34   :  { %1882 = vmatpush.bf16.msra.mxu1 %v5296_v19  ;;  %v5489_v56 = vld [vmem:[#allocation7 + $0x510] sm:$0xf0]  ;;  %v7970_v57 = vpack.c.bf16 %v100_v53, %v97_v52  ;;  %v7417_v60 = vld [vmem:[#allocation7 + $0x7e4] sm:$0xf]  ;;  %v5111_v62 = vld [vmem:[#allocation7 + $0x1e8] sm:$0xf]  ;;  %v5544_v63 = vor.u32 %v7340_v51, %v5543_v50 }
  0x35   :  { %1896 = vmatpush.bf16.msra.mxu2 %v5680_v20  ;;  %1910 = vmatpush.bf16.msra.mxu3 %v4916_v24  ;;  %v5873_v61 = vld [vmem:[#allocation7 + $0x810] sm:$0xf0]  ;;  %v7232_v0 = vld [vmem:[#allocation7 + $0x214] sm:$0xf0]  ;;  %v5495_v3 = vld [vmem:[#allocation7 + $0x4e8] sm:$0xf]  ;;  %v5492_v6 = vor.u32 %v7321_v55, %v5489_v56 }
  0x36   :  { %v98_v1 = vld [vmem:[#allocation4 + $0x8] sm:$0xff]  ;;  %v101_v2 = vld [vmem:[#allocation4 + $0x20] sm:$0xff]  ;;  %v7309_v7 = vld [vmem:[#allocation7 + $0x484] sm:$0xf]  ;;  %v5876_v9 = vor.u32 %v7417_v60, %v5873_v61  ;;  %v5112_v10 = vor.u32 %v7232_v0, %v5111_v62  ;;  %s4846_s25 = sshll.u32 %s8273_s6, 4  ;;  %s4847_s25 = int_to_ptr.hbm [resolvable:$true] %s4846_s25 }
  0x37   :  { %1869 = vmatpush.bf16.msra.mxu0 %v4864_v31  ;;  %v7328_v4 = vld [vmem:[#allocation7 + $0x514] sm:$0xf0]  ;;  %v7973_v5 = vpack.c.bf16 %v101_v2, %v98_v1  ;;  %v5441_v8 = vld [vmem:[#allocation7 + $0x4b0] sm:$0xf0]  ;;  %v7405_v11 = vld [vmem:[#allocation7 + $0x784] sm:$0xf] }
  0x38   :  { %1883 = vmatpush.bf16.msra.mxu1 %v5248_v35  ;;  %v5825_v12 = vld [vmem:[#allocation7 + $0x7b0] sm:$0xf0]  ;;  %v99_v13 = vld [vmem:[#allocation4 + $0x10] sm:$0xff]  ;;  %v5496_v14 = vor.u32 %v7328_v4, %v5495_v3  ;;  %v5063_v15 = vld [vmem:[#allocation7 + $0x188] sm:$0xf]  ;;  %v5444_v21 = vor.u32 %v7309_v7, %v5441_v8 }
  0x39   :  { %1897 = vmatpush.bf16.msra.mxu2 %v5632_v36  ;;  %1911 = vmatpush.bf16.msra.mxu3 %v4868_v39  ;;  %v7220_v16 = vld [vmem:[#allocation7 + $0x1b4] sm:$0xf0]  ;;  %v5447_v18 = vld [vmem:[#allocation7 + $0x488] sm:$0xf]  ;;  %v5828_v22 = vor.u32 %v7405_v11, %v5825_v12  ;;  %v7297_v24 = vld [vmem:[#allocation7 + $0x424] sm:$0xf] }
  0x3a   :  { %1870 = vmatmul.bf16.vlgmr.msra.gmra.mxu0 %v7970_v57  ;;  %v102_v17 = vld [vmem:[#allocation4 + $0x28] sm:$0xff]  ;;  %v5064_v23 = vor.u32 %v7220_v16, %v5063_v15  ;;  %v5393_v25 = vld [vmem:[#allocation7 + $0x450] sm:$0xf0]  ;;  %v7393_v26 = vld [vmem:[#allocation7 + $0x724] sm:$0xf] }
  0x3b   :  { %1918 = vmatpush.bf16.msrb.mxu0 %v5588_v40  ;;  %1884 = vmatmul.bf16.vlgmr.msra.gmra.mxu1 %v7973_v5  ;;  %v7316_v19 = vld [vmem:[#allocation7 + $0x4b4] sm:$0xf0]  ;;  %v7977_v20 = vpack.c.bf16 %v102_v17, %v99_v13  ;;  %v5777_v28 = vld [vmem:[#allocation7 + $0x750] sm:$0xf0]  ;;  %v5015_v29 = vld [vmem:[#allocation7 + $0x128] sm:$0xf]  ;;  %v5396_v33 = vor.u32 %v7297_v24, %v5393_v25 }
  0x3c   :  { %1932 = vmatpush.bf16.msrb.mxu1 %v5972_v42  ;;  %1912 = vmatmul.bf16.vlgmr.msra.gmra.mxu3 %v7970_v57  ;;  %v5448_v27 = vor.u32 %v7316_v19, %v5447_v18  ;;  %v7208_v30 = vld [vmem:[#allocation7 + $0x154] sm:$0xf0]  ;;  %v5399_v31 = vld [vmem:[#allocation7 + $0x428] sm:$0xf]  ;;  %v5780_v34 = vor.u32 %v7393_v26, %v5777_v28  ;;  %v7285_v36 = vld [vmem:[#allocation7 + $0x3c4] sm:$0xf] }
  0x3d   :  { %1946 = vmatpush.bf16.msrb.mxu2 %v5208_v43  ;;  %1960 = vmatpush.bf16.msrb.mxu3 %v5592_v47  ;;  %v7304_v32 = vld [vmem:[#allocation7 + $0x454] sm:$0xf0]  ;;  %v5016_v35 = vor.u32 %v7208_v30, %v5015_v29  ;;  %v5345_v37 = vld [vmem:[#allocation7 + $0x3f0] sm:$0xf0]  ;;  %v7381_v38 = vld [vmem:[#allocation7 + $0x6c4] sm:$0xf] }
  0x3e   :  { %1898 = vmatmul.bf16.vlgmr.msra.gmra.mxu2 %v7977_v20  ;;  %v5400_v39 = vor.u32 %v7304_v32, %v5399_v31  ;;  %v5729_v40 = vld [vmem:[#allocation7 + $0x6f0] sm:$0xf0]  ;;  %v4967_v41 = vld [vmem:[#allocation7 + $0xc8] sm:$0xf]  ;;  %v7196_v42 = vld [vmem:[#allocation7 + $0xf4] sm:$0xf0]  ;;  %v5348_v45 = vor.u32 %v7285_v36, %v5345_v37 }
  0x3f   :  { %1919 = vmatpush.bf16.msrb.mxu0 %v5540_v54  ;;  %v5351_v43 = vld [vmem:[#allocation7 + $0x3c8] sm:$0xf]  ;;  %v7292_v44 = vld [vmem:[#allocation7 + $0x3f4] sm:$0xf0]  ;;  %v5732_v46 = vor.u32 %v7381_v38, %v5729_v40  ;;  %v4968_v47 = vor.u32 %v7196_v42, %v4967_v41  ;;  %v7273_v48 = vld [vmem:[#allocation7 + $0x364] sm:$0xf] }
  0x40   :  { %1933 = vmatpush.bf16.msrb.mxu1 %v5924_v58  ;;  %v5297_v49 = vld [vmem:[#allocation7 + $0x390] sm:$0xf0]  ;;  %v7369_v50 = vld [vmem:[#allocation7 + $0x664] sm:$0xf]  ;;  %v5352_v51 = vor.u32 %v7292_v44, %v5351_v43  ;;  %v4919_v53 = vld [vmem:[#allocation7 + $0x68] sm:$0xf] }
  0x41   :  { %1947 = vmatpush.bf16.msrb.mxu2 %v5160_v59  ;;  %1961 = vmatpush.bf16.msrb.mxu3 %v5544_v63  ;;  %v5681_v52 = vld [vmem:[#allocation7 + $0x690] sm:$0xf0]  ;;  %v7184_v54 = vld [vmem:[#allocation7 + $0x94] sm:$0xf0]  ;;  %v5303_v55 = vld [vmem:[#allocation7 + $0x368] sm:$0xf]  ;;  %v5300_v58 = vor.u32 %v7273_v48, %v5297_v49 }
  0x42   :  { %v7280_v56 = vld [vmem:[#allocation7 + $0x394] sm:$0xf0]  ;;  %v7261_v59 = vld [vmem:[#allocation7 + $0x304] sm:$0xf]  ;;  %v5249_v60 = vld [vmem:[#allocation7 + $0x330] sm:$0xf0]  ;;  %v5684_v61 = vor.u32 %v7369_v50, %v5681_v52  ;;  %v4920_v62 = vor.u32 %v7184_v54, %v4919_v53 }
  0x43   :  { %1920 = vmatpush.bf16.msrb.mxu0 %v5492_v6  ;;  %v7357_v63 = vld [vmem:[#allocation7 + $0x604] sm:$0xf]  ;;  %v5633_v0 = vld [vmem:[#allocation7 + $0x630] sm:$0xf0]  ;;  %v4871_v1 = vld [vmem:[#allocation7 + $0x8] sm:$0xf]  ;;  %v5304_v2 = vor.u32 %v7280_v56, %v5303_v55 }
  0x44   :  { %1934 = vmatpush.bf16.msrb.mxu1 %v5876_v9  ;;  %v7172_v3 = vld [vmem:[#allocation7 + $0x34] sm:$0xf0]  ;;  %v5255_v4 = vld [vmem:[#allocation7 + $0x308] sm:$0xf]  ;;  %v7250_v9 = vld [vmem:[#allocation7 + $0x2ac] sm:$0xf] }
  0x45   :  { %1948 = vmatpush.bf16.msrb.mxu2 %v5112_v10  ;;  %1962 = vmatpush.bf16.msrb.mxu3 %v5496_v14  ;;  %v7268_v6 = vld [vmem:[#allocation7 + $0x334] sm:$0xf0]  ;;  %v5975_v7 = vld [vmem:[#allocation7 + $0x8a8] sm:$0xf]  ;;  %v5252_v10 = vor.u32 %v7261_v59, %v5249_v60  ;;  %v5209_v11 = vld [vmem:[#allocation7 + $0x2d8] sm:$0xf0]  ;;  %v5636_v14 = vor.u32 %v7357_v63, %v5633_v0  ;;  %v4872_v15 = vor.u32 %v7172_v3, %v4871_v1 }
  0x46   :  { %v7448_v8 = vld [vmem:[#allocation7 + $0x8d4] sm:$0xf0]  ;;  %v7346_v12 = vld [vmem:[#allocation7 + $0x5ac] sm:$0xf]  ;;  %v5593_v13 = vld [vmem:[#allocation7 + $0x5d8] sm:$0xf0]  ;;  %v5256_v18 = vor.u32 %v7268_v6, %v5255_v4 }
  0x47   :  { %1921 = vmatpush.bf16.msrb.mxu0 %v5444_v21  ;;  %v7442_v16 = vld [vmem:[#allocation7 + $0x8ac] sm:$0xf]  ;;  %v5977_v17 = vld [vmem:[#allocation7 + $0x8d8] sm:$0xf0]  ;;  %v5976_v19 = vor.u32 %v7448_v8, %v5975_v7  ;;  %v5212_v21 = vor.u32 %v7250_v9, %v5209_v11  ;;  %v7436_v24 = vld [vmem:[#allocation7 + $0x874] sm:$0xf0] }
  0x48   :  { %1935 = vmatpush.bf16.msrb.mxu1 %v5828_v22  ;;  %v5596_v22 = vor.u32 %v7346_v12, %v5593_v13  ;;  %v7238_v25 = vld [vmem:[#allocation7 + $0x24c] sm:$0xf]  ;;  %v5980_v26 = vor.u32 %v7442_v16, %v5977_v17  ;;  %v5545_v29 = vld [vmem:[#allocation7 + $0x578] sm:$0xf0]  ;;  %v7424_v36 = vld [vmem:[#allocation7 + $0x814] sm:$0xf0] }
  0x49   :  { %1949 = vmatpush.bf16.msrb.mxu2 %v5064_v23  ;;  %1963 = vmatpush.bf16.msrb.mxu3 %v5448_v27  ;;  %v5927_v23 = vld [vmem:[#allocation7 + $0x848] sm:$0xf]  ;;  %v5161_v27 = vld [vmem:[#allocation7 + $0x278] sm:$0xf0]  ;;  %v7334_v28 = vld [vmem:[#allocation7 + $0x54c] sm:$0xf] }
  0x4a   :  { %v7430_v30 = vld [vmem:[#allocation7 + $0x84c] sm:$0xf]  ;;  %v5929_v31 = vld [vmem:[#allocation7 + $0x878] sm:$0xf0]  ;;  %v5928_v32 = vor.u32 %v7436_v24, %v5927_v23  ;;  %v7412_v48 = vld [vmem:[#allocation7 + $0x7b4] sm:$0xf0] }
  0x4b   :  { %1922 = vmatpush.bf16.msrb.mxu0 %v5396_v33  ;;  %v5164_v33 = vor.u32 %v7238_v25, %v5161_v27  ;;  %v7226_v37 = vld [vmem:[#allocation7 + $0x1ec] sm:$0xf]  ;;  %v5932_v38 = vor.u32 %v7430_v30, %v5929_v31  ;;  %v5497_v41 = vld [vmem:[#allocation7 + $0x518] sm:$0xf0]  ;;  %v5783_v60 = vld [vmem:[#allocation7 + $0x728] sm:$0xf] }
  0x4c   :  { %1936 = vmatpush.bf16.msrb.mxu1 %v5780_v34  ;;  %v5548_v34 = vor.u32 %v7334_v28, %v5545_v29  ;;  %v7322_v40 = vld [vmem:[#allocation7 + $0x4ec] sm:$0xf]  ;;  %v5881_v43 = vld [vmem:[#allocation7 + $0x818] sm:$0xf0]  ;;  %v5735_v9 = vld [vmem:[#allocation7 + $0x6c8] sm:$0xf] }
  0x4d   :  { %1950 = vmatpush.bf16.msrb.mxu2 %v5016_v35  ;;  %1964 = vmatpush.bf16.msrb.mxu3 %v5400_v39  ;;  %v5879_v35 = vld [vmem:[#allocation7 + $0x7e8] sm:$0xf]  ;;  %v5113_v39 = vld [vmem:[#allocation7 + $0x218] sm:$0xf0]  ;;  %v7418_v42 = vld [vmem:[#allocation7 + $0x7ec] sm:$0xf] }
  0x4e   :  { %v5880_v44 = vor.u32 %v7424_v36, %v5879_v35  ;;  %v7214_v49 = vld [vmem:[#allocation7 + $0x18c] sm:$0xf]  ;;  %v5884_v50 = vor.u32 %v7418_v42, %v5881_v43  ;;  %v5449_v53 = vld [vmem:[#allocation7 + $0x4b8] sm:$0xf0]  ;;  %v7376_v23 = vld [vmem:[#allocation7 + $0x694] sm:$0xf0] }
  0x4f   :  { %1923 = vmatpush.bf16.msrb.mxu0 %v5348_v45  ;;  %v5116_v45 = vor.u32 %v7226_v37, %v5113_v39  ;;  %v7310_v52 = vld [vmem:[#allocation7 + $0x48c] sm:$0xf]  ;;  %v5833_v55 = vld [vmem:[#allocation7 + $0x7b8] sm:$0xf0]  ;;  %v5215_v43 = vld [vmem:[#allocation7 + $0x2b0] sm:$0xf] }
  0x50   :  { %1937 = vmatpush.bf16.msrb.mxu1 %v5732_v46  ;;  %v5500_v46 = vor.u32 %v7322_v40, %v5497_v41  ;;  %v7406_v54 = vld [vmem:[#allocation7 + $0x78c] sm:$0xf]  ;;  %v5452_v59 = vor.u32 %v7310_v52, %v5449_v53  ;;  %v5017_v0 = vld [vmem:[#allocation7 + $0x158] sm:$0xf0]  ;;  %v7251_v52 = vld [vmem:[#allocation7 + $0x2b4] sm:$0xf] }
  0x51   :  { %1951 = vmatpush.bf16.msrb.mxu2 %v4968_v47  ;;  %1965 = vmatpush.bf16.msrb.mxu3 %v5352_v51  ;;  %v5831_v47 = vld [vmem:[#allocation7 + $0x788] sm:$0xf]  ;;  %v5065_v51 = vld [vmem:[#allocation7 + $0x1b8] sm:$0xf0]  ;;  %v5836_v63 = vor.u32 %v7406_v54, %v5833_v55  ;;  %v7298_v1 = vld [vmem:[#allocation7 + $0x42c] sm:$0xf] }
  0x52   :  { %v5832_v56 = vor.u32 %v7412_v48, %v5831_v47  ;;  %v7394_v3 = vld [vmem:[#allocation7 + $0x72c] sm:$0xf]  ;;  %v5785_v4 = vld [vmem:[#allocation7 + $0x758] sm:$0xf0]  ;;  %v7353_v47 = vld [vmem:[#allocation7 + $0x5dc] sm:$0xf0] }
  0x53   :  { %1924 = vmatpush.bf16.msrb.mxu0 %v5300_v58  ;;  %v5068_v58 = vor.u32 %v7214_v49, %v5065_v51  ;;  %v7190_v11 = vld [vmem:[#allocation7 + $0xcc] sm:$0xf]  ;;  %v5788_v12 = vor.u32 %v7394_v3, %v5785_v4  ;;  %v4969_v13 = vld [vmem:[#allocation7 + $0xf8] sm:$0xf0]  ;;  %v5983_v48 = vld [vmem:[#allocation7 + $0x8b0] sm:$0xf] }
  0x54   :  { %1938 = vmatpush.bf16.msrb.mxu1 %v5684_v61  ;;  %v7400_v61 = vld [vmem:[#allocation7 + $0x754] sm:$0xf0]  ;;  %v7382_v16 = vld [vmem:[#allocation7 + $0x6cc] sm:$0xf]  ;;  %v5737_v17 = vld [vmem:[#allocation7 + $0x6f8] sm:$0xf0] }
  0x55   :  { %1952 = vmatpush.bf16.msrb.mxu2 %v4920_v62  ;;  %1966 = vmatpush.bf16.msrb.mxu3 %v5304_v2  ;;  %v7202_v62 = vld [vmem:[#allocation7 + $0x12c] sm:$0xf]  ;;  %v5401_v2 = vld [vmem:[#allocation7 + $0x458] sm:$0xf0]  ;;  %v5784_v6 = vor.u32 %v7400_v61, %v5783_v60  ;;  %v5740_v25 = vor.u32 %v7382_v16, %v5737_v17  ;;  %v7449_v49 = vld [vmem:[#allocation7 + $0x8dc] sm:$0xf0] }
  0x56   :  { %v5020_v7 = vor.u32 %v7202_v62, %v5017_v0  ;;  %v5404_v8 = vor.u32 %v7298_v1, %v5401_v2  ;;  %v7178_v24 = vld [vmem:[#allocation7 + $0x6c] sm:$0xf]  ;;  %v5305_v28 = vld [vmem:[#allocation7 + $0x398] sm:$0xf0]  ;;  %v5217_v53 = vld [vmem:[#allocation7 + $0x2e0] sm:$0xf0] }
  0x57   :  { %1925 = vmatpush.bf16.msrb.mxu0 %v5252_v10  ;;  %v7388_v10 = vld [vmem:[#allocation7 + $0x6f4] sm:$0xf0]  ;;  %v7274_v27 = vld [vmem:[#allocation7 + $0x36c] sm:$0xf]  ;;  %v5689_v30 = vld [vmem:[#allocation7 + $0x698] sm:$0xf0]  ;;  %v5220_v62 = vor.u32 %v7251_v52, %v5217_v53 }
  0x58   :  { %1939 = vmatpush.bf16.msrb.mxu1 %v5636_v14  ;;  %v7286_v14 = vld [vmem:[#allocation7 + $0x3cc] sm:$0xf]  ;;  %v5308_v35 = vor.u32 %v7274_v27, %v5305_v28  ;;  %v4873_v37 = vld [vmem:[#allocation7 + $0x38] sm:$0xf0]  ;;  %v7245_v60 = vld [vmem:[#allocation7 + $0x27c] sm:$0xf0] }
  0x59   :  { %1953 = vmatpush.bf16.msrb.mxu2 %v4872_v15  ;;  %1967 = vmatpush.bf16.msrb.mxu3 %v5256_v18  ;;  %v5353_v15 = vld [vmem:[#allocation7 + $0x3f8] sm:$0xf0]  ;;  %v5736_v18 = vor.u32 %v7388_v10, %v5735_v9  ;;  %v7370_v29 = vld [vmem:[#allocation7 + $0x66c] sm:$0xf]  ;;  %v5551_v61 = vld [vmem:[#allocation7 + $0x550] sm:$0xf] }
  0x5a   :  { %1926 = vmatmul.bf16.vlgmr.msrb.gmra.mxu0 %v7973_v5  ;;  %v7166_v36 = vld [vmem:[#allocation7 + $0xc] sm:$0xf]  ;;  %v5692_v39 = vor.u32 %v7370_v29, %v5689_v30  ;;  %v5257_v40 = vld [vmem:[#allocation7 + $0x338] sm:$0xf0]  ;;  %v5935_v0 = vld [vmem:[#allocation7 + $0x850] sm:$0xf] }
  0x5b   :  { %1974 = vmatpush.bf16.msra.mxu0 %v5976_v19  ;;  %1940 = vmatmul.bf16.vlgmr.msrb.gmra.mxu1 %v7977_v20  ;;  %v4972_v19 = vor.u32 %v7190_v11, %v4969_v13  ;;  %v7358_v41 = vld [vmem:[#allocation7 + $0x60c] sm:$0xf]  ;;  %v5641_v42 = vld [vmem:[#allocation7 + $0x638] sm:$0xf0]  ;;  %v7437_v1 = vld [vmem:[#allocation7 + $0x87c] sm:$0xf0] }
  0x5c   :  { %1988 = vmatpush.bf16.msra.mxu1 %v5212_v21  ;;  %1954 = vmatmul.bf16.vlgmr.msrb.gmra.mxu2 %v7970_v57  ;;  %v5356_v21 = vor.u32 %v7286_v14, %v5353_v15  ;;  %v5644_v54 = vor.u32 %v7358_v41, %v5641_v42  ;;  %v7239_v2 = vld [vmem:[#allocation7 + $0x254] sm:$0xf]  ;;  %v5169_v3 = vld [vmem:[#allocation7 + $0x280] sm:$0xf0]  ;;  %v7233_v9 = vld [vmem:[#allocation7 + $0x21c] sm:$0xf0] }
  0x5d   :  { %2002 = vmatpush.bf16.msra.mxu2 %v5596_v22  ;;  %2016 = vmatpush.bf16.msra.mxu3 %v5980_v26  ;;  %v5687_v22 = vld [vmem:[#allocation7 + $0x668] sm:$0xf]  ;;  %v4921_v26 = vld [vmem:[#allocation7 + $0x98] sm:$0xf0]  ;;  %v5503_v10 = vld [vmem:[#allocation7 + $0x4f0] sm:$0xf]  ;;  %v5172_v11 = vor.u32 %v7239_v2, %v5169_v3 }
  0x5e   :  { %1968 = vmatmul.bf16.vlgmr.msrb.gmra.mxu3 %v7973_v5  ;;  %v5688_v31 = vor.u32 %v7376_v23, %v5687_v22  ;;  %v5887_v13 = vld [vmem:[#allocation7 + $0x7f0] sm:$0xf]  ;;  %v7425_v14 = vld [vmem:[#allocation7 + $0x81c] sm:$0xf0]  ;;  %v7227_v15 = vld [vmem:[#allocation7 + $0x1f4] sm:$0xf] }
  0x5f   :  { %1975 = vmatpush.bf16.msra.mxu0 %v5928_v32  ;;  %v5639_v32 = vld [vmem:[#allocation7 + $0x608] sm:$0xf]  ;;  %v5121_v16 = vld [vmem:[#allocation7 + $0x220] sm:$0xf0]  ;;  %v7221_v22 = vld [vmem:[#allocation7 + $0x1bc] sm:$0xf0] }
  0x60   :  { %1989 = vmatpush.bf16.msra.mxu1 %v5164_v33  ;;  %v7364_v33 = vld [vmem:[#allocation7 + $0x634] sm:$0xf0]  ;;  %v5455_v23 = vld [vmem:[#allocation7 + $0x490] sm:$0xf]  ;;  %v7413_v27 = vld [vmem:[#allocation7 + $0x7bc] sm:$0xf0] }
  0x61   :  { %2003 = vmatpush.bf16.msra.mxu2 %v5548_v34  ;;  %2017 = vmatpush.bf16.msra.mxu3 %v5932_v38  ;;  %v4924_v34 = vor.u32 %v7178_v24, %v4921_v26  ;;  %v7262_v38 = vld [vmem:[#allocation7 + $0x30c] sm:$0xf]  ;;  %v5124_v24 = vor.u32 %v7227_v15, %v5121_v16  ;;  %v5839_v26 = vld [vmem:[#allocation7 + $0x790] sm:$0xf]  ;;  %v7215_v28 = vld [vmem:[#allocation7 + $0x194] sm:$0xf] }
  0x62   :  { %v5260_v51 = vor.u32 %v7262_v38, %v5257_v40  ;;  %v5073_v29 = vld [vmem:[#allocation7 + $0x1c0] sm:$0xf0]  ;;  %v5791_v38 = vld [vmem:[#allocation7 + $0x730] sm:$0xf]  ;;  %v7203_v40 = vld [vmem:[#allocation7 + $0x134] sm:$0xf] }
  0x63   :  { %1976 = vmatpush.bf16.msra.mxu0 %v5880_v44  ;;  %v7257_v44 = vld [vmem:[#allocation7 + $0x2dc] sm:$0xf0]  ;;  %v5025_v41 = vld [vmem:[#allocation7 + $0x160] sm:$0xf0]  ;;  %v7191_v52 = vld [vmem:[#allocation7 + $0xd4] sm:$0xf] }
  0x64   :  { %1990 = vmatpush.bf16.msra.mxu1 %v5116_v45  ;;  %v5599_v45 = vld [vmem:[#allocation7 + $0x5b0] sm:$0xf]  ;;  %v5216_v55 = vor.u32 %v7257_v44, %v5215_v43  ;;  %v4977_v53 = vld [vmem:[#allocation7 + $0x100] sm:$0xf0]  ;;  %v7347_v16 = vld [vmem:[#allocation7 + $0x5b4] sm:$0xf] }
  0x65   :  { %2004 = vmatpush.bf16.msra.mxu2 %v5500_v46  ;;  %2018 = vmatpush.bf16.msra.mxu3 %v5884_v50  ;;  %v5640_v46 = vor.u32 %v7364_v33, %v5639_v32  ;;  %v4876_v50 = vor.u32 %v7166_v36, %v4873_v37  ;;  %v5840_v32 = vor.u32 %v7413_v27, %v5839_v26  ;;  %v5023_v33 = vld [vmem:[#allocation7 + $0x130] sm:$0xf]  ;;  %v7305_v37 = vld [vmem:[#allocation7 + $0x45c] sm:$0xf0]  ;;  %v4929_v2 = vld [vmem:[#allocation7 + $0xa0] sm:$0xf0] }
  0x66   :  { %v5076_v36 = vor.u32 %v7215_v28, %v5073_v29  ;;  %v4881_v15 = vld [vmem:[#allocation7 + $0x40] sm:$0xf0]  ;;  %v5607_v26 = vld [vmem:[#allocation7 + $0x5b8] sm:$0xf]  ;;  %v7354_v27 = vld [vmem:[#allocation7 + $0x5e4] sm:$0xf0] }
  0x67   :  { %1977 = vmatpush.bf16.msra.mxu0 %v5832_v56  ;;  %v5600_v56 = vor.u32 %v7353_v47, %v5599_v45  ;;  %v4975_v45 = vld [vmem:[#allocation7 + $0xd0] sm:$0xf] }
  0x68   :  { %1991 = vmatpush.bf16.msra.mxu1 %v5068_v58  ;;  %v5984_v58 = vor.u32 %v7449_v49, %v5983_v48  ;;  %v5359_v47 = vld [vmem:[#allocation7 + $0x3d0] sm:$0xf]  ;;  %v5028_v48 = vor.u32 %v7203_v40, %v5025_v41  ;;  %v7293_v49 = vld [vmem:[#allocation7 + $0x3fc] sm:$0xf0]  ;;  %v7342_v40 = vld [vmem:[#allocation7 + $0x584] sm:$0xf0] }
  0x69   :  { %2005 = vmatpush.bf16.msra.mxu2 %v5452_v59  ;;  %2019 = vmatpush.bf16.msra.mxu3 %v5836_v63  ;;  %v5167_v59 = vld [vmem:[#allocation7 + $0x250] sm:$0xf]  ;;  %v7341_v63 = vld [vmem:[#allocation7 + $0x57c] sm:$0xf0] }
  0x6a   :  { %v5168_v4 = vor.u32 %v7245_v60, %v5167_v59  ;;  %v7185_v59 = vld [vmem:[#allocation7 + $0x9c] sm:$0xf0]  ;;  %v5311_v60 = vld [vmem:[#allocation7 + $0x370] sm:$0xf] }
  0x6b   :  { %1978 = vmatpush.bf16.msra.mxu0 %v5784_v6  ;;  %v5552_v6 = vor.u32 %v7341_v63, %v5551_v61  ;;  %v4980_v61 = vor.u32 %v7191_v52, %v4977_v53  ;;  %v5695_v63 = vld [vmem:[#allocation7 + $0x670] sm:$0xf]  ;;  %v7330_v52 = vld [vmem:[#allocation7 + $0x524] sm:$0xf0] }
  0x6c   :  { %1992 = vmatpush.bf16.msra.mxu1 %v5020_v7  ;;  %v5936_v7 = vor.u32 %v7437_v1, %v5935_v0  ;;  %v7377_v0 = vld [vmem:[#allocation7 + $0x69c] sm:$0xf0]  ;;  %v7179_v1 = vld [vmem:[#allocation7 + $0x74] sm:$0xf] }
  0x6d   :  { %2006 = vmatpush.bf16.msra.mxu2 %v5404_v8  ;;  %2020 = vmatpush.bf16.msra.mxu3 %v5788_v12  ;;  %v5119_v8 = vld [vmem:[#allocation7 + $0x1f0] sm:$0xf]  ;;  %v7329_v12 = vld [vmem:[#allocation7 + $0x51c] sm:$0xf0] }
  0x6e   :  { %v5120_v17 = vor.u32 %v7233_v9, %v5119_v8  ;;  %v5696_v8 = vor.u32 %v7377_v0, %v5695_v63  ;;  %v5263_v9 = vld [vmem:[#allocation7 + $0x310] sm:$0xf]  ;;  %v7222_v63 = vld [vmem:[#allocation7 + $0x1c4] sm:$0xf0]  ;;  %v5463_v0 = vld [vmem:[#allocation7 + $0x498] sm:$0xf] }
  0x6f   :  { %1979 = vmatpush.bf16.msra.mxu0 %v5736_v18  ;;  %v5504_v18 = vor.u32 %v7329_v12, %v5503_v10  ;;  %v7269_v10 = vld [vmem:[#allocation7 + $0x33c] sm:$0xf0]  ;;  %v4932_v12 = vor.u32 %v7179_v1, %v4929_v2  ;;  %v7318_v1 = vld [vmem:[#allocation7 + $0x4c4] sm:$0xf0] }
  0x70   :  { %1993 = vmatpush.bf16.msra.mxu1 %v4972_v19  ;;  %v5888_v19 = vor.u32 %v7425_v14, %v5887_v13  ;;  %v7365_v13 = vld [vmem:[#allocation7 + $0x63c] sm:$0xf0]  ;;  %v7167_v14 = vld [vmem:[#allocation7 + $0x14] sm:$0xf] }
  0x71   :  { %2007 = vmatpush.bf16.msra.mxu2 %v5356_v21  ;;  %2021 = vmatpush.bf16.msra.mxu3 %v5740_v25  ;;  %v5071_v21 = vld [vmem:[#allocation7 + $0x190] sm:$0xf]  ;;  %v7317_v25 = vld [vmem:[#allocation7 + $0x4bc] sm:$0xf0]  ;;  %v4884_v28 = vor.u32 %v7167_v14, %v4881_v15  ;;  %v7306_v14 = vld [vmem:[#allocation7 + $0x464] sm:$0xf0] }
  0x72   :  { %v5072_v30 = vor.u32 %v7221_v22, %v5071_v21  ;;  %v5985_v21 = vld [vmem:[#allocation7 + $0x8e0] sm:$0xf0]  ;;  %v5223_v22 = vld [vmem:[#allocation7 + $0x2b8] sm:$0xf] }
  0x73   :  { %1980 = vmatpush.bf16.msra.mxu0 %v5688_v31  ;;  %v5456_v31 = vor.u32 %v7317_v25, %v5455_v23  ;;  %v7258_v23 = vld [vmem:[#allocation7 + $0x2e4] sm:$0xf0] }
  0x74   :  { %1994 = vmatpush.bf16.msra.mxu1 %v4924_v34  ;;  %v7209_v34 = vld [vmem:[#allocation7 + $0x15c] sm:$0xf0] }
  0x75   :  { %2008 = vmatpush.bf16.msra.mxu2 %v5308_v35  ;;  %2022 = vmatpush.bf16.msra.mxu3 %v5692_v39  ;;  %v5407_v35 = vld [vmem:[#allocation7 + $0x430] sm:$0xf]  ;;  %v7401_v39 = vld [vmem:[#allocation7 + $0x75c] sm:$0xf0]  ;;  %v5024_v42 = vor.u32 %v7209_v34, %v5023_v33  ;;  %v5553_v33 = vld [vmem:[#allocation7 + $0x580] sm:$0xf0] }
  0x76   :  { %v5408_v43 = vor.u32 %v7305_v37, %v5407_v35  ;;  %v5792_v44 = vor.u32 %v7401_v39, %v5791_v38  ;;  %v7431_v34 = vld [vmem:[#allocation7 + $0x854] sm:$0xf]  ;;  %v5608_v35 = vor.u32 %v7354_v27, %v5607_v26  ;;  %v5175_v37 = vld [vmem:[#allocation7 + $0x258] sm:$0xf]  ;;  %v7246_v38 = vld [vmem:[#allocation7 + $0x284] sm:$0xf0] }
  0x77   :  { %1981 = vmatpush.bf16.msra.mxu0 %v5640_v46  ;;  %v7197_v46 = vld [vmem:[#allocation7 + $0xfc] sm:$0xf0]  ;;  %v5559_v39 = vld [vmem:[#allocation7 + $0x558] sm:$0xf]  ;;  %v7294_v27 = vld [vmem:[#allocation7 + $0x404] sm:$0xf0] }
  0x78   :  { %1995 = vmatpush.bf16.msra.mxu1 %v4876_v50  ;;  %v5743_v50 = vld [vmem:[#allocation7 + $0x6d0] sm:$0xf]  ;;  %v5367_v26 = vld [vmem:[#allocation7 + $0x3d8] sm:$0xf] }
  0x79   :  { %2009 = vmatpush.bf16.msra.mxu2 %v5260_v51  ;;  %2023 = vmatpush.bf16.msra.mxu3 %v5644_v54  ;;  %v7389_v51 = vld [vmem:[#allocation7 + $0x6fc] sm:$0xf0]  ;;  %v4976_v54 = vor.u32 %v7197_v46, %v4975_v45  ;;  %v5505_v45 = vld [vmem:[#allocation7 + $0x520] sm:$0xf0]  ;;  %v7419_v46 = vld [vmem:[#allocation7 + $0x7f4] sm:$0xf] }
  0x7a   :  { %1982 = vmatmul.bf16.vlgmr.msra.gmra.mxu0 %v7977_v20 }
  0x7b   :  { %2030 = vmatpush.bf16.msrb.mxu0 %v5216_v55  ;;  %1996 = vmatmul.bf16.vlgmr.msra.gmra.mxu1 %v7970_v57  ;;  %v5360_v55 = vor.u32 %v7293_v49, %v5359_v47  ;;  %v5560_v47 = vor.u32 %v7342_v40, %v5559_v39  ;;  %v5127_v49 = vld [vmem:[#allocation7 + $0x1f8] sm:$0xf]  ;;  %v7282_v39 = vld [vmem:[#allocation7 + $0x3a4] sm:$0xf0] }
  0x7c   :  { %2044 = vmatpush.bf16.msrb.mxu1 %v5600_v56  ;;  %2010 = vmatmul.bf16.vlgmr.msra.gmra.mxu2 %v7973_v5  ;;  %v5744_v56 = vor.u32 %v7389_v51, %v5743_v50  ;;  %v7234_v50 = vld [vmem:[#allocation7 + $0x224] sm:$0xf0]  ;;  %v5511_v51 = vld [vmem:[#allocation7 + $0x4f8] sm:$0xf] }
  0x7d   :  { %2058 = vmatpush.bf16.msrb.mxu2 %v5984_v58  ;;  %2072 = vmatpush.bf16.msrb.mxu3 %v5220_v62  ;;  %v4927_v58 = vld [vmem:[#allocation7 + $0x70] sm:$0xf]  ;;  %v7281_v62 = vld [vmem:[#allocation7 + $0x39c] sm:$0xf0] }
  0x7e   :  { %2024 = vmatmul.bf16.vlgmr.msra.gmra.mxu3 %v7977_v20  ;;  %v4928_v3 = vor.u32 %v7185_v59, %v4927_v58  ;;  %v5457_v58 = vld [vmem:[#allocation7 + $0x4c0] sm:$0xf0]  ;;  %v7407_v59 = vld [vmem:[#allocation7 + $0x794] sm:$0xf] }
  0x7f   :  { %2031 = vmatpush.bf16.msrb.mxu0 %v5168_v4  ;;  %v4879_v4 = vld [vmem:[#allocation7 + $0x10] sm:$0xf] }
  0x80   :  { %2045 = vmatpush.bf16.msrb.mxu1 %v5552_v6  ;;  %v7173_v6 = vld [vmem:[#allocation7 + $0x3c] sm:$0xf0] }
  0x81   :  { %2059 = vmatpush.bf16.msrb.mxu2 %v5936_v7  ;;  %2073 = vmatpush.bf16.msrb.mxu3 %v5172_v11  ;;  %v5312_v7 = vor.u32 %v7281_v62, %v5311_v60  ;;  %v5647_v11 = vld [vmem:[#allocation7 + $0x610] sm:$0xf]  ;;  %v5512_v60 = vor.u32 %v7330_v52, %v5511_v51  ;;  %v5079_v62 = vld [vmem:[#allocation7 + $0x198] sm:$0xf]  ;;  %v7270_v51 = vld [vmem:[#allocation7 + $0x344] sm:$0xf0] }
  0x82   :  { %v5648_v25 = vor.u32 %v7365_v13, %v5647_v11  ;;  %v5031_v11 = vld [vmem:[#allocation7 + $0x138] sm:$0xf] }
  0x83   :  { %2032 = vmatpush.bf16.msrb.mxu0 %v5120_v17  ;;  %v5601_v17 = vld [vmem:[#allocation7 + $0x5e0] sm:$0xf0]  ;;  %v5415_v13 = vld [vmem:[#allocation7 + $0x438] sm:$0xf] }
  0x84   :  { %2046 = vmatpush.bf16.msrb.mxu1 %v5504_v18  ;;  %v7443_v18 = vld [vmem:[#allocation7 + $0x8b4] sm:$0xf]  ;;  %v5604_v29 = vor.u32 %v7347_v16, %v5601_v17  ;;  %v5991_v52 = vld [vmem:[#allocation7 + $0x8b8] sm:$0xf] }
  0x85   :  { %2060 = vmatpush.bf16.msrb.mxu2 %v5888_v19  ;;  %2074 = vmatpush.bf16.msrb.mxu3 %v5124_v24  ;;  %v4880_v19 = vor.u32 %v7173_v6, %v4879_v4  ;;  %v5264_v24 = vor.u32 %v7269_v10, %v5263_v9  ;;  %v5080_v4 = vor.u32 %v7222_v63, %v5079_v62  ;;  %v7299_v6 = vld [vmem:[#allocation7 + $0x434] sm:$0xf]  ;;  %v5793_v10 = vld [vmem:[#allocation7 + $0x760] sm:$0xf0]  ;;  %v7444_v62 = vld [vmem:[#allocation7 + $0x8bc] sm:$0xf] }
  0x86   :  { %v5464_v9 = vor.u32 %v7318_v1, %v5463_v0  ;;  %v5993_v63 = vld [vmem:[#allocation7 + $0x8e8] sm:$0xf0] }
  0x87   :  { %2033 = vmatpush.bf16.msrb.mxu0 %v5072_v30  ;;  %v5988_v30 = vor.u32 %v7443_v18, %v5985_v21  ;;  %v7287_v18 = vld [vmem:[#allocation7 + $0x3d4] sm:$0xf] }
  0x88   :  { %2047 = vmatpush.bf16.msrb.mxu1 %v5456_v31  ;;  %v5224_v31 = vor.u32 %v7258_v23, %v5223_v22  ;;  %v7383_v21 = vld [vmem:[#allocation7 + $0x6d4] sm:$0xf]  ;;  %v5416_v22 = vor.u32 %v7306_v14, %v5415_v13  ;;  %v5745_v23 = vld [vmem:[#allocation7 + $0x700] sm:$0xf0]  ;;  %v5945_v13 = vld [vmem:[#allocation7 + $0x888] sm:$0xf0] }
  0x89   :  { %2061 = vmatpush.bf16.msrb.mxu2 %v5840_v32  ;;  %2075 = vmatpush.bf16.msrb.mxu3 %v5076_v36  ;;  %v7335_v32 = vld [vmem:[#allocation7 + $0x554] sm:$0xf]  ;;  %v5937_v36 = vld [vmem:[#allocation7 + $0x880] sm:$0xf0] }
  0x8a   :  { %v5556_v41 = vor.u32 %v7335_v32, %v5553_v33  ;;  %v5313_v32 = vld [vmem:[#allocation7 + $0x3a0] sm:$0xf0]  ;;  %v7371_v33 = vld [vmem:[#allocation7 + $0x674] sm:$0xf] }
  0x8b   :  { %2034 = vmatpush.bf16.msrb.mxu0 %v5024_v42  ;;  %v5940_v42 = vor.u32 %v7431_v34, %v5937_v36  ;;  %v5368_v34 = vor.u32 %v7294_v27, %v5367_v26  ;;  %v4935_v36 = vld [vmem:[#allocation7 + $0x78] sm:$0xf]  ;;  %v5897_v26 = vld [vmem:[#allocation7 + $0x828] sm:$0xf0] }
  0x8c   :  { %2048 = vmatpush.bf16.msrb.mxu1 %v5408_v43  ;;  %v5176_v43 = vor.u32 %v7246_v38, %v5175_v37  ;;  %v7186_v37 = vld [vmem:[#allocation7 + $0xa4] sm:$0xf0]  ;;  %v5319_v38 = vld [vmem:[#allocation7 + $0x378] sm:$0xf] }
  0x8d   :  { %2062 = vmatpush.bf16.msrb.mxu2 %v5792_v44  ;;  %2076 = vmatpush.bf16.msrb.mxu3 %v5028_v48  ;;  %v7323_v44 = vld [vmem:[#allocation7 + $0x4f4] sm:$0xf]  ;;  %v5889_v48 = vld [vmem:[#allocation7 + $0x820] sm:$0xf0] }
  0x8e   :  { %v5508_v53 = vor.u32 %v7323_v44, %v5505_v45  ;;  %v4936_v44 = vor.u32 %v7186_v37, %v4935_v36  ;;  %v7359_v45 = vld [vmem:[#allocation7 + $0x614] sm:$0xf]  ;;  %v5465_v36 = vld [vmem:[#allocation7 + $0x4c8] sm:$0xf0]  ;;  %v7408_v37 = vld [vmem:[#allocation7 + $0x79c] sm:$0xf] }
  0x8f   :  { %2035 = vmatpush.bf16.msrb.mxu0 %v4976_v54  ;;  %v5892_v54 = vor.u32 %v7419_v46, %v5889_v48  ;;  %v5649_v46 = vld [vmem:[#allocation7 + $0x640] sm:$0xf0]  ;;  %v5320_v48 = vor.u32 %v7282_v39, %v5319_v38  ;;  %v5849_v38 = vld [vmem:[#allocation7 + $0x7c8] sm:$0xf0] }
  0x90   :  { %2049 = vmatpush.bf16.msrb.mxu1 %v5360_v55  ;;  %v5128_v55 = vor.u32 %v7234_v50, %v5127_v49  ;;  %v7174_v49 = vld [vmem:[#allocation7 + $0x44] sm:$0xf0]  ;;  %v5271_v50 = vld [vmem:[#allocation7 + $0x318] sm:$0xf] }
  0x91   :  { %2063 = vmatpush.bf16.msrb.mxu2 %v5744_v56  ;;  %2077 = vmatpush.bf16.msrb.mxu3 %v4980_v61  ;;  %v7311_v56 = vld [vmem:[#allocation7 + $0x494] sm:$0xf]  ;;  %v5841_v61 = vld [vmem:[#allocation7 + $0x7c0] sm:$0xf0]  ;;  %v5272_v0 = vor.u32 %v7270_v51, %v5271_v50  ;;  %v5801_v50 = vld [vmem:[#allocation7 + $0x768] sm:$0xf0] }
  0x92   :  { %v5460_v2 = vor.u32 %v7311_v56, %v5457_v58  ;;  %v5225_v56 = vld [vmem:[#allocation7 + $0x2e8] sm:$0xf0]  ;;  %v7348_v58 = vld [vmem:[#allocation7 + $0x5bc] sm:$0xf] }
  0x93   :  { %2036 = vmatpush.bf16.msrb.mxu0 %v4928_v3  ;;  %v5844_v3 = vor.u32 %v7407_v59, %v5841_v61  ;;  %v5609_v59 = vld [vmem:[#allocation7 + $0x5e8] sm:$0xf0] }
  0x94   :  { %2050 = vmatpush.bf16.msrb.mxu1 %v5312_v7  ;;  %v5409_v7 = vld [vmem:[#allocation7 + $0x460] sm:$0xf0] }
  0x95   :  { %2064 = vmatpush.bf16.msrb.mxu2 %v5696_v8  ;;  %2078 = vmatpush.bf16.msrb.mxu3 %v4932_v12  ;;  %v7395_v8 = vld [vmem:[#allocation7 + $0x734] sm:$0xf]  ;;  %v7210_v12 = vld [vmem:[#allocation7 + $0x164] sm:$0xf0]  ;;  %v5412_v15 = vor.u32 %v7299_v6, %v5409_v7  ;;  %v7240_v7 = vld [vmem:[#allocation7 + $0x25c] sm:$0xf] }
  0x96   :  { %v5796_v16 = vor.u32 %v7395_v8, %v5793_v10  ;;  %v5032_v17 = vor.u32 %v7210_v12, %v5031_v11  ;;  %v7438_v6 = vld [vmem:[#allocation7 + $0x884] sm:$0xf0]  ;;  %v5996_v8 = vor.u32 %v7444_v62, %v5993_v63  ;;  %v7336_v10 = vld [vmem:[#allocation7 + $0x55c] sm:$0xf]  ;;  %v5561_v11 = vld [vmem:[#allocation7 + $0x588] sm:$0xf0] }
  0x97   :  { %2037 = vmatpush.bf16.msrb.mxu0 %v4880_v19  ;;  %v5361_v19 = vld [vmem:[#allocation7 + $0x400] sm:$0xf0]  ;;  %v7432_v12 = vld [vmem:[#allocation7 + $0x85c] sm:$0xf]  ;;  %v5753_v63 = vld [vmem:[#allocation7 + $0x708] sm:$0xf0] }
  0x98   :  { %2051 = vmatpush.bf16.msrb.mxu1 %v5264_v24  ;;  %v4983_v24 = vld [vmem:[#allocation7 + $0xd8] sm:$0xf]  ;;  %v7384_v62 = vld [vmem:[#allocation7 + $0x6dc] sm:$0xf] }
  0x99   :  { %2065 = vmatpush.bf16.msrb.mxu2 %v5648_v25  ;;  %2079 = vmatpush.bf16.msrb.mxu3 %v4884_v28  ;;  %v7198_v25 = vld [vmem:[#allocation7 + $0x104] sm:$0xf0]  ;;  %v5364_v28 = vor.u32 %v7287_v18, %v5361_v19  ;;  %v7228_v19 = vld [vmem:[#allocation7 + $0x1fc] sm:$0xf] }
  0x9a   :  { %2038 = vmatmul.bf16.vlgmr.msrb.gmra.mxu0 %v7970_v57  ;;  %v7426_v18 = vld [vmem:[#allocation7 + $0x824] sm:$0xf0] }
  0x9b   :  { %2086 = vmatpush.bf16.msra.mxu0 %v5604_v29  ;;  %2052 = vmatmul.bf16.vlgmr.msrb.gmra.mxu1 %v7973_v5  ;;  %v5748_v29 = vor.u32 %v7383_v21, %v5745_v23  ;;  %v5948_v21 = vor.u32 %v7432_v12, %v5945_v13  ;;  %v7324_v23 = vld [vmem:[#allocation7 + $0x4fc] sm:$0xf]  ;;  %v5705_v12 = vld [vmem:[#allocation7 + $0x6a8] sm:$0xf0] }
  0x9c   :  { %2100 = vmatpush.bf16.msra.mxu1 %v5988_v30  ;;  %2066 = vmatmul.bf16.vlgmr.msrb.gmra.mxu2 %v7977_v20  ;;  %v4984_v30 = vor.u32 %v7198_v25, %v4983_v24  ;;  %v5513_v24 = vld [vmem:[#allocation7 + $0x528] sm:$0xf0]  ;;  %v7420_v25 = vld [vmem:[#allocation7 + $0x7fc] sm:$0xf] }
  0x9d   :  { %2114 = vmatpush.bf16.msra.mxu2 %v5224_v31  ;;  %2128 = vmatpush.bf16.msra.mxu3 %v5608_v35  ;;  %v7275_v31 = vld [vmem:[#allocation7 + $0x374] sm:$0xf]  ;;  %v5697_v35 = vld [vmem:[#allocation7 + $0x6a0] sm:$0xf0] }
  0x9e   :  { %2080 = vmatmul.bf16.vlgmr.msrb.gmra.mxu3 %v7970_v57  ;;  %v5316_v40 = vor.u32 %v7275_v31, %v5313_v32  ;;  %v7414_v31 = vld [vmem:[#allocation7 + $0x7c4] sm:$0xf0]  ;;  %v7216_v32 = vld [vmem:[#allocation7 + $0x19c] sm:$0xf] }
  0x9f   :  { %2087 = vmatpush.bf16.msra.mxu0 %v5556_v41  ;;  %v7263_v41 = vld [vmem:[#allocation7 + $0x314] sm:$0xf] }
  0xa0   :  { %2101 = vmatpush.bf16.msra.mxu1 %v5940_v42  ;;  %v5265_v42 = vld [vmem:[#allocation7 + $0x340] sm:$0xf0] }
  0xa1   :  { %2115 = vmatpush.bf16.msra.mxu2 %v5176_v43  ;;  %2129 = vmatpush.bf16.msra.mxu3 %v5560_v47  ;;  %v5700_v43 = vor.u32 %v7371_v33, %v5697_v35  ;;  %v4887_v47 = vld [vmem:[#allocation7 + $0x18] sm:$0xf]  ;;  %v5900_v33 = vor.u32 %v7420_v25, %v5897_v26  ;;  %v7312_v35 = vld [vmem:[#allocation7 + $0x49c] sm:$0xf]  ;;  %v5657_v25 = vld [vmem:[#allocation7 + $0x648] sm:$0xf0] }
  0xa2   :  { %v4888_v61 = vor.u32 %v7174_v49, %v4887_v47  ;;  %v7300_v47 = vld [vmem:[#allocation7 + $0x43c] sm:$0xf]  ;;  %v5231_v26 = vld [vmem:[#allocation7 + $0x2c0] sm:$0xf] }
  0xa3   :  { %2088 = vmatpush.bf16.msra.mxu0 %v5508_v53  ;;  %v7450_v53 = vld [vmem:[#allocation7 + $0x8e4] sm:$0xf0]  ;;  %v7396_v49 = vld [vmem:[#allocation7 + $0x73c] sm:$0xf] }
  0xa4   :  { %2102 = vmatpush.bf16.msra.mxu1 %v5892_v54  ;;  %v7252_v54 = vld [vmem:[#allocation7 + $0x2bc] sm:$0xf]  ;;  %v5992_v1 = vor.u32 %v7450_v53, %v5991_v52 }
  0xa5   :  { %2116 = vmatpush.bf16.msra.mxu2 %v5128_v55  ;;  %2130 = vmatpush.bf16.msra.mxu3 %v5512_v60  ;;  %v5268_v55 = vor.u32 %v7263_v41, %v5265_v42  ;;  %v5652_v60 = vor.u32 %v7359_v45, %v5649_v46  ;;  %v5468_v41 = vor.u32 %v7312_v35, %v5465_v36  ;;  %v5799_v42 = vld [vmem:[#allocation7 + $0x738] sm:$0xf]  ;;  %v5033_v46 = vld [vmem:[#allocation7 + $0x168] sm:$0xf0]  ;;  %v7253_v35 = vld [vmem:[#allocation7 + $0x2c4] sm:$0xf] }
  0xa6   :  { %v5852_v45 = vor.u32 %v7408_v37, %v5849_v38  ;;  %v5233_v36 = vld [vmem:[#allocation7 + $0x2f0] sm:$0xf0] }
  0xa7   :  { %2089 = vmatpush.bf16.msra.mxu0 %v5460_v2  ;;  %v5228_v2 = vor.u32 %v7252_v54, %v5225_v56  ;;  %v5751_v54 = vld [vmem:[#allocation7 + $0x6d8] sm:$0xf]  ;;  %v7192_v56 = vld [vmem:[#allocation7 + $0xdc] sm:$0xf] }
  0xa8   :  { %2103 = vmatpush.bf16.msra.mxu1 %v5844_v3  ;;  %v5612_v3 = vor.u32 %v7348_v58, %v5609_v59  ;;  %v5804_v58 = vor.u32 %v7396_v49, %v5801_v50  ;;  %v4985_v59 = vld [vmem:[#allocation7 + $0x108] sm:$0xf0]  ;;  %v5185_v49 = vld [vmem:[#allocation7 + $0x290] sm:$0xf0] }
  0xa9   :  { %2117 = vmatpush.bf16.msra.mxu2 %v5080_v4  ;;  %2131 = vmatpush.bf16.msra.mxu3 %v5464_v9  ;;  %v5943_v4 = vld [vmem:[#allocation7 + $0x858] sm:$0xf]  ;;  %v5177_v9 = vld [vmem:[#allocation7 + $0x288] sm:$0xf0] }
  0xaa   :  { %v5944_v14 = vor.u32 %v7438_v6, %v5943_v4  ;;  %v7378_v4 = vld [vmem:[#allocation7 + $0x6a4] sm:$0xf0]  ;;  %v7180_v6 = vld [vmem:[#allocation7 + $0x7c] sm:$0xf] }
  0xab   :  { %2090 = vmatpush.bf16.msra.mxu0 %v5412_v15  ;;  %v5180_v15 = vor.u32 %v7240_v7, %v5177_v9  ;;  %v5756_v7 = vor.u32 %v7384_v62, %v5753_v63  ;;  %v7276_v9 = vld [vmem:[#allocation7 + $0x37c] sm:$0xf]  ;;  %v5137_v62 = vld [vmem:[#allocation7 + $0x230] sm:$0xf0] }
  0xac   :  { %2104 = vmatpush.bf16.msra.mxu1 %v5796_v16  ;;  %v5564_v16 = vor.u32 %v7336_v10, %v5561_v11  ;;  %v5321_v10 = vld [vmem:[#allocation7 + $0x3a8] sm:$0xf0]  ;;  %v7372_v11 = vld [vmem:[#allocation7 + $0x67c] sm:$0xf] }
  0xad   :  { %2118 = vmatpush.bf16.msra.mxu2 %v5032_v17  ;;  %2132 = vmatpush.bf16.msra.mxu3 %v5416_v22  ;;  %v5895_v17 = vld [vmem:[#allocation7 + $0x7f8] sm:$0xf]  ;;  %v5129_v22 = vld [vmem:[#allocation7 + $0x228] sm:$0xf0] }
  0xae   :  { %v5896_v27 = vor.u32 %v7426_v18, %v5895_v17  ;;  %v5324_v17 = vor.u32 %v7276_v9, %v5321_v10  ;;  %v7168_v18 = vld [vmem:[#allocation7 + $0x1c] sm:$0xf]  ;;  %v7415_v9 = vld [vmem:[#allocation7 + $0x7cc] sm:$0xf0]  ;;  %v7217_v10 = vld [vmem:[#allocation7 + $0x1a4] sm:$0xf] }
  0xaf   :  { %2091 = vmatpush.bf16.msra.mxu0 %v5364_v28  ;;  %v5132_v28 = vor.u32 %v7228_v19, %v5129_v22  ;;  %v4889_v19 = vld [vmem:[#allocation7 + $0x48] sm:$0xf0]  ;;  %v5708_v22 = vor.u32 %v7372_v11, %v5705_v12  ;;  %v5089_v11 = vld [vmem:[#allocation7 + $0x1d0] sm:$0xf0] }
  0xb0   :  { %2105 = vmatpush.bf16.msra.mxu1 %v5748_v29  ;;  %v5516_v29 = vor.u32 %v7324_v23, %v5513_v24  ;;  %v5273_v23 = vld [vmem:[#allocation7 + $0x348] sm:$0xf0]  ;;  %v7360_v24 = vld [vmem:[#allocation7 + $0x61c] sm:$0xf] }
  0xb1   :  { %2119 = vmatpush.bf16.msra.mxu2 %v4984_v30  ;;  %2133 = vmatpush.bf16.msra.mxu3 %v5368_v34  ;;  %v5847_v30 = vld [vmem:[#allocation7 + $0x798] sm:$0xf]  ;;  %v5081_v34 = vld [vmem:[#allocation7 + $0x1c8] sm:$0xf0]  ;;  %v5660_v37 = vor.u32 %v7360_v24, %v5657_v25  ;;  %v5041_v24 = vld [vmem:[#allocation7 + $0x170] sm:$0xf0] }
  0xb2   :  { %v5848_v39 = vor.u32 %v7414_v31, %v5847_v30  ;;  %v7355_v30 = vld [vmem:[#allocation7 + $0x5ec] sm:$0xf0]  ;;  %v5999_v31 = vld [vmem:[#allocation7 + $0x8c0] sm:$0xf] }
  0xb3   :  { %2092 = vmatpush.bf16.msra.mxu0 %v5316_v40  ;;  %v5084_v40 = vor.u32 %v7216_v32, %v5081_v34  ;;  %v7451_v32 = vld [vmem:[#allocation7 + $0x8ec] sm:$0xf0] }
  0xb4   :  { %2106 = vmatpush.bf16.msra.mxu1 %v5700_v43  ;;  %v7402_v43 = vld [vmem:[#allocation7 + $0x764] sm:$0xf0] }
  0xb5   :  { %2120 = vmatpush.bf16.msra.mxu2 %v4936_v44  ;;  %2134 = vmatpush.bf16.msra.mxu3 %v5320_v48  ;;  %v7204_v44 = vld [vmem:[#allocation7 + $0x13c] sm:$0xf]  ;;  %v5417_v48 = vld [vmem:[#allocation7 + $0x468] sm:$0xf0]  ;;  %v5800_v51 = vor.u32 %v7402_v43, %v5799_v42  ;;  %v7247_v42 = vld [vmem:[#allocation7 + $0x28c] sm:$0xf0] }
  0xb6   :  { %v5036_v52 = vor.u32 %v7204_v44, %v5033_v46  ;;  %v5420_v53 = vor.u32 %v7300_v47, %v5417_v48  ;;  %v5567_v43 = vld [vmem:[#allocation7 + $0x560] sm:$0xf]  ;;  %v5236_v44 = vor.u32 %v7253_v35, %v5233_v36  ;;  %v7439_v47 = vld [vmem:[#allocation7 + $0x88c] sm:$0xf0]  ;;  %v7241_v48 = vld [vmem:[#allocation7 + $0x264] sm:$0xf] }
  0xb7   :  { %2093 = vmatpush.bf16.msra.mxu0 %v5268_v55  ;;  %v7390_v55 = vld [vmem:[#allocation7 + $0x704] sm:$0xf0]  ;;  %v5951_v46 = vld [vmem:[#allocation7 + $0x860] sm:$0xf]  ;;  %v7193_v35 = vld [vmem:[#allocation7 + $0xe4] sm:$0xf] }
  0xb8   :  { %2107 = vmatpush.bf16.msra.mxu1 %v5652_v60  ;;  %v7288_v60 = vld [vmem:[#allocation7 + $0x3dc] sm:$0xf]  ;;  %v4993_v36 = vld [vmem:[#allocation7 + $0x110] sm:$0xf0] }
  0xb9   :  { %2121 = vmatpush.bf16.msra.mxu2 %v4888_v61  ;;  %2135 = vmatpush.bf16.msra.mxu3 %v5272_v0  ;;  %v5369_v61 = vld [vmem:[#allocation7 + $0x408] sm:$0xf0]  ;;  %v5752_v0 = vor.u32 %v7390_v55, %v5751_v54  ;;  %v7235_v54 = vld [vmem:[#allocation7 + $0x22c] sm:$0xf0]  ;;  %v5519_v55 = vld [vmem:[#allocation7 + $0x500] sm:$0xf] }
  0xba   :  { %2094 = vmatmul.bf16.vlgmr.msra.gmra.mxu0 %v7973_v5 }
  0xbb   :  { %2142 = vmatpush.bf16.msrb.mxu0 %v5992_v1  ;;  %2108 = vmatmul.bf16.vlgmr.msra.gmra.mxu1 %v7977_v20  ;;  %v4988_v1 = vor.u32 %v7192_v56, %v4985_v59  ;;  %v5188_v56 = vor.u32 %v7241_v48, %v5185_v49  ;;  %v5903_v59 = vld [vmem:[#allocation7 + $0x800] sm:$0xf]  ;;  %v4945_v48 = vld [vmem:[#allocation7 + $0xb0] sm:$0xf0] }
  0xbc   :  { %2156 = vmatpush.bf16.msrb.mxu1 %v5228_v2  ;;  %2122 = vmatmul.bf16.vlgmr.msra.gmra.mxu2 %v7970_v57  ;;  %v5372_v2 = vor.u32 %v7288_v60, %v5369_v61  ;;  %v7427_v60 = vld [vmem:[#allocation7 + $0x82c] sm:$0xf0]  ;;  %v7229_v61 = vld [vmem:[#allocation7 + $0x204] sm:$0xf] }
  0xbd   :  { %2170 = vmatpush.bf16.msrb.mxu2 %v5612_v3  ;;  %2184 = vmatpush.bf16.msrb.mxu3 %v5996_v8  ;;  %v5703_v3 = vld [vmem:[#allocation7 + $0x678] sm:$0xf]  ;;  %v4937_v8 = vld [vmem:[#allocation7 + $0xa8] sm:$0xf0] }
  0xbe   :  { %2136 = vmatmul.bf16.vlgmr.msra.gmra.mxu3 %v7973_v5  ;;  %v5704_v13 = vor.u32 %v7378_v4, %v5703_v3  ;;  %v7223_v3 = vld [vmem:[#allocation7 + $0x1cc] sm:$0xf0]  ;;  %v5471_v4 = vld [vmem:[#allocation7 + $0x4a0] sm:$0xf] }
  0xbf   :  { %2143 = vmatpush.bf16.msrb.mxu0 %v5944_v14  ;;  %v5655_v14 = vld [vmem:[#allocation7 + $0x618] sm:$0xf] }
  0xc0   :  { %2157 = vmatpush.bf16.msrb.mxu1 %v5180_v15  ;;  %v7366_v15 = vld [vmem:[#allocation7 + $0x644] sm:$0xf0] }
  0xc1   :  { %2171 = vmatpush.bf16.msrb.mxu2 %v5564_v16  ;;  %2185 = vmatpush.bf16.msrb.mxu3 %v5948_v21  ;;  %v4940_v16 = vor.u32 %v7180_v6, %v4937_v8  ;;  %v7264_v21 = vld [vmem:[#allocation7 + $0x31c] sm:$0xf]  ;;  %v5140_v6 = vor.u32 %v7229_v61, %v5137_v62  ;;  %v5855_v8 = vld [vmem:[#allocation7 + $0x7a0] sm:$0xf]  ;;  %v4897_v61 = vld [vmem:[#allocation7 + $0x50] sm:$0xf0] }
  0xc2   :  { %v5276_v34 = vor.u32 %v7264_v21, %v5273_v23  ;;  %v5807_v21 = vld [vmem:[#allocation7 + $0x740] sm:$0xf]  ;;  %v7205_v23 = vld [vmem:[#allocation7 + $0x144] sm:$0xf] }
  0xc3   :  { %2144 = vmatpush.bf16.msrb.mxu0 %v5896_v27  ;;  %v7259_v27 = vld [vmem:[#allocation7 + $0x2ec] sm:$0xf0]  ;;  %v7349_v62 = vld [vmem:[#allocation7 + $0x5c4] sm:$0xf] }
  0xc4   :  { %2158 = vmatpush.bf16.msrb.mxu1 %v5132_v28  ;;  %v5615_v28 = vld [vmem:[#allocation7 + $0x5c0] sm:$0xf]  ;;  %v5232_v38 = vor.u32 %v7259_v27, %v5231_v26 }
  0xc5   :  { %2172 = vmatpush.bf16.msrb.mxu2 %v5516_v29  ;;  %2186 = vmatpush.bf16.msrb.mxu3 %v5900_v33  ;;  %v5656_v29 = vor.u32 %v7366_v15, %v5655_v14  ;;  %v4892_v33 = vor.u32 %v7168_v18, %v4889_v19  ;;  %v5856_v14 = vor.u32 %v7415_v9, %v5855_v8  ;;  %v5039_v15 = vld [vmem:[#allocation7 + $0x140] sm:$0xf]  ;;  %v7307_v19 = vld [vmem:[#allocation7 + $0x46c] sm:$0xf0]  ;;  %v5623_v8 = vld [vmem:[#allocation7 + $0x5c8] sm:$0xf] }
  0xc6   :  { %v5092_v18 = vor.u32 %v7217_v10, %v5089_v11  ;;  %v7356_v9 = vld [vmem:[#allocation7 + $0x5f4] sm:$0xf0] }
  0xc7   :  { %2145 = vmatpush.bf16.msrb.mxu0 %v5848_v39  ;;  %v5616_v39 = vor.u32 %v7355_v30, %v5615_v28  ;;  %v4991_v28 = vld [vmem:[#allocation7 + $0xe0] sm:$0xf] }
  0xc8   :  { %2159 = vmatpush.bf16.msrb.mxu1 %v5084_v40  ;;  %v6000_v40 = vor.u32 %v7451_v32, %v5999_v31  ;;  %v5375_v30 = vld [vmem:[#allocation7 + $0x3e0] sm:$0xf]  ;;  %v5044_v31 = vor.u32 %v7205_v23, %v5041_v24  ;;  %v7295_v32 = vld [vmem:[#allocation7 + $0x40c] sm:$0xf0]  ;;  %v7344_v23 = vld [vmem:[#allocation7 + $0x594] sm:$0xf0] }
  0xc9   :  { %2173 = vmatpush.bf16.msrb.mxu2 %v5468_v41  ;;  %2187 = vmatpush.bf16.msrb.mxu3 %v5852_v45  ;;  %v5183_v41 = vld [vmem:[#allocation7 + $0x260] sm:$0xf]  ;;  %v7343_v45 = vld [vmem:[#allocation7 + $0x58c] sm:$0xf0] }
  0xca   :  { %v5184_v50 = vor.u32 %v7247_v42, %v5183_v41  ;;  %v7187_v41 = vld [vmem:[#allocation7 + $0xac] sm:$0xf0]  ;;  %v5327_v42 = vld [vmem:[#allocation7 + $0x380] sm:$0xf] }
  0xcb   :  { %2146 = vmatpush.bf16.msrb.mxu0 %v5800_v51  ;;  %v5568_v51 = vor.u32 %v7343_v45, %v5567_v43  ;;  %v4996_v43 = vor.u32 %v7193_v35, %v4993_v36  ;;  %v5711_v45 = vld [vmem:[#allocation7 + $0x680] sm:$0xf]  ;;  %v7332_v35 = vld [vmem:[#allocation7 + $0x534] sm:$0xf0] }
  0xcc   :  { %2160 = vmatpush.bf16.msrb.mxu1 %v5036_v52  ;;  %v5952_v52 = vor.u32 %v7439_v47, %v5951_v46  ;;  %v7379_v46 = vld [vmem:[#allocation7 + $0x6ac] sm:$0xf0]  ;;  %v7181_v47 = vld [vmem:[#allocation7 + $0x84] sm:$0xf] }
  0xcd   :  { %2174 = vmatpush.bf16.msrb.mxu2 %v5420_v53  ;;  %2188 = vmatpush.bf16.msrb.mxu3 %v5804_v58  ;;  %v5135_v53 = vld [vmem:[#allocation7 + $0x200] sm:$0xf]  ;;  %v7331_v58 = vld [vmem:[#allocation7 + $0x52c] sm:$0xf0] }
  0xce   :  { %v5136_v63 = vor.u32 %v7235_v54, %v5135_v53  ;;  %v5712_v53 = vor.u32 %v7379_v46, %v5711_v45  ;;  %v5279_v54 = vld [vmem:[#allocation7 + $0x320] sm:$0xf]  ;;  %v5857_v45 = vld [vmem:[#allocation7 + $0x7d0] sm:$0xf0]  ;;  %v5095_v46 = vld [vmem:[#allocation7 + $0x1a8] sm:$0xf] }
  0xcf   :  { %2147 = vmatpush.bf16.msrb.mxu0 %v5752_v0  ;;  %v5520_v0 = vor.u32 %v7331_v58, %v5519_v55  ;;  %v7271_v55 = vld [vmem:[#allocation7 + $0x34c] sm:$0xf0]  ;;  %v4948_v58 = vor.u32 %v7181_v47, %v4945_v48  ;;  %v7224_v47 = vld [vmem:[#allocation7 + $0x1d4] sm:$0xf0]  ;;  %v5479_v48 = vld [vmem:[#allocation7 + $0x4a8] sm:$0xf] }
  0xd0   :  { %2161 = vmatpush.bf16.msrb.mxu1 %v4988_v1  ;;  %v5904_v1 = vor.u32 %v7427_v60, %v5903_v59  ;;  %v7367_v59 = vld [vmem:[#allocation7 + $0x64c] sm:$0xf0]  ;;  %v7169_v60 = vld [vmem:[#allocation7 + $0x24] sm:$0xf] }
  0xd1   :  { %2175 = vmatpush.bf16.msrb.mxu2 %v5372_v2  ;;  %2189 = vmatpush.bf16.msrb.mxu3 %v5756_v7  ;;  %v5087_v2 = vld [vmem:[#allocation7 + $0x1a0] sm:$0xf]  ;;  %v7319_v7 = vld [vmem:[#allocation7 + $0x4cc] sm:$0xf0]  ;;  %v4900_v10 = vor.u32 %v7169_v60, %v4897_v61  ;;  %v7212_v60 = vld [vmem:[#allocation7 + $0x174] sm:$0xf0] }
  0xd2   :  { %v5088_v12 = vor.u32 %v7223_v3, %v5087_v2  ;;  %v6001_v2 = vld [vmem:[#allocation7 + $0x8f0] sm:$0xf0]  ;;  %v5239_v3 = vld [vmem:[#allocation7 + $0x2c8] sm:$0xf] }
  0xd3   :  { %2148 = vmatpush.bf16.msrb.mxu0 %v5704_v13  ;;  %v5472_v13 = vor.u32 %v7319_v7, %v5471_v4  ;;  %v7260_v4 = vld [vmem:[#allocation7 + $0x2f4] sm:$0xf0]  ;;  %v5431_v61 = vld [vmem:[#allocation7 + $0x448] sm:$0xf] }
  0xd4   :  { %2162 = vmatpush.bf16.msrb.mxu1 %v4940_v16  ;;  %v7211_v16 = vld [vmem:[#allocation7 + $0x16c] sm:$0xf0] }
  0xd5   :  { %2176 = vmatpush.bf16.msrb.mxu2 %v5324_v17  ;;  %2190 = vmatpush.bf16.msrb.mxu3 %v5708_v22  ;;  %v5423_v17 = vld [vmem:[#allocation7 + $0x440] sm:$0xf]  ;;  %v7403_v22 = vld [vmem:[#allocation7 + $0x76c] sm:$0xf0]  ;;  %v5040_v25 = vor.u32 %v7211_v16, %v5039_v15  ;;  %v5569_v15 = vld [vmem:[#allocation7 + $0x590] sm:$0xf0] }
  0xd6   :  { %v5424_v26 = vor.u32 %v7307_v19, %v5423_v17  ;;  %v5808_v27 = vor.u32 %v7403_v22, %v5807_v21  ;;  %v7433_v16 = vld [vmem:[#allocation7 + $0x864] sm:$0xf]  ;;  %v5624_v17 = vor.u32 %v7356_v9, %v5623_v8  ;;  %v5191_v19 = vld [vmem:[#allocation7 + $0x268] sm:$0xf]  ;;  %v7248_v21 = vld [vmem:[#allocation7 + $0x294] sm:$0xf0] }
  0xd7   :  { %2149 = vmatpush.bf16.msrb.mxu0 %v5656_v29  ;;  %v7199_v29 = vld [vmem:[#allocation7 + $0x10c] sm:$0xf0]  ;;  %v5575_v22 = vld [vmem:[#allocation7 + $0x568] sm:$0xf]  ;;  %v5761_v9 = vld [vmem:[#allocation7 + $0x710] sm:$0xf0] }
  0xd8   :  { %2163 = vmatpush.bf16.msrb.mxu1 %v4892_v33  ;;  %v5759_v33 = vld [vmem:[#allocation7 + $0x6e0] sm:$0xf] }
  0xd9   :  { %2177 = vmatpush.bf16.msrb.mxu2 %v5276_v34  ;;  %2191 = vmatpush.bf16.msrb.mxu3 %v5660_v37  ;;  %v7391_v34 = vld [vmem:[#allocation7 + $0x70c] sm:$0xf0]  ;;  %v4992_v37 = vor.u32 %v7199_v29, %v4991_v28  ;;  %v5521_v28 = vld [vmem:[#allocation7 + $0x530] sm:$0xf0]  ;;  %v7421_v29 = vld [vmem:[#allocation7 + $0x804] sm:$0xf] }
  0xda   :  { %2150 = vmatmul.bf16.vlgmr.msrb.gmra.mxu0 %v7977_v20 }
  0xdb   :  { %2198 = vmatpush.bf16.msra.mxu0 %v5232_v38  ;;  %2164 = vmatmul.bf16.vlgmr.msrb.gmra.mxu1 %v7970_v57  ;;  %v5376_v38 = vor.u32 %v7295_v32, %v5375_v30  ;;  %v5576_v30 = vor.u32 %v7344_v23, %v5575_v22  ;;  %v5143_v32 = vld [vmem:[#allocation7 + $0x208] sm:$0xf]  ;;  %v7373_v22 = vld [vmem:[#allocation7 + $0x684] sm:$0xf] }
  0xdc   :  { %2212 = vmatpush.bf16.msra.mxu1 %v5616_v39  ;;  %2178 = vmatmul.bf16.vlgmr.msrb.gmra.mxu2 %v7973_v5  ;;  %v5760_v39 = vor.u32 %v7391_v34, %v5759_v33  ;;  %v7236_v33 = vld [vmem:[#allocation7 + $0x234] sm:$0xf0]  ;;  %v5527_v34 = vld [vmem:[#allocation7 + $0x508] sm:$0xf] }
  0xdd   :  { %2226 = vmatpush.bf16.msra.mxu2 %v6000_v40  ;;  %2240 = vmatpush.bf16.msra.mxu3 %v5236_v44  ;;  %v4943_v40 = vld [vmem:[#allocation7 + $0x80] sm:$0xf]  ;;  %v7283_v44 = vld [vmem:[#allocation7 + $0x3ac] sm:$0xf0] }
  0xde   :  { %2192 = vmatmul.bf16.vlgmr.msrb.gmra.mxu3 %v7977_v20  ;;  %v4944_v49 = vor.u32 %v7187_v41, %v4943_v40  ;;  %v5144_v40 = vor.u32 %v7236_v33, %v5143_v32  ;;  %v7313_v41 = vld [vmem:[#allocation7 + $0x4a4] sm:$0xf] }
  0xdf   :  { %2199 = vmatpush.bf16.msra.mxu0 %v5184_v50  ;;  %v4895_v50 = vld [vmem:[#allocation7 + $0x20] sm:$0xf] }
  0xe0   :  { %2213 = vmatpush.bf16.msra.mxu1 %v5568_v51  ;;  %v7175_v51 = vld [vmem:[#allocation7 + $0x4c] sm:$0xf0] }
  0xe1   :  { %2227 = vmatpush.bf16.msra.mxu2 %v5952_v52  ;;  %2241 = vmatpush.bf16.msra.mxu3 %v5188_v56  ;;  %v5328_v52 = vor.u32 %v7283_v44, %v5327_v42  ;;  %v5663_v56 = vld [vmem:[#allocation7 + $0x620] sm:$0xf]  ;;  %v5473_v42 = vld [vmem:[#allocation7 + $0x4d0] sm:$0xf0]  ;;  %v5528_v44 = vor.u32 %v7332_v35, %v5527_v34  ;;  %v7361_v34 = vld [vmem:[#allocation7 + $0x624] sm:$0xf] }
  0xe2   :  { %v5664_v7 = vor.u32 %v7367_v59, %v5663_v56  ;;  %v5047_v59 = vld [vmem:[#allocation7 + $0x148] sm:$0xf]  ;;  %v5665_v35 = vld [vmem:[#allocation7 + $0x650] sm:$0xf0] }
  0xe3   :  { %2200 = vmatpush.bf16.msra.mxu0 %v5136_v63  ;;  %v5617_v63 = vld [vmem:[#allocation7 + $0x5f0] sm:$0xf0] }
  0xe4   :  { %2214 = vmatpush.bf16.msra.mxu1 %v5520_v0  ;;  %v7445_v0 = vld [vmem:[#allocation7 + $0x8c4] sm:$0xf]  ;;  %v5620_v11 = vor.u32 %v7349_v62, %v5617_v63  ;;  %v7308_v62 = vld [vmem:[#allocation7 + $0x474] sm:$0xf0]  ;;  %v8008_v63 = vpop.f32.mrf.mxu2 }
  0xe5   :  { %2228 = vmatpush.bf16.msra.mxu2 %v5904_v1  ;;  %2242 = vmatpush.bf16.msra.mxu3 %v5140_v6  ;;  %v4896_v1 = vor.u32 %v7175_v51, %v4895_v50  ;;  %v5280_v6 = vor.u32 %v7271_v55, %v5279_v54  ;;  %v5476_v50 = vor.u32 %v7313_v41, %v5473_v42  ;;  %v5425_v54 = vld [vmem:[#allocation7 + $0x470] sm:$0xf0]  ;;  %v7397_v55 = vld [vmem:[#allocation7 + $0x744] sm:$0xf]  ;;  %v7176_v42 = vld [vmem:[#allocation7 + $0x54] sm:$0xf0] }
  0xe6   :  { %v5432_v8 = vor.u32 %v7308_v62, %v5431_v61 }
  0xe7   :  { %2201 = vmatpush.bf16.msra.mxu0 %v5088_v12  ;;  %v6004_v12 = vor.u32 %v7445_v0, %v6001_v2  ;;  %v8010_v0 = vpop.f32.mrf.mxu3 }
  0xe8   :  { %2215 = vmatpush.bf16.msra.mxu1 %v5472_v13  ;;  %v5240_v13 = vor.u32 %v7260_v4, %v5239_v3  ;;  %v5048_v3 = vor.u32 %v7212_v60, %v5047_v59  ;;  %v7289_v4 = vld [vmem:[#allocation7 + $0x3e4] sm:$0xf] }
  0xe9   :  { %2229 = vmatpush.bf16.msra.mxu2 %v5856_v14  ;;  %2243 = vmatpush.bf16.msra.mxu3 %v5092_v18  ;;  %v7337_v14 = vld [vmem:[#allocation7 + $0x564] sm:$0xf]  ;;  %v5953_v18 = vld [vmem:[#allocation7 + $0x890] sm:$0xf0] }
  0xea   :  { %v5572_v24 = vor.u32 %v7337_v14, %v5569_v15  ;;  %v5383_v14 = vld [vmem:[#allocation7 + $0x3e8] sm:$0xf]  ;;  %v7296_v15 = vld [vmem:[#allocation7 + $0x414] sm:$0xf0] }
  0xeb   :  { %2202 = vmatpush.bf16.msra.mxu0 %v5040_v25  ;;  %v5956_v25 = vor.u32 %v7433_v16, %v5953_v18  ;;  %v5384_v23 = vor.u32 %v7296_v15, %v5383_v14 }
  0xec   :  { %2216 = vmatpush.bf16.msra.mxu1 %v5424_v26  ;;  %v5192_v26 = vor.u32 %v7248_v21, %v5191_v19  ;;  %v7277_v19 = vld [vmem:[#allocation7 + $0x384] sm:$0xf]  ;;  %v5329_v21 = vld [vmem:[#allocation7 + $0x3b0] sm:$0xf0] }
  0xed   :  { %2230 = vmatpush.bf16.msra.mxu2 %v5808_v27  ;;  %2244 = vmatpush.bf16.msra.mxu3 %v5044_v31  ;;  %v7325_v27 = vld [vmem:[#allocation7 + $0x504] sm:$0xf]  ;;  %v5905_v31 = vld [vmem:[#allocation7 + $0x830] sm:$0xf0] }
  0xee   :  { %v5524_v36 = vor.u32 %v7325_v27, %v5521_v28  ;;  %v5335_v27 = vld [vmem:[#allocation7 + $0x388] sm:$0xf]  ;;  %v7284_v28 = vld [vmem:[#allocation7 + $0x3b4] sm:$0xf0] }
  0xef   :  { %2203 = vmatpush.bf16.msra.mxu0 %v4992_v37  ;;  %v8004_v37 = vpop.f32.mrf.mxu0  ;;  %v5336_v41 = vor.u32 %v7284_v28, %v5335_v27  ;;  %v5913_v27 = vld [vmem:[#allocation7 + $0x838] sm:$0xf0] }
  0xf0   :  { %2217 = vmatpush.bf16.msra.mxu1 %v5376_v38  ;;  %v8006_v38 = vpop.f32.mrf.mxu1 }
  0xf1   :  { %2231 = vmatpush.bf16.msra.mxu2 %v5760_v39  ;;  %2245 = vmatpush.bf16.msra.mxu3 %v4996_v43  ;;  %v5908_v39 = vor.u32 %v7421_v29, %v5905_v31  ;;  %v7409_v43 = vld [vmem:[#allocation7 + $0x7a4] sm:$0xf]  ;;  %v5332_v29 = vor.u32 %v7277_v19, %v5329_v21  ;;  %v5281_v31 = vld [vmem:[#allocation7 + $0x350] sm:$0xf0]  ;;  %v7428_v19 = vld [vmem:[#allocation7 + $0x834] sm:$0xf0] }
  0xf2   :  { %v5860_v51 = vor.u32 %v7409_v43, %v5857_v45  ;;  %v5287_v43 = vld [vmem:[#allocation7 + $0x328] sm:$0xf]  ;;  %v7230_v21 = vld [vmem:[#allocation7 + $0x20c] sm:$0xf] }
  0xf3   :  { %2204 = vmatpush.bf16.msra.mxu0 %v4944_v49  ;;  %v7320_v49 = vld [vmem:[#allocation7 + $0x4d4] sm:$0xf0]  ;;  %v6007_v45 = vld [vmem:[#allocation7 + $0x8c8] sm:$0xf] }
  0xf4   :  { %2218 = vmatpush.bf16.msra.mxu1 %v5328_v52  ;;  %v5096_v52 = vor.u32 %v7224_v47, %v5095_v46  ;;  %v5480_v56 = vor.u32 %v7320_v49, %v5479_v48  ;;  %v7452_v46 = vld [vmem:[#allocation7 + $0x8f4] sm:$0xf0]  ;;  %v7254_v47 = vld [vmem:[#allocation7 + $0x2cc] sm:$0xf]  ;;  %v5241_v49 = vld [vmem:[#allocation7 + $0x2f8] sm:$0xf0] }
  0xf5   :  { %2232 = vmatpush.bf16.msra.mxu2 %v5712_v53  ;;  %2246 = vmatpush.bf16.msra.mxu3 %v4948_v58  ;;  %v7301_v53 = vld [vmem:[#allocation7 + $0x444] sm:$0xf]  ;;  %v5809_v58 = vld [vmem:[#allocation7 + $0x770] sm:$0xf0]  ;;  %v6008_v60 = vor.u32 %v7452_v46, %v6007_v45  ;;  %v5244_v61 = vor.u32 %v7254_v47, %v5241_v49  ;;  %v5865_v45 = vld [vmem:[#allocation7 + $0x7d8] sm:$0xf0] }
  0xf6   :  { %v5812_v2 = vor.u32 %v7397_v55, %v5809_v58  ;;  %v6009_v58 = vld [vmem:[#allocation7 + $0x8f8] sm:$0xf0]  ;;  %v5815_v49 = vld [vmem:[#allocation7 + $0x748] sm:$0xf] }
  0xf7   :  { %2205 = vmatpush.bf16.msra.mxu0 %v4896_v1  ;;  %v5428_v1 = vor.u32 %v7301_v53, %v5425_v54  ;;  %v5668_v54 = vor.u32 %v7361_v34, %v5665_v35  ;;  %v7416_v34 = vld [vmem:[#allocation7 + $0x7d4] sm:$0xf0]  ;;  %v7218_v35 = vld [vmem:[#allocation7 + $0x1ac] sm:$0xf] }
  0xf8   :  { %2219 = vmatpush.bf16.msra.mxu1 %v5280_v6  ;;  %v5377_v6 = vld [vmem:[#allocation7 + $0x410] sm:$0xf0] }
  0xf9   :  { %2233 = vmatpush.bf16.msra.mxu2 %v5664_v7  ;;  %2247 = vmatpush.bf16.msra.mxu3 %v4900_v10  ;;  %v7385_v7 = vld [vmem:[#allocation7 + $0x6e4] sm:$0xf]  ;;  %v4999_v10 = vld [vmem:[#allocation7 + $0xe8] sm:$0xf]  ;;  %v5380_v16 = vor.u32 %v7289_v4, %v5377_v6  ;;  %v5193_v6 = vld [vmem:[#allocation7 + $0x298] sm:$0xf0] }
  0xfa   :  { %2206 = vmatmul.bf16.vlgmr.msra.gmra.mxu0 %v7970_v57 }
  0xfb   :  { %2254 = vmatpush.bf16.msrb.mxu0 %v5620_v11  ;;  %2220 = vmatmul.bf16.vlgmr.msra.gmra.mxu1 %v7973_v5  ;;  %v7200_v11 = vld [vmem:[#allocation7 + $0x114] sm:$0xf0] }
  0xfc   :  { %2268 = vmatpush.bf16.msrb.mxu1 %v6004_v12  ;;  %2234 = vmatmul.bf16.vlgmr.msra.gmra.mxu2 %v7977_v20  ;;  %v8012_v12 = vpop.f32.mrf.mxu0  ;;  %v5000_v18 = vor.u32 %v7200_v11, %v4999_v10  ;;  %v5961_v10 = vld [vmem:[#allocation7 + $0x898] sm:$0xf0] }
  0xfd   :  { %2282 = vmatpush.bf16.msrb.mxu2 %v5240_v13  ;;  %2296 = vmatpush.bf16.msrb.mxu3 %v5624_v17  ;;  %v8014_v13 = vpop.f32.mrf.mxu1  ;;  %v5764_v17 = vor.u32 %v7385_v7, %v5761_v9  ;;  %v7338_v7 = vld [vmem:[#allocation7 + $0x56c] sm:$0xf] }
  0xfe   :  { %2248 = vmatmul.bf16.vlgmr.msra.gmra.mxu3 %v7970_v57  ;;  %v7434_v9 = vld [vmem:[#allocation7 + $0x86c] sm:$0xf] }
  0xff   :  { %2255 = vmatpush.bf16.msrb.mxu0 %v5572_v24  ;;  %v5713_v24 = vld [vmem:[#allocation7 + $0x6b0] sm:$0xf0] }
 0x100   :  { %2269 = vmatpush.bf16.msrb.mxu1 %v5956_v25  ;;  %v4951_v25 = vld [vmem:[#allocation7 + $0x88] sm:$0xf]  ;;  %v5716_v32 = vor.u32 %v7373_v22, %v5713_v24  ;;  %v5964_v22 = vor.u32 %v7434_v9, %v5961_v10  ;;  %v7326_v24 = vld [vmem:[#allocation7 + $0x50c] sm:$0xf] }
 0x101   :  { %2283 = vmatpush.bf16.msrb.mxu2 %v5192_v26  ;;  %2297 = vmatpush.bf16.msrb.mxu3 %v5576_v30  ;;  %v7188_v26 = vld [vmem:[#allocation7 + $0xb4] sm:$0xf0]  ;;  %v7265_v30 = vld [vmem:[#allocation7 + $0x324] sm:$0xf]  ;;  %v7194_v9 = vld [vmem:[#allocation7 + $0xec] sm:$0xf] }
 0x102   :  { %v4952_v33 = vor.u32 %v7188_v26, %v4951_v25  ;;  %v5284_v48 = vor.u32 %v7265_v30, %v5281_v31  ;;  %v5529_v25 = vld [vmem:[#allocation7 + $0x538] sm:$0xf0]  ;;  %v7422_v26 = vld [vmem:[#allocation7 + $0x80c] sm:$0xf] }
 0x103   :  { %2256 = vmatpush.bf16.msrb.mxu0 %v5524_v36  ;;  %v4903_v36 = vld [vmem:[#allocation7 + $0x28] sm:$0xf] }
 0x104   :  { %2270 = vmatpush.bf16.msrb.mxu1 %v5908_v39  ;;  %v8016_v39 = vpop.f32.mrf.mxu2  ;;  %v4904_v55 = vor.u32 %v7176_v42, %v4903_v36  ;;  %v5916_v36 = vor.u32 %v7422_v26, %v5913_v27  ;;  %v7314_v42 = vld [vmem:[#allocation7 + $0x4ac] sm:$0xf] }
 0x105   :  { %2284 = vmatpush.bf16.msrb.mxu2 %v5144_v40  ;;  %2298 = vmatpush.bf16.msrb.mxu3 %v5528_v44  ;;  %v8018_v40 = vpop.f32.mrf.mxu3  ;;  %v7272_v44 = vld [vmem:[#allocation7 + $0x354] sm:$0xf0]  ;;  %v8022_v53 = vpop.f32.mrf.mxu1  ;;  %v7182_v26 = vld [vmem:[#allocation7 + $0x8c] sm:$0xf] }
 0x106   :  { %v5288_v59 = vor.u32 %v7272_v44, %v5287_v43  ;;  %v5481_v43 = vld [vmem:[#allocation7 + $0x4d8] sm:$0xf0]  ;;  %v7410_v44 = vld [vmem:[#allocation7 + $0x7ac] sm:$0xf] }
 0x107   :  { %2257 = vmatpush.bf16.msrb.mxu0 %v5476_v50  ;;  %v7350_v50 = vld [vmem:[#allocation7 + $0x5cc] sm:$0xf] }
 0x108   :  { %2271 = vmatpush.bf16.msrb.mxu1 %v5860_v51  ;;  %v5625_v51 = vld [vmem:[#allocation7 + $0x5f8] sm:$0xf0] }
 0x109   :  { %2285 = vmatpush.bf16.msrb.mxu2 %v5096_v52  ;;  %2299 = vmatpush.bf16.msrb.mxu3 %v5480_v56  ;;  %v8020_v52 = vpop.f32.mrf.mxu0  ;;  %v7446_v56 = vld [vmem:[#allocation7 + $0x8cc] sm:$0xf]  ;;  %v5628_v62 = vor.u32 %v7350_v50, %v5625_v51  ;;  %v7404_v50 = vld [vmem:[#allocation7 + $0x774] sm:$0xf0] }
 0x10a   :  { %v6012_v4 = vor.u32 %v7446_v56, %v6009_v58  ;;  %v7206_v51 = vld [vmem:[#allocation7 + $0x14c] sm:$0xf]  ;;  %v5868_v56 = vor.u32 %v7410_v44, %v5865_v45  ;;  %v5049_v58 = vld [vmem:[#allocation7 + $0x178] sm:$0xf0] }
 0x10b   :  { %2258 = vmatpush.bf16.msrb.mxu0 %v5428_v1  ;;  %v5959_v1 = vld [vmem:[#allocation7 + $0x868] sm:$0xf] }
 0x10c   :  { %2272 = vmatpush.bf16.msrb.mxu1 %v5812_v2  ;;  %v7440_v2 = vld [vmem:[#allocation7 + $0x894] sm:$0xf0]  ;;  %v8024_v11 = vpop.f32.mrf.mxu2 }
 0x10d   :  { %2286 = vmatpush.bf16.msrb.mxu2 %v5048_v3  ;;  %2300 = vmatpush.bf16.msrb.mxu3 %v5432_v8  ;;  %v7242_v3 = vld [vmem:[#allocation7 + $0x26c] sm:$0xf]  ;;  %v5577_v8 = vld [vmem:[#allocation7 + $0x598] sm:$0xf0]  ;;  %v8026_v14 = vpop.f32.mrf.mxu3  ;;  %v5960_v15 = vor.u32 %v7440_v2, %v5959_v1  ;;  %v8034_v30 = vpop.f32.mrf.mxu1  ;;  %v5816_v1 = vor.u32 %v7404_v50, %v5815_v49 }
 0x10e   :  { %v5289_v50 = vld [vmem:[#allocation7 + $0x358] sm:$0xf0] }
 0x10f   :  { %2259 = vmatpush.bf16.msrb.mxu0 %v5380_v16  ;;  %v5196_v16 = vor.u32 %v7242_v3, %v5193_v6 }
 0x110   :  { %2273 = vmatpush.bf16.msrb.mxu1 %v5764_v17  ;;  %v5580_v17 = vor.u32 %v7338_v7, %v5577_v8  ;;  %v5767_v7 = vld [vmem:[#allocation7 + $0x6e8] sm:$0xf]  ;;  %v7392_v8 = vld [vmem:[#allocation7 + $0x714] sm:$0xf0] }
 0x111   :  { %2287 = vmatpush.bf16.msrb.mxu2 %v5000_v18  ;;  %2301 = vmatpush.bf16.msrb.mxu3 %v5384_v23  ;;  %v5911_v18 = vld [vmem:[#allocation7 + $0x808] sm:$0xf]  ;;  %v5145_v23 = vld [vmem:[#allocation7 + $0x238] sm:$0xf0] }
 0x112   :  { %v5912_v28 = vor.u32 %v7428_v19, %v5911_v18  ;;  %v5148_v31 = vor.u32 %v7230_v21, %v5145_v23  ;;  %v7386_v18 = vld [vmem:[#allocation7 + $0x6ec] sm:$0xf]  ;;  %v5769_v19 = vld [vmem:[#allocation7 + $0x718] sm:$0xf0]  ;;  %v5768_v21 = vor.u32 %v7392_v8, %v5767_v7  ;;  %v7523_v7 = vld [vmem:[#allocation10 + $0x230] sm:$0xf0] }
 0x113   :  { %2260 = vmatpush.bf16.msrb.mxu0 %v5332_v29  ;;  %v8032_v29 = vpop.f32.mrf.mxu0 }
 0x114   :  { %2274 = vmatpush.bf16.msrb.mxu1 %v5716_v32  ;;  %v5532_v32 = vor.u32 %v7326_v24, %v5529_v25  ;;  %v5719_v24 = vld [vmem:[#allocation7 + $0x688] sm:$0xf]  ;;  %v7380_v25 = vld [vmem:[#allocation7 + $0x6b4] sm:$0xf0] }
 0x115   :  { %2288 = vmatpush.bf16.msrb.mxu2 %v4952_v33  ;;  %2302 = vmatpush.bf16.msrb.mxu3 %v5336_v41  ;;  %v5863_v33 = vld [vmem:[#allocation7 + $0x7a8] sm:$0xf]  ;;  %v5097_v41 = vld [vmem:[#allocation7 + $0x1d8] sm:$0xf0]  ;;  %v8042_v3 = vpop.f32.mrf.mxu1 }
 0x116   :  { %v5864_v46 = vor.u32 %v7416_v34, %v5863_v33  ;;  %v5100_v47 = vor.u32 %v7218_v35, %v5097_v41  ;;  %v7278_v33 = vld [vmem:[#allocation7 + $0x38c] sm:$0xf]  ;;  %v5337_v34 = vld [vmem:[#allocation7 + $0x3b8] sm:$0xf0]  ;;  %v5720_v41 = vor.u32 %v7380_v25, %v5719_v24 }
 0x117   :  { %2261 = vmatpush.bf16.msrb.mxu0 %v5284_v48  ;;  %v5484_v48 = vor.u32 %v7314_v42, %v5481_v43  ;;  %v7374_v35 = vld [vmem:[#allocation7 + $0x68c] sm:$0xf]  ;;  %v5671_v42 = vld [vmem:[#allocation7 + $0x628] sm:$0xf]  ;;  %v7368_v43 = vld [vmem:[#allocation7 + $0x654] sm:$0xf0]  ;;  %v5340_v45 = vor.u32 %v7278_v33, %v5337_v34 }
 0x118   :  { %2275 = vmatpush.bf16.msrb.mxu1 %v5668_v54  ;;  %v8036_v54 = vpop.f32.mrf.mxu2  ;;  %v7520_v33 = vld [vmem:[#allocation10 + $0x218] sm:$0xf0]  ;;  %v6375_v34 = vld [vmem:[#allocation10 + $0x2d0] sm:$0xf] }
 0x119   :  { %2289 = vmatpush.bf16.msrb.mxu2 %v4904_v55  ;;  %2303 = vmatpush.bf16.msrb.mxu3 %v5288_v59  ;;  %v8038_v55 = vpop.f32.mrf.mxu3  ;;  %v7302_v59 = vld [vmem:[#allocation7 + $0x44c] sm:$0xf] }
 0x11a   :  { %2262 = vmatmul.bf16.vlgmr.msrb.gmra.mxu0 %v7973_v5 }
 0x11b   :  { %2310 = vmatpush.bf16.msra.mxu0 %v6008_v60  ;;  %2276 = vmatmul.bf16.vlgmr.msrb.gmra.mxu1 %v7977_v20  ;;  %v5433_v60 = vld [vmem:[#allocation7 + $0x478] sm:$0xf0]  ;;  %v8040_v2 = vpop.f32.mrf.mxu0 }
 0x11c   :  { %2324 = vmatpush.bf16.msra.mxu1 %v5244_v61  ;;  %2290 = vmatmul.bf16.vlgmr.msrb.gmra.mxu2 %v7970_v57  ;;  %v7398_v61 = vld [vmem:[#allocation7 + $0x74c] sm:$0xf]  ;;  %v5436_v6 = vor.u32 %v7302_v59, %v5433_v60  ;;  %v6099_v60 = vld [vmem:[#allocation10 + $0xa8] sm:$0xf] }
 0x11d   :  { %2338 = vmatpush.bf16.msra.mxu2 %v5628_v62  ;;  %2352 = vmatpush.bf16.msra.mxu3 %v6012_v4  ;;  %v5817_v62 = vld [vmem:[#allocation7 + $0x778] sm:$0xf0]  ;;  %v5052_v4 = vor.u32 %v7206_v51, %v5049_v58  ;;  %v7362_v51 = vld [vmem:[#allocation7 + $0x62c] sm:$0xf]  ;;  %v8050_v59 = vpop.f32.mrf.mxu1 }
 0x11e   :  { %2304 = vmatmul.bf16.vlgmr.msrb.gmra.mxu3 %v7973_v5  ;;  %v5820_v10 = vor.u32 %v7398_v61, %v5817_v62  ;;  %v7475_v61 = vld [vmem:[#allocation10 + $0xb0] sm:$0xf0]  ;;  %v6195_v62 = vld [vmem:[#allocation10 + $0x168] sm:$0xf] }
 0x11f   :  { %2311 = vmatpush.bf16.msra.mxu0 %v5960_v15  ;;  %v5001_v15 = vld [vmem:[#allocation7 + $0x118] sm:$0xf0] }
 0x120   :  { %2325 = vmatpush.bf16.msra.mxu1 %v5196_v16  ;;  %v7290_v16 = vld [vmem:[#allocation7 + $0x3ec] sm:$0xf]  ;;  %v8044_v27 = vpop.f32.mrf.mxu2 }
 0x121   :  { %2339 = vmatpush.bf16.msra.mxu2 %v5580_v17  ;;  %2353 = vmatpush.bf16.msra.mxu3 %v5964_v22  ;;  %v5385_v17 = vld [vmem:[#allocation7 + $0x418] sm:$0xf0]  ;;  %v5004_v22 = vor.u32 %v7194_v9, %v5001_v15  ;;  %v7547_v15 = vld [vmem:[#allocation10 + $0x2f0] sm:$0xf0] }
 0x122   :  { %v5388_v23 = vor.u32 %v7290_v16, %v5385_v17  ;;  %v6100_v17 = vor.u32 %v7475_v61, %v6099_v60 }
 0x123   :  { %2312 = vmatpush.bf16.msra.mxu0 %v5912_v28  ;;  %v8046_v28 = vpop.f32.mrf.mxu3  ;;  %v8048_v58 = vpop.f32.mrf.mxu0 }
 0x124   :  { %2326 = vmatpush.bf16.msra.mxu1 %v5148_v31  ;;  %v5772_v31 = vor.u32 %v7386_v18, %v5769_v19 }
 0x125   :  { %2340 = vmatpush.bf16.msra.mxu2 %v5532_v32  ;;  %2354 = vmatpush.bf16.msra.mxu3 %v5916_v36  ;;  %v4953_v32 = vld [vmem:[#allocation7 + $0xb8] sm:$0xf0] }
 0x126   :  { %v5721_v36 = vld [vmem:[#allocation7 + $0x6b8] sm:$0xf0]  ;;  %v4956_v44 = vor.u32 %v7182_v26, %v4953_v32 }
 0x127   :  { %2313 = vmatpush.bf16.msra.mxu0 %v5864_v46  ;;  %v7170_v46 = vld [vmem:[#allocation7 + $0x2c] sm:$0xf]  ;;  %v5724_v49 = vor.u32 %v7374_v35, %v5721_v36  ;;  %v6279_v32 = vld [vmem:[#allocation10 + $0x210] sm:$0xf]  ;;  %v7544_v35 = vld [vmem:[#allocation10 + $0x2d8] sm:$0xf0] }
 0x128   :  { %2327 = vmatpush.bf16.msra.mxu1 %v5100_v47  ;;  %v4905_v47 = vld [vmem:[#allocation7 + $0x58] sm:$0xf0]  ;;  %v8052_v24 = vpop.f32.mrf.mxu2  ;;  %v8056_v36 = vld [vmem:[#allocation9] sm:$0xff] }
 0x129   :  { %2341 = vmatpush.bf16.msra.mxu2 %v5484_v48  ;;  %2355 = vmatpush.bf16.msra.mxu3 %v5868_v56  ;;  %v7266_v48 = vld [vmem:[#allocation7 + $0x32c] sm:$0xf]  ;;  %v5673_v56 = vld [vmem:[#allocation7 + $0x658] sm:$0xf0]  ;;  %v4908_v8 = vor.u32 %v7170_v46, %v4905_v47  ;;  %v6075_v46 = vld [vmem:[#allocation10 + $0x78] sm:$0xf] }
 0x12a   :  { %v5292_v9 = vor.u32 %v7266_v48, %v5289_v50  ;;  %v5676_v16 = vor.u32 %v7362_v51, %v5673_v56  ;;  %v7469_v47 = vld [vmem:[#allocation10 + $0x80] sm:$0xf0]  ;;  %v6171_v48 = vld [vmem:[#allocation10 + $0x138] sm:$0xf]  ;;  %v398_v60 = vperm.slane %v8056_v36, 0  ;;  %v399_v61 = vperm.slane %v8056_v36, 1 }
 0x12b   :  { %2314 = vmatpush.bf16.msra.mxu0 %v5816_v1  ;;  %v5672_v1 = vor.u32 %v7368_v43, %v5671_v42  ;;  %v8054_v25 = vpop.f32.mrf.mxu3  ;;  %v8058_v42 = vpop.f32.mrf.mxu0  ;;  %v7493_v50 = vld [vmem:[#allocation10 + $0x140] sm:$0xf0]  ;;  %v6267_v51 = vld [vmem:[#allocation10 + $0x1f8] sm:$0xf] }
 0x12c   :  { %2328 = vmatpush.bf16.msra.mxu1 %v5052_v4  ;;  %v7499_v4 = vld [vmem:[#allocation10 + $0x170] sm:$0xf0]  ;;  %v8060_v43 = vpop.f32.mrf.mxu1  ;;  %v7517_v56 = vld [vmem:[#allocation10 + $0x200] sm:$0xf0] }
 0x12d   :  { %2342 = vmatpush.bf16.msra.mxu2 %v5436_v6  ;;  %2356 = vmatpush.bf16.msra.mxu3 %v5820_v10  ;;  %v6291_v6 = vld [vmem:[#allocation10 + $0x228] sm:$0xf]  ;;  %v6196_v18 = vor.u32 %v7499_v4, %v6195_v62  ;;  %v6363_v62 = vld [vmem:[#allocation10 + $0x2b8] sm:$0xf]  ;;  %v6076_v4 = vor.u32 %v7469_v47, %v6075_v46  ;;  %v7511_v46 = vld [vmem:[#allocation10 + $0x1d0] sm:$0xf0] }
 0x12e   :  { %v6387_v10 = vld [vmem:[#allocation10 + $0x2e8] sm:$0xf]  ;;  %v6292_v19 = vor.u32 %v7523_v7, %v6291_v6  ;;  %v6172_v6 = vor.u32 %v7493_v50, %v6171_v48  ;;  %v6268_v7 = vor.u32 %v7517_v56, %v6267_v51  ;;  %v7535_v51 = vld [vmem:[#allocation10 + $0x290] sm:$0xf0] }
 0x12f   :  { %2315 = vmatpush.bf16.msra.mxu0 %v5768_v21  ;;  %v6087_v21 = vld [vmem:[#allocation10 + $0x90] sm:$0xf]  ;;  %v6388_v26 = vor.u32 %v7547_v15, %v6387_v10  ;;  %v6159_v10 = vld [vmem:[#allocation10 + $0x120] sm:$0xf]  ;;  %v6339_v50 = vld [vmem:[#allocation10 + $0x288] sm:$0xf] }
 0x130   :  { %2329 = vmatpush.bf16.msra.mxu1 %v5004_v22  ;;  %v7472_v22 = vld [vmem:[#allocation10 + $0x98] sm:$0xf0]  ;;  %v8068_v15 = vpop.f32.mrf.mxu2 }
 0x131   :  { %2343 = vmatpush.bf16.msra.mxu2 %v5388_v23  ;;  %2357 = vmatpush.bf16.msra.mxu3 %v5772_v31  ;;  %v6183_v23 = vld [vmem:[#allocation10 + $0x150] sm:$0xf]  ;;  %v7496_v31 = vld [vmem:[#allocation10 + $0x158] sm:$0xf0] }
 0x133   :  { %2316 = vmatpush.bf16.msra.mxu0 %v5720_v41  ;;  %v6088_v41 = vor.u32 %v7472_v22, %v6087_v21  ;;  %v1914_v21 = vadd.f32 %v8010_v0, %v399_v61  ;;  %v6351_v22 = vld [vmem:[#allocation10 + $0x2a0] sm:$0xf]  ;;  %v7487_v0 = vld [vmem:[#allocation10 + $0x110] sm:$0xf0]  ;;  %v8080_v48 = vpop.f32.mrf.mxu0 }
 0x134   :  { %2330 = vmatpush.bf16.msra.mxu1 %v4956_v44  ;;  %v6184_v44 = vor.u32 %v7496_v31, %v6183_v23  ;;  %v7538_v23 = vld [vmem:[#allocation10 + $0x2a8] sm:$0xf0]  ;;  %v400_v31 = vperm.slane %v8056_v36, 2 }
 0x135   :  { %2344 = vmatpush.bf16.msra.mxu2 %v5340_v45  ;;  %2358 = vmatpush.bf16.msra.mxu3 %v5724_v49  ;;  %v6280_v45 = vor.u32 %v7520_v33, %v6279_v32  ;;  %v6376_v49 = vor.u32 %v7544_v35, %v6375_v34  ;;  %v401_v32 = vperm.slane %v8056_v36, 3  ;;  %v1928_v56 = vadd.f32 %v8020_v52, %v1914_v21 }
 0x136   :  { %v6340_v52 = vor.u32 %v7535_v51, %v6339_v50 }
 0x137   :  { %2317 = vmatpush.bf16.msra.mxu0 %v5672_v1  ;;  %v7541_v1 = vld [vmem:[#allocation10 + $0x2c0] sm:$0xf0] }
 0x138   :  { %2331 = vmatpush.bf16.msra.mxu1 %v4908_v8  ;;  %v6063_v8 = vld [vmem:[#allocation10 + $0x60] sm:$0xf] }
 0x139   :  { %2345 = vmatpush.bf16.msra.mxu2 %v5292_v9  ;;  %2359 = vmatpush.bf16.msra.mxu3 %v5676_v16  ;;  %v7466_v9 = vld [vmem:[#allocation10 + $0x68] sm:$0xf0]  ;;  %v6364_v16 = vor.u32 %v7541_v1, %v6363_v62  ;;  %v1958_v1 = vadd.f32 %v8036_v54, %v400_v31 }
 0x13a   :  { %2318 = vmatmul.bf16.vlgmr.msra.gmra.mxu0 %v7977_v20  ;;  %v6064_v33 = vor.u32 %v7466_v9, %v6063_v8  ;;  %v1998_v8 = vadd.f32 %v8042_v3, %v401_v32  ;;  %v2000_v9 = vadd.f32 %v8050_v59, %v401_v32  ;;  %v7481_v32 = vld [vmem:[#allocation10 + $0xe0] sm:$0xf0] }
 0x13b   :  { %4330 = vmatpush.bf16.msrb.mxu0 %v6100_v17  ;;  %2332 = vmatmul.bf16.vlgmr.msra.gmra.mxu1 %v7970_v57  ;;  %v8070_v57 = vpop.f32.mrf.mxu3  ;;  %v6255_v17 = vld [vmem:[#allocation10 + $0x1e0] sm:$0xf]  ;;  %v1972_v21 = vadd.f32 %v8038_v55, %v1958_v1 }
 0x13c   :  { %4344 = vmatpush.bf16.msrb.mxu1 %v6196_v18  ;;  %2346 = vmatmul.bf16.vlgmr.msra.gmra.mxu2 %v7973_v5  ;;  %v7490_v5 = vld [vmem:[#allocation10 + $0x128] sm:$0xf0] }
 0x13d   :  { %4358 = vmatpush.bf16.msrb.mxu2 %v6292_v19  ;;  %4372 = vmatpush.bf16.msrb.mxu3 %v6388_v26  ;;  %v7514_v18 = vld [vmem:[#allocation10 + $0x1e8] sm:$0xf0]  ;;  %v1874_v19 = vadd.f32 %v8012_v12, %v398_v60  ;;  %v1916_v26 = vadd.f32 %v8018_v40, %v399_v61  ;;  %v6160_v34 = vor.u32 %v7490_v5, %v6159_v10  ;;  %v6231_v10 = vld [vmem:[#allocation10 + $0x1b0] sm:$0xf] }
 0x13e   :  { %2360 = vmatmul.bf16.vlgmr.msra.gmra.mxu3 %v7977_v20  ;;  %v1872_v20 = vadd.f32 %v8004_v37, %v398_v60  ;;  %v6256_v35 = vor.u32 %v7514_v18, %v6255_v17  ;;  %v7463_v37 = vld [vmem:[#allocation10 + $0x50] sm:$0xf0]  ;;  %v6352_v12 = vor.u32 %v7538_v23, %v6351_v22  ;;  %v1956_v61 = vadd.f32 %v8024_v11, %v400_v31  ;;  %v7508_v11 = vld [vmem:[#allocation10 + $0x1b8] sm:$0xf0]  ;;  %v6327_v5 = vld [vmem:[#allocation10 + $0x270] sm:$0xf] }
 0x13f   :  { %4331 = vmatpush.bf16.msrb.mxu0 %v6088_v41  ;;  %v6051_v41 = vld [vmem:[#allocation10 + $0x48] sm:$0xf]  ;;  %v1888_v47 = vadd.f32 %v8014_v13, %v1874_v19  ;;  %v1930_v60 = vadd.f32 %v8032_v29, %v1916_v26  ;;  %v7484_v29 = vld [vmem:[#allocation10 + $0xf8] sm:$0xf0]  ;;  %v8097_v18 = vadd.f32 %v8022_v53, %v1928_v56  ;;  %v6232_v22 = vor.u32 %v7508_v11, %v6231_v10  ;;  %v6027_v23 = vld [vmem:[#allocation10 + $0x18] sm:$0xf] }
 0x140   :  { %4345 = vmatpush.bf16.msrb.mxu1 %v6184_v44  ;;  %v6147_v44 = vld [vmem:[#allocation10 + $0x108] sm:$0xf]  ;;  %v1886_v40 = vadd.f32 %v8006_v38, %v1872_v20  ;;  %v6052_v62 = vor.u32 %v7463_v37, %v6051_v41  ;;  %v7532_v17 = vld [vmem:[#allocation10 + $0x278] sm:$0xf0]  ;;  %v1970_v59 = vadd.f32 %v8026_v14, %v1956_v61  ;;  %v8103_v20 = vpop.f32.mrf.mxu2  ;;  %v7457_v53 = vld [vmem:[#allocation10 + $0x20] sm:$0xf0]  ;;  %v2014_v31 = vadd.f32 %v8052_v24, %v2000_v9 }
 0x141   :  { %4359 = vmatpush.bf16.msrb.mxu2 %v6280_v45  ;;  %4373 = vmatpush.bf16.msrb.mxu3 %v6376_v49  ;;  %v6243_v45 = vld [vmem:[#allocation10 + $0x1c8] sm:$0xf]  ;;  %v8082_v49 = vpop.f32.mrf.mxu1  ;;  %v6148_v38 = vor.u32 %v7487_v0, %v6147_v44  ;;  %v8094_v54 = vadd.f32 %v8016_v39, %v1888_v47  ;;  %v8100_v3 = vadd.f32 %v8034_v30, %v1930_v60  ;;  %v6123_v26 = vld [vmem:[#allocation10 + $0xd8] sm:$0xf]  ;;  %v7529_v37 = vld [vmem:[#allocation10 + $0x260] sm:$0xf0] }
 0x142   :  { %v6244_v13 = vor.u32 %v7511_v46, %v6243_v45  ;;  %v2012_v30 = vadd.f32 %v8044_v27, %v1998_v8  ;;  %v6328_v14 = vor.u32 %v7532_v17, %v6327_v5  ;;  %v6315_v41 = vld [vmem:[#allocation10 + $0x258] sm:$0xf]  ;;  %v2367_v44 = vmax.f32 %v8097_v18, 0.0  ;;  %v6015_v24 = vld [vmem:[#allocation10] sm:$0xf] }
 0x143   :  { %4332 = vmatpush.bf16.msrb.mxu0 %v6076_v4  ;;  %v6039_v4 = vld [vmem:[#allocation10 + $0x30] sm:$0xf]  ;;  %v8105_v19 = vpop.f32.mrf.mxu3  ;;  %v2378_v55 = vmax.f32 %v8094_v54, 0.0  ;;  %v1984_v0 = vadd.f32 %v8040_v2, %v1970_v59  ;;  %v6028_v27 = vor.u32 %v7457_v53, %v6027_v23  ;;  %v7454_v45 = vld [vmem:[#allocation10 + $0x8] sm:$0xf0]  ;;  %v1986_v46 = vadd.f32 %v8048_v58, %v1972_v21 }
 0x144   :  { %4346 = vmatpush.bf16.msrb.mxu1 %v6172_v6  ;;  %v7460_v6 = vld [vmem:[#allocation10 + $0x38] sm:$0xf0]  ;;  %v6124_v50 = vor.u32 %v7481_v32, %v6123_v26  ;;  %v6111_v56 = vld [vmem:[#allocation10 + $0xc0] sm:$0xf]  ;;  %v7478_v60 = vld [vmem:[#allocation10 + $0xc8] sm:$0xf0]  ;;  %v2028_v2 = vadd.f32 %v8054_v25, %v2014_v31  ;;  %v6316_v1 = vor.u32 %v7529_v37, %v6315_v41  ;;  %v6016_v8 = vor.u32 %v7454_v45, %v6015_v24 }
 0x145   :  { %4360 = vmatpush.bf16.msrb.mxu2 %v6268_v7  ;;  %4374 = vmatpush.bf16.msrb.mxu3 %v6364_v16  ;;  %v6135_v7 = vld [vmem:[#allocation10 + $0xf0] sm:$0xf]  ;;  %v8091_v16 = vadd.f32 %v8008_v63, %v1886_v40  ;;  %v6040_v63 = vor.u32 %v7460_v6, %v6039_v4  ;;  %v8116_v40 = vpop.f32.mrf.mxu0  ;;  %v6207_v61 = vld [vmem:[#allocation10 + $0x180] sm:$0xf]  ;;  %v7526_v58 = vld [vmem:[#allocation10 + $0x248] sm:$0xf0]  ;;  %v6112_v25 = vor.u32 %v7478_v60, %v6111_v56 }
 0x146   :  { %v6136_v39 = vor.u32 %v7484_v29, %v6135_v7  ;;  %v6483_v4 = vld [vmem:[#allocation10 + $0x3a8] sm:$0xf]  ;;  %v7571_v6 = vld [vmem:[#allocation10 + $0x3b0] sm:$0xf0]  ;;  %v2381_v17 = vmax.f32 %v2028_v2, 0.0  ;;  %v402_v60 = vperm.slane %v8056_v36, 4 }
 0x147   :  { %4333 = vmatpush.bf16.msrb.mxu0 %v6064_v33  ;;  %v6219_v33 = vld [vmem:[#allocation10 + $0x198] sm:$0xf]  ;;  %v6579_v7 = vld [vmem:[#allocation10 + $0x468] sm:$0xf]  ;;  %v7595_v9 = vld [vmem:[#allocation10 + $0x470] sm:$0xf0] }
 0x148   :  { %4347 = vmatpush.bf16.msrb.mxu1 %v6160_v34  ;;  %v7505_v34 = vld [vmem:[#allocation10 + $0x1a0] sm:$0xf0]  ;;  %v7619_v29 = vld [vmem:[#allocation10 + $0x530] sm:$0xf0]  ;;  %v8122_v10 = vpop.f32.mrf.mxu2  ;;  %v6771_v59 = vld [vmem:[#allocation10 + $0x5e8] sm:$0xf]  ;;  %v6580_v21 = vor.u32 %v7595_v9, %v6579_v7 }
 0x149   :  { %4361 = vmatpush.bf16.msrb.mxu2 %v6256_v35  ;;  %4375 = vmatpush.bf16.msrb.mxu3 %v6352_v12  ;;  %v2366_v35 = vmax.f32 %v8091_v16, 0.0  ;;  %v2379_v12 = vmax.f32 %v8100_v3, 0.0  ;;  %v8118_v47 = vpop.f32.mrf.mxu1  ;;  %v6220_v51 = vor.u32 %v7505_v34, %v6219_v33  ;;  %v2380_v16 = vmax.f32 %v1986_v46, 0.0  ;;  %v7568_v23 = vld [vmem:[#allocation10 + $0x398] sm:$0xf0] }
 0x14a   :  { %v6484_v3 = vor.u32 %v7571_v6, %v6483_v4  ;;  %v6567_v53 = vld [vmem:[#allocation10 + $0x450] sm:$0xf]  ;;  %v7592_v26 = vld [vmem:[#allocation10 + $0x458] sm:$0xf0]  ;;  %v6555_v46 = vld [vmem:[#allocation10 + $0x438] sm:$0xf] }
 0x14b   :  { %4334 = vmatpush.bf16.msrb.mxu0 %v6052_v62  ;;  %v2026_v62 = vadd.f32 %v8046_v28, %v2012_v30  ;;  %v8124_v11 = vpop.f32.mrf.mxu3  ;;  %v2368_v28 = vmax.f32 %v1984_v0, 0.0  ;;  %v6663_v30 = vld [vmem:[#allocation10 + $0x510] sm:$0xf]  ;;  %v7616_v31 = vld [vmem:[#allocation10 + $0x518] sm:$0xf0]  ;;  %v8128_v32 = vpack.c.bf16 %v2379_v12, %v2367_v44 }
 0x14c   :  { %4348 = vmatpush.bf16.msrb.mxu1 %v6148_v38  ;;  %v7502_v38 = vld [vmem:[#allocation10 + $0x188] sm:$0xf0]  ;;  %v6759_v37 = vld [vmem:[#allocation10 + $0x5d0] sm:$0xf]  ;;  %v7640_v0 = vld [vmem:[#allocation10 + $0x5d8] sm:$0xf0] }
 0x14d   :  { %4362 = vmatpush.bf16.msrb.mxu2 %v6244_v13  ;;  %4376 = vmatpush.bf16.msrb.mxu3 %v6340_v52  ;;  %v6303_v13 = vld [vmem:[#allocation10 + $0x240] sm:$0xf]  ;;  %v6675_v52 = vld [vmem:[#allocation10 + $0x528] sm:$0xf]  ;;  %v6208_v54 = vor.u32 %v7502_v38, %v6207_v61  ;;  %v2369_v5 = vmax.f32 %v2026_v62, 0.0  ;;  %v8130_v33 = vpack.c.bf16 %v2380_v16, %v2368_v28  ;;  %v8134_v24 = vpop.f32.mrf.mxu0  ;;  %v6760_v61 = vor.u32 %v7640_v0, %v6759_v37 }
 0x14e   :  { %v6304_v18 = vor.u32 %v7526_v58, %v6303_v13  ;;  %v6459_v44 = vld [vmem:[#allocation10 + $0x378] sm:$0xf]  ;;  %v7565_v12 = vld [vmem:[#allocation10 + $0x380] sm:$0xf0]  ;;  %v6447_v6 = vld [vmem:[#allocation10 + $0x360] sm:$0xf]  ;;  %v2040_v28 = vadd.f32 %v8058_v42, %v402_v60  ;;  %v2042_v16 = vadd.f32 %v8080_v48, %v402_v60 }
 0x14f   :  { %4335 = vmatpush.bf16.msrb.mxu0 %v6040_v63  ;;  %v7643_v63 = vld [vmem:[#allocation10 + $0x5f0] sm:$0xf0]  ;;  %v7613_v56 = vld [vmem:[#allocation10 + $0x500] sm:$0xf0]  ;;  %v6460_v62 = vor.u32 %v7565_v12, %v6459_v44  ;;  %v6747_v38 = vld [vmem:[#allocation10 + $0x5b8] sm:$0xf] }
 0x150   :  { %4349 = vmatpush.bf16.msrb.mxu1 %v6136_v39  ;;  %v6676_v39 = vor.u32 %v7619_v29, %v6675_v52  ;;  %v6772_v34 = vor.u32 %v7643_v63, %v6771_v59  ;;  %v2125_v2 = vpop.f32.mrf.mxu2  ;;  %v7637_v13 = vld [vmem:[#allocation10 + $0x5c0] sm:$0xf0]  ;;  %v7562_v7 = vld [vmem:[#allocation10 + $0x368] sm:$0xf0]  ;;  %v6639_v52 = vld [vmem:[#allocation10 + $0x4e0] sm:$0xf] }
 0x151   :  { %4363 = vmatpush.bf16.msrb.mxu2 %v6232_v22  ;;  %4377 = vmatpush.bf16.msrb.mxu3 %v6328_v14  ;;  %v6471_v22 = vld [vmem:[#allocation10 + $0x390] sm:$0xf]  ;;  %v8126_v14 = vpack.c.bf16 %v2378_v55, %v2366_v35  ;;  %v8136_v45 = vpop.f32.mrf.mxu1  ;;  %v6568_v35 = vor.u32 %v7592_v26, %v6567_v53  ;;  %v6664_v55 = vor.u32 %v7616_v31, %v6663_v30  ;;  %v7586_v9 = vld [vmem:[#allocation10 + $0x428] sm:$0xf0]  ;;  %v6435_v42 = vld [vmem:[#allocation10 + $0x348] sm:$0xf] }
 0x152   :  { %v6472_v41 = vor.u32 %v7568_v23, %v6471_v22  ;;  %v7610_v29 = vld [vmem:[#allocation10 + $0x4e8] sm:$0xf0]  ;;  %v7559_v22 = vld [vmem:[#allocation10 + $0x350] sm:$0xf0]  ;;  %v6531_v48 = vld [vmem:[#allocation10 + $0x408] sm:$0xf]  ;;  %v2054_v30 = vadd.f32 %v8060_v43, %v2040_v28  ;;  %v2056_v31 = vadd.f32 %v8082_v49, %v2042_v16 }
 0x153   :  { %4336 = vmatpush.bf16.msrb.mxu0 %v6028_v27  ;;  %v8132_v27 = vpack.c.bf16 %v2381_v17, %v2369_v5  ;;  %v6748_v5 = vor.u32 %v7637_v13, %v6747_v38  ;;  %v6448_v17 = vor.u32 %v7562_v7, %v6447_v6  ;;  %v7583_v23 = vld [vmem:[#allocation10 + $0x410] sm:$0xf0]  ;;  %v6627_v53 = vld [vmem:[#allocation10 + $0x4c8] sm:$0xf]  ;;  %v6436_v0 = vor.u32 %v7559_v22, %v6435_v42  ;;  %v7556_v43 = vld [vmem:[#allocation10 + $0x338] sm:$0xf0] }
 0x154   :  { %4350 = vmatpush.bf16.msrb.mxu1 %v6124_v50  ;;  %v7589_v50 = vld [vmem:[#allocation10 + $0x440] sm:$0xf0]  ;;  %v7607_v26 = vld [vmem:[#allocation10 + $0x4d0] sm:$0xf0]  ;;  %v6532_v12 = vor.u32 %v7583_v23, %v6531_v48  ;;  %v8158_v38 = vadd.f32 %v8068_v15, %v2054_v30  ;;  %v8162_v13 = vadd.f32 %v8103_v20, %v2056_v31 }
 0x155   :  { %4364 = vmatpush.bf16.msrb.mxu2 %v6220_v51  ;;  %4378 = vmatpush.bf16.msrb.mxu3 %v6316_v1  ;;  %v6651_v51 = vld [vmem:[#allocation10 + $0x4f8] sm:$0xf]  ;;  %v8143_v1 = vpop.f32.mrf.mxu3  ;;  %v6556_v58 = vor.u32 %v7589_v50, %v6555_v46  ;;  %v6628_v46 = vor.u32 %v7607_v26, %v6627_v53  ;;  %v6423_v50 = vld [vmem:[#allocation10 + $0x330] sm:$0xf]  ;;  %v7577_v16 = vld [vmem:[#allocation10 + $0x3e0] sm:$0xf0] }
 0x156   :  { %v6652_v4 = vor.u32 %v7613_v56, %v6651_v51  ;;  %v6519_v51 = vld [vmem:[#allocation10 + $0x3f0] sm:$0xf]  ;;  %v6424_v6 = vor.u32 %v7556_v43, %v6423_v50  ;;  %v7625_v42 = vld [vmem:[#allocation10 + $0x560] sm:$0xf0]  ;;  %v6495_v53 = vld [vmem:[#allocation10 + $0x3c0] sm:$0xf] }
 0x157   :  { %4337 = vmatpush.bf16.msrb.mxu0 %v6016_v8  ;;  %v6543_v8 = vld [vmem:[#allocation10 + $0x420] sm:$0xf]  ;;  %v8149_v59 = vpop.f32.mrf.mxu0  ;;  %v7574_v26 = vld [vmem:[#allocation10 + $0x3c8] sm:$0xf0] }
 0x158   :  { %4351 = vmatpush.bf16.msrb.mxu1 %v6112_v25  ;;  %v403_v25 = vperm.slane %v8056_v36, 5  ;;  %v6544_v63 = vor.u32 %v7586_v9, %v6543_v8 }
 0x159   :  { %4365 = vmatpush.bf16.msrb.mxu2 %v6208_v54  ;;  %4379 = vmatpush.bf16.msrb.mxu3 %v6304_v18  ;;  %v404_v54 = vperm.slane %v8056_v36, 6  ;;  %v6735_v18 = vld [vmem:[#allocation10 + $0x5a0] sm:$0xf] }
 0x15a   :  { %4338 = vmatmul.bf16.vlgmr.msrb.gmra.mxu0 %v8126_v14  ;;  %v2084_v44 = vadd.f32 %v8105_v19, %v403_v25 }
 0x15b   :  { %4386 = vmatpush.bf16.msra.mxu0 %v6484_v3  ;;  %4352 = vmatmul.bf16.vlgmr.msrb.gmra.mxu1 %v8128_v32  ;;  %v7634_v3 = vld [vmem:[#allocation10 + $0x5a8] sm:$0xf0]  ;;  %v2124_v49 = vadd.f32 %v8122_v10, %v404_v54  ;;  %v6711_v10 = vld [vmem:[#allocation10 + $0x570] sm:$0xf] }
 0x15c   :  { %4400 = vmatpush.bf16.msra.mxu1 %v6580_v21  ;;  %4366 = vmatmul.bf16.vlgmr.msrb.gmra.mxu2 %v8130_v33  ;;  %v6640_v21 = vor.u32 %v7610_v29, %v6639_v52  ;;  %v6736_v37 = vor.u32 %v7634_v3, %v6735_v18  ;;  %v2098_v7 = vadd.f32 %v8134_v24, %v2084_v44  ;;  %v6411_v52 = vld [vmem:[#allocation10 + $0x318] sm:$0xf]  ;;  %v7553_v29 = vld [vmem:[#allocation10 + $0x320] sm:$0xf0]  ;;  %v2382_v24 = vmax.f32 %v8162_v13, 0.0 }
 0x15d   :  { %4414 = vmatpush.bf16.msra.mxu2 %v6676_v39  ;;  %4380 = vmatmul.bf16.vlgmr.msrb.gmra.mxu3 %v8132_v27  ;;  %v2165_v39 = vpop.f32.mrf.mxu1  ;;  %v2138_v20 = vadd.f32 %v8124_v11, %v2124_v49  ;;  %v6699_v11 = vld [vmem:[#allocation10 + $0x558] sm:$0xf]  ;;  %v7667_v44 = vld [vmem:[#allocation10 + $0x6b0] sm:$0xf0]  ;;  %v7059_v49 = vld [vmem:[#allocation10 + $0x828] sm:$0xf] }
 0x15e   :  { %4428 = vmatpush.bf16.msra.mxu3 %v6772_v34  ;;  %v2082_v34 = vadd.f32 %v8070_v57, %v403_v25  ;;  %v2126_v57 = vadd.f32 %v2125_v2, %v404_v54  ;;  %v7628_v2 = vld [vmem:[#allocation10 + $0x578] sm:$0xf0]  ;;  %v6603_v25 = vld [vmem:[#allocation10 + $0x498] sm:$0xf]  ;;  %v7601_v54 = vld [vmem:[#allocation10 + $0x4a0] sm:$0xf0]  ;;  %v2112_v22 = vadd.f32 %v8136_v45, %v2098_v7  ;;  %v6700_v43 = vor.u32 %v7625_v42, %v6699_v11 }
 0x15f   :  { %4387 = vmatpush.bf16.msra.mxu0 %v6472_v41  ;;  %v405_v41 = vperm.slane %v8056_v36, 7  ;;  %v2179_v56 = vpop.f32.mrf.mxu2  ;;  %v6615_v36 = vld [vmem:[#allocation10 + $0x4b0] sm:$0xf]  ;;  %v2153_v18 = vpop.f32.mrf.mxu0  ;;  %v6604_v23 = vor.u32 %v7601_v54, %v6603_v25  ;;  %v2152_v30 = vadd.f32 %v8149_v59, %v2138_v20  ;;  %v7688_v7 = vld [vmem:[#allocation10 + $0x758] sm:$0xf0] }
 0x160   :  { %4401 = vmatpush.bf16.msra.mxu1 %v6568_v35  ;;  %v6723_v35 = vld [vmem:[#allocation10 + $0x588] sm:$0xf]  ;;  %v2096_v19 = vadd.f32 %v8116_v40, %v2082_v34  ;;  %v6507_v40 = vld [vmem:[#allocation10 + $0x3d8] sm:$0xf]  ;;  %v2140_v28 = vadd.f32 %v8143_v1, %v2126_v57  ;;  %v6399_v1 = vld [vmem:[#allocation10 + $0x300] sm:$0xf] }
 0x161   :  { %4415 = vmatpush.bf16.msra.mxu2 %v6664_v55  ;;  %v7631_v55 = vld [vmem:[#allocation10 + $0x590] sm:$0xf0]  ;;  %v2193_v60 = vpop.f32.mrf.mxu3  ;;  %v6508_v48 = vor.u32 %v7577_v16, %v6507_v40  ;;  %v2383_v59 = vmax.f32 %v2112_v22, 0.0  ;;  %v7709_v11 = vld [vmem:[#allocation10 + $0x800] sm:$0xf0] }
 0x162   :  { %4429 = vmatpush.bf16.msra.mxu3 %v6760_v61  ;;  %v7580_v61 = vld [vmem:[#allocation10 + $0x3f8] sm:$0xf0]  ;;  %v2154_v31 = vadd.f32 %v2153_v18, %v2140_v28  ;;  %v7715_v57 = vld [vmem:[#allocation10 + $0x830] sm:$0xf0]  ;;  %v7661_v18 = vld [vmem:[#allocation10 + $0x680] sm:$0xf0] }
 0x163   :  { %4388 = vmatpush.bf16.msra.mxu0 %v6460_v62  ;;  %v7604_v62 = vld [vmem:[#allocation10 + $0x4b8] sm:$0xf0]  ;;  %v6520_v8 = vor.u32 %v7580_v61, %v6519_v51  ;;  %v6496_v61 = vor.u32 %v7574_v26, %v6495_v53  ;;  %v7143_v53 = vld [vmem:[#allocation10 + $0x8d0] sm:$0xf]  ;;  %v6927_v26 = vld [vmem:[#allocation10 + $0x720] sm:$0xf] }
 0x164   :  { %4402 = vmatpush.bf16.msra.mxu1 %v6556_v58  ;;  %v2166_v58 = vadd.f32 %v2165_v39, %v405_v41  ;;  %v6616_v9 = vor.u32 %v7604_v62, %v6615_v36  ;;  %v6412_v39 = vor.u32 %v7553_v29, %v6411_v52  ;;  %v6687_v62 = vld [vmem:[#allocation10 + $0x540] sm:$0xf]  ;;  %v2384_v13 = vmax.f32 %v2154_v31, 0.0  ;;  %v7047_v52 = vld [vmem:[#allocation10 + $0x810] sm:$0xf] }
 0x165   :  { %4416 = vmatpush.bf16.msra.mxu2 %v6652_v4  ;;  %v6724_v4 = vor.u32 %v7631_v55, %v6723_v35  ;;  %v2167_v15 = vpop.f32.mrf.mxu1  ;;  %v6867_v35 = vld [vmem:[#allocation10 + $0x6a8] sm:$0xf]  ;;  %v7712_v29 = vld [vmem:[#allocation10 + $0x818] sm:$0xf0] }
 0x166   :  { %4430 = vmatpush.bf16.msra.mxu3 %v6748_v5  ;;  %v2370_v5 = vmax.f32 %v8158_v38, 0.0  ;;  %v2168_v3 = vadd.f32 %v2167_v15, %v405_v41  ;;  %v7048_v38 = vor.u32 %v7712_v29, %v7047_v52  ;;  %v7700_v52 = vld [vmem:[#allocation10 + $0x7b8] sm:$0xf0] }
 0x167   :  { %4389 = vmatpush.bf16.msra.mxu0 %v6448_v17  ;;  %v8169_v17 = vadd.f32 %v8118_v47, %v2096_v19  ;;  %v7550_v47 = vld [vmem:[#allocation10 + $0x308] sm:$0xf0]  ;;  %v2181_v34 = vpop.f32.mrf.mxu2  ;;  %v2372_v19 = vmax.f32 %v2152_v30, 0.0 }
 0x168   :  { %4403 = vmatpush.bf16.msra.mxu1 %v6544_v63  ;;  %v2180_v63 = vadd.f32 %v2179_v56, %v2166_v58  ;;  %v2182_v55 = vadd.f32 %v2181_v34, %v2168_v3  ;;  %v6400_v51 = vor.u32 %v7550_v47, %v6399_v1  ;;  %v6868_v58 = vor.u32 %v7667_v44, %v6867_v35  ;;  %v6939_v3 = vld [vmem:[#allocation10 + $0x738] sm:$0xf]  ;;  %v8188_v1 = vld [vmem:[#allocation9 + $0x8] sm:$0xf]  ;;  %v7658_v47 = vld [vmem:[#allocation10 + $0x668] sm:$0xf0] }
 0x169   :  { %4417 = vmatpush.bf16.msra.mxu2 %v6640_v21  ;;  %v6712_v21 = vor.u32 %v7628_v2, %v6711_v10  ;;  %v2195_v41 = vpop.f32.mrf.mxu3  ;;  %v2371_v45 = vmax.f32 %v8169_v17, 0.0  ;;  %v6855_v10 = vld [vmem:[#allocation10 + $0x690] sm:$0xf]  ;;  %v8177_v40 = vpack.c.bf16 %v2382_v24, %v2370_v5  ;;  %v8181_v16 = vpack.c.bf16 %v2384_v13, %v2372_v19  ;;  %v6843_v17 = vld [vmem:[#allocation10 + $0x678] sm:$0xf] }
 0x16a   :  { %4431 = vmatpush.bf16.msra.mxu3 %v6736_v37  ;;  %v6591_v37 = vld [vmem:[#allocation10 + $0x480] sm:$0xf]  ;;  %v2194_v50 = vadd.f32 %v2193_v60, %v2180_v63  ;;  %v2196_v56 = vadd.f32 %v2195_v41, %v2182_v55  ;;  %v7664_v60 = vld [vmem:[#allocation10 + $0x698] sm:$0xf0]  ;;  %v6951_v2 = vld [vmem:[#allocation10 + $0x750] sm:$0xf]  ;;  %v6844_v22 = vor.u32 %v7661_v18, %v6843_v17 }
 0x16b   :  { %4390 = vmatpush.bf16.msra.mxu0 %v6436_v0  ;;  %v7598_v0 = vld [vmem:[#allocation10 + $0x488] sm:$0xf0]  ;;  %v8179_v20 = vpack.c.bf16 %v2383_v59, %v2371_v45  ;;  %v6856_v25 = vor.u32 %v7664_v60, %v6855_v10  ;;  %v6952_v54 = vor.u32 %v7688_v7, %v6951_v2  ;;  %v7685_v63 = vld [vmem:[#allocation10 + $0x740] sm:$0xf0]  ;;  %v7155_v5 = vld [vmem:[#allocation10 + $0x8e8] sm:$0xf] }
 0x16c   :  { %4404 = vmatpush.bf16.msra.mxu1 %v6532_v12  ;;  %v6963_v12 = vld [vmem:[#allocation10 + $0x768] sm:$0xf]  ;;  %v6592_v36 = vor.u32 %v7598_v0, %v6591_v37  ;;  %v2385_v15 = vmax.f32 %v2196_v56, 0.0  ;;  %v7739_v24 = vld [vmem:[#allocation10 + $0x8f0] sm:$0xf0]  ;;  %v406_v41 = vperm.slane %v8188_v1, 0 }
 0x16d   :  { %4418 = vmatpush.bf16.msra.mxu2 %v6628_v46  ;;  %v7691_v46 = vld [vmem:[#allocation10 + $0x770] sm:$0xf0]  ;;  %v7156_v42 = vor.u32 %v7739_v24, %v7155_v5  ;;  %v7682_v30 = vld [vmem:[#allocation10 + $0x728] sm:$0xf0]  ;;  %v7736_v34 = vld [vmem:[#allocation10 + $0x8d8] sm:$0xf0] }
 0x16e   :  { %4432 = vmatpush.bf16.msra.mxu3 %v6724_v4  ;;  %v6964_v4 = vor.u32 %v7691_v46, %v6963_v12  ;;  %v7023_v37 = vld [vmem:[#allocation10 + $0x7e0] sm:$0xf]  ;;  %v7706_v0 = vld [vmem:[#allocation10 + $0x7e8] sm:$0xf0]  ;;  %v7144_v35 = vor.u32 %v7736_v34, %v7143_v53  ;;  %v6928_v44 = vor.u32 %v7682_v30, %v6927_v26  ;;  %v6819_v45 = vld [vmem:[#allocation10 + $0x648] sm:$0xf] }
 0x16f   :  { %4391 = vmatpush.bf16.msra.mxu0 %v6424_v6  ;;  %v7622_v6 = vld [vmem:[#allocation10 + $0x548] sm:$0xf0]  ;;  %v7733_v59 = vld [vmem:[#allocation10 + $0x8c0] sm:$0xf0]  ;;  %v6903_v60 = vld [vmem:[#allocation10 + $0x6f0] sm:$0xf] }
 0x170   :  { %4405 = vmatpush.bf16.msra.mxu1 %v6520_v8  ;;  %v7060_v8 = vor.u32 %v7715_v57, %v7059_v49  ;;  %v6688_v28 = vor.u32 %v7622_v6, %v6687_v62  ;;  %v7679_v49 = vld [vmem:[#allocation10 + $0x710] sm:$0xf0]  ;;  %v7024_v57 = vor.u32 %v7706_v0, %v7023_v37  ;;  %v7119_v6 = vld [vmem:[#allocation10 + $0x8a0] sm:$0xf]  ;;  %v7676_v2 = vld [vmem:[#allocation10 + $0x6f8] sm:$0xf0] }
 0x171   :  { %4419 = vmatpush.bf16.msra.mxu2 %v6616_v9  ;;  %v2373_v9 = vmax.f32 %v2194_v50, 0.0  ;;  %v7655_v50 = vld [vmem:[#allocation10 + $0x650] sm:$0xf0]  ;;  %v6795_v18 = vld [vmem:[#allocation10 + $0x618] sm:$0xf] }
 0x172   :  { %4433 = vmatpush.bf16.msra.mxu3 %v6712_v21  ;;  %v6820_v19 = vor.u32 %v7655_v50, %v6819_v45  ;;  %v7673_v5 = vld [vmem:[#allocation10 + $0x6e0] sm:$0xf0]  ;;  %v6783_v53 = vld [vmem:[#allocation10 + $0x600] sm:$0xf]  ;;  %v7646_v26 = vld [vmem:[#allocation10 + $0x608] sm:$0xf0] }
 0x173   :  { %4392 = vmatpush.bf16.msra.mxu0 %v6412_v39  ;;  %v8184_v21 = vpack.c.bf16 %v2385_v15, %v2373_v9  ;;  %v7035_v39 = vld [vmem:[#allocation10 + $0x7f8] sm:$0xf]  ;;  %v6999_v15 = vld [vmem:[#allocation10 + $0x7b0] sm:$0xf]  ;;  %v6879_v30 = vld [vmem:[#allocation10 + $0x6c0] sm:$0xf] }
 0x174   :  { %4406 = vmatpush.bf16.msra.mxu1 %v6508_v48  ;;  %v6940_v48 = vor.u32 %v7685_v63, %v6939_v3  ;;  %v7036_v31 = vor.u32 %v7709_v11, %v7035_v39  ;;  %v7649_v3 = vld [vmem:[#allocation10 + $0x620] sm:$0xf0]  ;;  %v6891_v63 = vld [vmem:[#allocation10 + $0x6d8] sm:$0xf]  ;;  %v7000_v24 = vor.u32 %v7700_v52, %v6999_v15  ;;  %v7107_v39 = vld [vmem:[#allocation10 + $0x888] sm:$0xf] }
 0x175   :  { %4420 = vmatpush.bf16.msra.mxu2 %v6604_v23  ;;  %v6831_v23 = vld [vmem:[#allocation10 + $0x660] sm:$0xf]  ;;  %v7727_v11 = vld [vmem:[#allocation10 + $0x890] sm:$0xf0]  ;;  %v6892_v34 = vor.u32 %v7673_v5, %v6891_v63  ;;  %v7670_v37 = vld [vmem:[#allocation10 + $0x6c8] sm:$0xf0] }
 0x176   :  { %4434 = vmatpush.bf16.msra.mxu3 %v6700_v43  ;;  %v6832_v55 = vor.u32 %v7658_v47, %v6831_v23  ;;  %v7131_v43 = vld [vmem:[#allocation10 + $0x8b8] sm:$0xf]  ;;  %v7108_v23 = vor.u32 %v7727_v11, %v7107_v39  ;;  %v7519_v52 = vld [vmem:[#allocation10 + $0x214] sm:$0xf]  ;;  %v6077_v63 = vld [vmem:[#allocation10 + $0x84] sm:$0xf0] }
 0x177   :  { %4393 = vmatpush.bf16.msra.mxu0 %v6400_v51  ;;  %v2207_v12 = vpop.f32.mrf.mxu0  ;;  %v6915_v51 = vld [vmem:[#allocation10 + $0x708] sm:$0xf]  ;;  %v7132_v62 = vor.u32 %v7733_v59, %v7131_v43  ;;  %v6101_v0 = vld [vmem:[#allocation10 + $0xb4] sm:$0xf0]  ;;  %v7522_v59 = vld [vmem:[#allocation10 + $0x22c] sm:$0xf] }
 0x178   :  { %4407 = vmatpush.bf16.msra.mxu1 %v6496_v61  ;;  %v2221_v46 = vpop.f32.mrf.mxu1  ;;  %v2208_v56 = vadd.f32 %v2207_v12, %v406_v41  ;;  %v7011_v61 = vld [vmem:[#allocation10 + $0x7c8] sm:$0xf]  ;;  %v6916_v13 = vor.u32 %v7679_v49, %v6915_v51  ;;  %v7095_v12 = vld [vmem:[#allocation10 + $0x870] sm:$0xf]  ;;  %v6197_v43 = vld [vmem:[#allocation10 + $0x174] sm:$0xf0] }
 0x179   :  { %4421 = vmatpush.bf16.msra.mxu2 %v6592_v36  ;;  %v7703_v36 = vld [vmem:[#allocation10 + $0x7d0] sm:$0xf0]  ;;  %v6975_v51 = vld [vmem:[#allocation10 + $0x780] sm:$0xf]  ;;  %v6173_v5 = vld [vmem:[#allocation10 + $0x144] sm:$0xf0] }
 0x17a   :  { %4394 = vmatmul.bf16.vlgmr.msra.gmra.mxu0 %v8177_v40  ;;  %4435 = vmatpush.bf16.msra.mxu3 %v6688_v28  ;;  %v7012_v7 = vor.u32 %v7703_v36, %v7011_v61  ;;  %v2222_v9 = vadd.f32 %v2221_v46, %v2208_v56  ;;  %v7724_v46 = vld [vmem:[#allocation10 + $0x878] sm:$0xf0]  ;;  %v6293_v56 = vld [vmem:[#allocation10 + $0x234] sm:$0xf0]  ;;  %v6784_v36 = vor.u32 %v7646_v26, %v6783_v53  ;;  %v7546_v39 = vld [vmem:[#allocation10 + $0x2ec] sm:$0xf] }
 0x17b   :  { %4442 = vmatpush.bf16.msrb.mxu0 %v6868_v58  ;;  %4408 = vmatmul.bf16.vlgmr.msra.gmra.mxu1 %v8179_v20  ;;  %v6807_v58 = vld [vmem:[#allocation10 + $0x630] sm:$0xf]  ;;  %v7096_v49 = vor.u32 %v7724_v46, %v7095_v12  ;;  %v6296_v15 = vor.u32 %v7522_v59, %v6293_v56  ;;  %v7513_v12 = vld [vmem:[#allocation10 + $0x1e4] sm:$0xf]  ;;  %v6149_v56 = vld [vmem:[#allocation10 + $0x114] sm:$0xf0] }
 0x17c   :  { %4456 = vmatpush.bf16.msrb.mxu1 %v6964_v4  ;;  %4422 = vmatmul.bf16.vlgmr.msra.gmra.mxu2 %v8181_v16  ;;  %v7652_v4 = vld [vmem:[#allocation10 + $0x638] sm:$0xf0]  ;;  %v6257_v46 = vld [vmem:[#allocation10 + $0x1ec] sm:$0xf0] }
 0x17d   :  { %4470 = vmatpush.bf16.msrb.mxu2 %v7060_v8  ;;  %4436 = vmatmul.bf16.vlgmr.msra.gmra.mxu3 %v8184_v21  ;;  %v7730_v8 = vld [vmem:[#allocation10 + $0x8a8] sm:$0xf0]  ;;  %v6808_v28 = vor.u32 %v7652_v4, %v6807_v58 }
 0x17e   :  { %4484 = vmatpush.bf16.msrb.mxu3 %v7156_v42  ;;  %v7120_v29 = vor.u32 %v7730_v8, %v7119_v6  ;;  %v7471_v6 = vld [vmem:[#allocation10 + $0x94] sm:$0xf] }
 0x17f   :  { %4443 = vmatpush.bf16.msrb.mxu0 %v6856_v25  ;;  %v2235_v10 = vpop.f32.mrf.mxu2  ;;  %v6904_v25 = vor.u32 %v7676_v2, %v6903_v60  ;;  %v7495_v60 = vld [vmem:[#allocation10 + $0x154] sm:$0xf]  ;;  %v6185_v2 = vld [vmem:[#allocation10 + $0x15c] sm:$0xf0] }
 0x180   :  { %4457 = vmatpush.bf16.msrb.mxu1 %v6952_v54  ;;  %v2209_v54 = vpop.f32.mrf.mxu0  ;;  %v2223_v17 = vpop.f32.mrf.mxu1  ;;  %v2236_v42 = vadd.f32 %v2235_v10, %v2222_v9  ;;  %v6089_v10 = vld [vmem:[#allocation10 + $0x9c] sm:$0xf0] }
 0x181   :  { %4471 = vmatpush.bf16.msrb.mxu2 %v7048_v38  ;;  %v2210_v38 = vadd.f32 %v2209_v54, %v406_v41  ;;  %v7474_v41 = vld [vmem:[#allocation10 + $0xac] sm:$0xf]  ;;  %v6092_v54 = vor.u32 %v7471_v6, %v6089_v10  ;;  %v6245_v6 = vld [vmem:[#allocation10 + $0x1d4] sm:$0xf0] }
 0x182   :  { %4485 = vmatpush.bf16.msrb.mxu3 %v7144_v35  ;;  %v2374_v45 = vmax.f32 %v2236_v42, 0.0  ;;  %v6104_v58 = vor.u32 %v7474_v41, %v6101_v0  ;;  %v6389_v42 = vld [vmem:[#allocation10 + $0x2f4] sm:$0xf0]  ;;  %v6161_v41 = vld [vmem:[#allocation10 + $0x12c] sm:$0xf0] }
 0x183   :  { %4444 = vmatpush.bf16.msrb.mxu0 %v6844_v22  ;;  %v6987_v22 = vld [vmem:[#allocation10 + $0x798] sm:$0xf]  ;;  %v2224_v47 = vadd.f32 %v2223_v17, %v2210_v38  ;;  %v6188_v17 = vor.u32 %v7495_v60, %v6185_v2  ;;  %v7492_v38 = vld [vmem:[#allocation10 + $0x13c] sm:$0xf]  ;;  %v6377_v0 = vld [vmem:[#allocation10 + $0x2dc] sm:$0xf0] }
 0x184   :  { %4458 = vmatpush.bf16.msrb.mxu1 %v6940_v48  ;;  %v7697_v48 = vld [vmem:[#allocation10 + $0x7a0] sm:$0xf0]  ;;  %v6176_v26 = vor.u32 %v7492_v38, %v6173_v5  ;;  %v7459_v2 = vld [vmem:[#allocation10 + $0x34] sm:$0xf] }
 0x185   :  { %4472 = vmatpush.bf16.msrb.mxu2 %v7036_v31  ;;  %v6796_v31 = vor.u32 %v7649_v3, %v6795_v18  ;;  %v2249_v18 = vpop.f32.mrf.mxu3  ;;  %v7468_v3 = vld [vmem:[#allocation10 + $0x7c] sm:$0xf] }
 0x186   :  { %4486 = vmatpush.bf16.msrb.mxu3 %v7132_v62  ;;  %v6880_v62 = vor.u32 %v7670_v37, %v6879_v30  ;;  %v6080_v53 = vor.u32 %v7468_v3, %v6077_v63  ;;  %v7465_v30 = vld [vmem:[#allocation10 + $0x64] sm:$0xf]  ;;  %v6233_v3 = vld [vmem:[#allocation10 + $0x1bc] sm:$0xf0] }
 0x187   :  { %4445 = vmatpush.bf16.msrb.mxu0 %v6832_v55  ;;  %v2237_v35 = vpop.f32.mrf.mxu2  ;;  %v7498_v55 = vld [vmem:[#allocation10 + $0x16c] sm:$0xf]  ;;  %v7489_v37 = vld [vmem:[#allocation10 + $0x124] sm:$0xf] }
 0x188   :  { %4459 = vmatpush.bf16.msrb.mxu1 %v6928_v44  ;;  %v6988_v44 = vor.u32 %v7697_v48, %v6987_v22  ;;  %v2238_v50 = vadd.f32 %v2237_v35, %v2224_v47  ;;  %v6200_v4 = vor.u32 %v7498_v55, %v6197_v43  ;;  %v407_v22 = vperm.slane %v8188_v1, 1  ;;  %v7516_v48 = vld [vmem:[#allocation10 + $0x1fc] sm:$0xf] }
 0x189   :  { %4473 = vmatpush.bf16.msrb.mxu2 %v7024_v57  ;;  %v7694_v57 = vld [vmem:[#allocation10 + $0x788] sm:$0xf0]  ;;  %v6392_v47 = vor.u32 %v7546_v39, %v6389_v42  ;;  %v6164_v43 = vor.u32 %v7489_v37, %v6161_v41  ;;  %v6029_v39 = vld [vmem:[#allocation10 + $0x24] sm:$0xf0]  ;;  %v6017_v37 = vld [vmem:[#allocation10 + $0xc] sm:$0xf0] }
 0x18a   :  { %4487 = vmatpush.bf16.msrb.mxu3 %v7120_v29  ;;  %v2386_v61 = vmax.f32 %v2238_v50, 0.0  ;;  %v6281_v29 = vld [vmem:[#allocation10 + $0x21c] sm:$0xf0]  ;;  %v7504_v41 = vld [vmem:[#allocation10 + $0x19c] sm:$0xf] }
 0x18b   :  { %4446 = vmatpush.bf16.msrb.mxu0 %v6820_v19  ;;  %v7083_v19 = vld [vmem:[#allocation10 + $0x858] sm:$0xf]  ;;  %v6284_v11 = vor.u32 %v7519_v52, %v6281_v29  ;;  %v7483_v52 = vld [vmem:[#allocation10 + $0xf4] sm:$0xf]  ;;  %v6137_v29 = vld [vmem:[#allocation10 + $0xfc] sm:$0xf0] }
 0x18c   :  { %4460 = vmatpush.bf16.msrb.mxu1 %v6916_v13  ;;  %v7721_v13 = vld [vmem:[#allocation10 + $0x860] sm:$0xf0]  ;;  %v8192_v9 = vpack.c.bf16 %v2386_v61, %v2374_v45  ;;  %v7540_v61 = vld [vmem:[#allocation10 + $0x2bc] sm:$0xf]  ;;  %v6140_v5 = vor.u32 %v7483_v52, %v6137_v29 }
 0x18d   :  { %4474 = vmatpush.bf16.msrb.mxu2 %v7012_v7  ;;  %v6976_v7 = vor.u32 %v7694_v57, %v6975_v51  ;;  %v7084_v8 = vor.u32 %v7721_v13, %v7083_v19  ;;  %v7462_v51 = vld [vmem:[#allocation10 + $0x4c] sm:$0xf]  ;;  %v6260_v19 = vor.u32 %v7513_v12, %v6257_v46  ;;  %v6113_v12 = vld [vmem:[#allocation10 + $0xcc] sm:$0xf0] }
 0x18e   :  { %4488 = vmatpush.bf16.msrb.mxu3 %v7108_v23  ;;  %v6269_v23 = vld [vmem:[#allocation10 + $0x204] sm:$0xf0]  ;;  %v7486_v57 = vld [vmem:[#allocation10 + $0x10c] sm:$0xf] }
 0x18f   :  { %4447 = vmatpush.bf16.msrb.mxu0 %v6808_v28  ;;  %v7071_v28 = vld [vmem:[#allocation10 + $0x840] sm:$0xf]  ;;  %v6272_v35 = vor.u32 %v7516_v48, %v6269_v23  ;;  %v6152_v60 = vor.u32 %v7486_v57, %v6149_v56  ;;  %v6125_v48 = vld [vmem:[#allocation10 + $0xe4] sm:$0xf0]  ;;  %v7534_v23 = vld [vmem:[#allocation10 + $0x28c] sm:$0xf] }
 0x190   :  { %4461 = vmatpush.bf16.msrb.mxu1 %v6904_v25  ;;  %v7718_v25 = vld [vmem:[#allocation10 + $0x848] sm:$0xf0]  ;;  %v6581_v57 = vld [vmem:[#allocation10 + $0x474] sm:$0xf0] }
 0x191   :  { %4475 = vmatpush.bf16.msrb.mxu2 %v7000_v24  ;;  %v7072_v24 = vor.u32 %v7718_v25, %v7071_v28  ;;  %v6353_v28 = vld [vmem:[#allocation10 + $0x2ac] sm:$0xf0]  ;;  %v7570_v46 = vld [vmem:[#allocation10 + $0x3ac] sm:$0xf] }
 0x192   :  { %4489 = vmatpush.bf16.msrb.mxu3 %v7096_v49  ;;  %v6053_v49 = vld [vmem:[#allocation10 + $0x54] sm:$0xf0] }
 0x193   :  { %4448 = vmatpush.bf16.msrb.mxu0 %v6796_v31  ;;  %v6065_v31 = vld [vmem:[#allocation10 + $0x6c] sm:$0xf0]  ;;  %v6056_v10 = vor.u32 %v7462_v51, %v6053_v49  ;;  %v6485_v51 = vld [vmem:[#allocation10 + $0x3b4] sm:$0xf0]  ;;  %v7594_v49 = vld [vmem:[#allocation10 + $0x46c] sm:$0xf] }
 0x194   :  { %4462 = vmatpush.bf16.msrb.mxu1 %v6892_v34  ;;  %v7543_v34 = vld [vmem:[#allocation10 + $0x2d4] sm:$0xf]  ;;  %v6068_v50 = vor.u32 %v7465_v30, %v6065_v31 }
 0x195   :  { %4476 = vmatpush.bf16.msrb.mxu2 %v6988_v44  ;;  %v6380_v55 = vor.u32 %v7543_v34, %v6377_v0  ;;  %v2250_v44 = vadd.f32 %v2249_v18, %v407_v22  ;;  %v7507_v18 = vld [vmem:[#allocation10 + $0x1b4] sm:$0xf]  ;;  %v7453_v34 = vld [vmem:[#allocation10 + $0x4] sm:$0xf]  ;;  %v6221_v0 = vld [vmem:[#allocation10 + $0x1a4] sm:$0xf0] }
 0x196   :  { %4490 = vmatpush.bf16.msrb.mxu3 %v7084_v8  ;;  %v7537_v8 = vld [vmem:[#allocation10 + $0x2a4] sm:$0xf] }
 0x197   :  { %4449 = vmatpush.bf16.msrb.mxu0 %v6784_v36  ;;  %v2263_v45 = vpop.f32.mrf.mxu0  ;;  %v6365_v36 = vld [vmem:[#allocation10 + $0x2c4] sm:$0xf0] }
 0x198   :  { %4463 = vmatpush.bf16.msrb.mxu1 %v6880_v62  ;;  %v2277_v59 = vpop.f32.mrf.mxu1  ;;  %v2251_v62 = vpop.f32.mrf.mxu3  ;;  %v6368_v13 = vor.u32 %v7540_v61, %v6365_v36  ;;  %v7501_v36 = vld [vmem:[#allocation10 + $0x184] sm:$0xf] }
 0x199   :  { %4477 = vmatpush.bf16.msrb.mxu2 %v6976_v7  ;;  %v6041_v7 = vld [vmem:[#allocation10 + $0x3c] sm:$0xf0] }
 0x19a   :  { %4450 = vmatmul.bf16.vlgmr.msrb.gmra.mxu0 %v8192_v9  ;;  %4491 = vmatpush.bf16.msrb.mxu3 %v7072_v24  ;;  %v6044_v38 = vor.u32 %v7459_v2, %v6041_v7  ;;  %v7456_v24 = vld [vmem:[#allocation10 + $0x1c] sm:$0xf]  ;;  %v6473_v2 = vld [vmem:[#allocation10 + $0x39c] sm:$0xf0]  ;;  %v7591_v7 = vld [vmem:[#allocation10 + $0x454] sm:$0xf] }
 0x19b   :  { %4498 = vmatpush.bf16.msra.mxu0 %v6104_v58  ;;  %v2264_v58 = vadd.f32 %v2263_v45, %v2250_v44  ;;  %v7477_v44 = vld [vmem:[#allocation10 + $0xc4] sm:$0xf] }
 0x19c   :  { %4512 = vmatpush.bf16.msra.mxu1 %v6200_v4  ;;  %v7510_v4 = vld [vmem:[#allocation10 + $0x1cc] sm:$0xf] }
 0x19d   :  { %4526 = vmatpush.bf16.msra.mxu2 %v6296_v15  ;;  %v2252_v15 = vadd.f32 %v2251_v62, %v407_v22  ;;  %v6248_v25 = vor.u32 %v7510_v4, %v6245_v6  ;;  %v6209_v62 = vld [vmem:[#allocation10 + $0x18c] sm:$0xf0]  ;;  %v6317_v4 = vld [vmem:[#allocation10 + $0x264] sm:$0xf0]  ;;  %v6488_v6 = vor.u32 %v7570_v46, %v6485_v51  ;;  %v409_v51 = vperm.slane %v8188_v1, 3 }
 0x19e   :  { %4540 = vmatpush.bf16.msra.mxu3 %v6392_v47  ;;  %v6341_v47 = vld [vmem:[#allocation10 + $0x294] sm:$0xf0] }
 0x19f   :  { %4499 = vmatpush.bf16.msra.mxu0 %v6092_v54  ;;  %v6356_v54 = vor.u32 %v7537_v8, %v6353_v28  ;;  %v2265_v63 = vpop.f32.mrf.mxu0  ;;  %v6569_v8 = vld [vmem:[#allocation10 + $0x45c] sm:$0xf0]  ;;  %v2291_v29 = vpop.f32.mrf.mxu2 }
 0x1a0   :  { %4513 = vmatpush.bf16.msra.mxu1 %v6188_v17  ;;  %v2278_v17 = vadd.f32 %v2277_v59, %v2264_v58  ;;  %v2266_v42 = vadd.f32 %v2265_v63, %v2252_v15  ;;  %v2279_v22 = vpop.f32.mrf.mxu1  ;;  %v6224_v59 = vor.u32 %v7504_v41, %v6221_v0  ;;  %v7528_v58 = vld [vmem:[#allocation10 + $0x25c] sm:$0xf]  ;;  %v6212_v15 = vor.u32 %v7501_v36, %v6209_v62  ;;  %v6461_v63 = vld [vmem:[#allocation10 + $0x384] sm:$0xf0]  ;;  %v6437_v41 = vld [vmem:[#allocation10 + $0x354] sm:$0xf0] }
 0x1a1   :  { %4527 = vmatpush.bf16.msra.mxu2 %v6284_v11  ;;  %v7480_v11 = vld [vmem:[#allocation10 + $0xdc] sm:$0xf]  ;;  %v6320_v52 = vor.u32 %v7528_v58, %v6317_v4  ;;  %v2305_v28 = vpop.f32.mrf.mxu3  ;;  %v7582_v0 = vld [vmem:[#allocation10 + $0x40c] sm:$0xf] }
 0x1a2   :  { %4541 = vmatpush.bf16.msra.mxu3 %v6380_v55  ;;  %v2375_v30 = vmax.f32 %v2278_v17, 0.0  ;;  %v2280_v31 = vadd.f32 %v2279_v22, %v2266_v42  ;;  %v6128_v55 = vor.u32 %v7480_v11, %v6125_v48  ;;  %v7561_v42 = vld [vmem:[#allocation10 + $0x364] sm:$0xf]  ;;  %v6449_v22 = vld [vmem:[#allocation10 + $0x36c] sm:$0xf0] }
 0x1a3   :  { %4500 = vmatpush.bf16.msra.mxu0 %v6080_v53  ;;  %v6236_v53 = vor.u32 %v7507_v18, %v6233_v3  ;;  %v6572_v18 = vor.u32 %v7591_v7, %v6569_v8  ;;  %v7564_v3 = vld [vmem:[#allocation10 + $0x37c] sm:$0xf]  ;;  %v7585_v48 = vld [vmem:[#allocation10 + $0x424] sm:$0xf]  ;;  %v6509_v7 = vld [vmem:[#allocation10 + $0x3e4] sm:$0xf0] }
 0x1a4   :  { %4514 = vmatpush.bf16.msra.mxu1 %v6176_v26  ;;  %v6344_v26 = vor.u32 %v7534_v23, %v6341_v47  ;;  %v2387_v45 = vmax.f32 %v2280_v31, 0.0  ;;  %v6545_v23 = vld [vmem:[#allocation10 + $0x42c] sm:$0xf0]  ;;  %v408_v47 = vperm.slane %v8188_v1, 2  ;;  %v7558_v31 = vld [vmem:[#allocation10 + $0x34c] sm:$0xf] }
 0x1a5   :  { %4528 = vmatpush.bf16.msra.mxu2 %v6272_v35  ;;  %v6032_v35 = vor.u32 %v7456_v24, %v6029_v39  ;;  %v6464_v39 = vor.u32 %v7564_v3, %v6461_v63  ;;  %v6440_v46 = vor.u32 %v7558_v31, %v6437_v41  ;;  %v7552_v58 = vld [vmem:[#allocation10 + $0x31c] sm:$0xf]  ;;  %v7618_v8 = vld [vmem:[#allocation10 + $0x52c] sm:$0xf]  ;;  %v7573_v63 = vld [vmem:[#allocation10 + $0x3c4] sm:$0xf] }
 0x1a6   :  { %4542 = vmatpush.bf16.msra.mxu3 %v6368_v13  ;;  %v8196_v61 = vpack.c.bf16 %v2387_v45, %v2375_v30  ;;  %v6116_v13 = vor.u32 %v7477_v44, %v6113_v12  ;;  %v6548_v30 = vor.u32 %v7585_v48, %v6545_v23  ;;  %v7615_v23 = vld [vmem:[#allocation10 + $0x514] sm:$0xf] }
 0x1a7   :  { %4501 = vmatpush.bf16.msra.mxu0 %v6068_v50  ;;  %v7531_v50 = vld [vmem:[#allocation10 + $0x274] sm:$0xf] }
 0x1a8   :  { %4515 = vmatpush.bf16.msra.mxu1 %v6164_v43  ;;  %v6329_v43 = vld [vmem:[#allocation10 + $0x27c] sm:$0xf0] }
 0x1a9   :  { %4529 = vmatpush.bf16.msra.mxu2 %v6260_v19  ;;  %v6332_v56 = vor.u32 %v7531_v50, %v6329_v43  ;;  %v6020_v19 = vor.u32 %v7453_v34, %v6017_v37  ;;  %4464 = vmatmul.bf16.vlgmr.msrb.gmra.mxu1 %v8196_v61  ;;  %v2307_v34 = vpop.f32.mrf.mxu3  ;;  %v7555_v50 = vld [vmem:[#allocation10 + $0x334] sm:$0xf]  ;;  %v6425_v43 = vld [vmem:[#allocation10 + $0x33c] sm:$0xf0] }
 0x1aa   :  { %4543 = vmatpush.bf16.msra.mxu3 %v6356_v54  ;;  %v6305_v54 = vld [vmem:[#allocation10 + $0x24c] sm:$0xf0] }
 0x1ab   :  { %4502 = vmatpush.bf16.msra.mxu0 %v6056_v10  ;;  %v6584_v10 = vor.u32 %v7594_v49, %v6581_v57  ;;  %v7579_v49 = vld [vmem:[#allocation10 + $0x3f4] sm:$0xf]  ;;  %v6521_v57 = vld [vmem:[#allocation10 + $0x3fc] sm:$0xf0] }
 0x1ac   :  { %4516 = vmatpush.bf16.msra.mxu1 %v6152_v60  ;;  %v7567_v60 = vld [vmem:[#allocation10 + $0x394] sm:$0xf] }
 0x1ad   :  { %4530 = vmatpush.bf16.msra.mxu2 %v6248_v25  ;;  %v7525_v25 = vld [vmem:[#allocation10 + $0x244] sm:$0xf]  ;;  %v6476_v17 = vor.u32 %v7567_v60, %v6473_v2  ;;  %v6413_v60 = vld [vmem:[#allocation10 + $0x324] sm:$0xf0]  ;;  %v7576_v2 = vld [vmem:[#allocation10 + $0x3dc] sm:$0xf] }
 0x1ae   :  { %4544 = vmatpush.bf16.msra.mxu3 %v6344_v26  ;;  %v6308_v24 = vor.u32 %v7525_v25, %v6305_v54  ;;  %v6452_v26 = vor.u32 %v7561_v42, %v6449_v22  ;;  %v6416_v25 = vor.u32 %v7552_v58, %v6413_v60  ;;  %v6512_v54 = vor.u32 %v7576_v2, %v6509_v7  ;;  %v7690_v42 = vld [vmem:[#allocation10 + $0x76c] sm:$0xf]  ;;  %v6965_v22 = vld [vmem:[#allocation10 + $0x774] sm:$0xf0]  ;;  %v7684_v58 = vld [vmem:[#allocation10 + $0x73c] sm:$0xf] }
 0x1af   :  { %4503 = vmatpush.bf16.msra.mxu0 %v6044_v38  ;;  %v7588_v38 = vld [vmem:[#allocation10 + $0x43c] sm:$0xf]  ;;  %v6968_v41 = vor.u32 %v7690_v42, %v6965_v22  ;;  %v7609_v60 = vld [vmem:[#allocation10 + $0x4e4] sm:$0xf]  ;;  %v6641_v2 = vld [vmem:[#allocation10 + $0x4ec] sm:$0xf0] }
 0x1b0   :  { %4517 = vmatpush.bf16.msra.mxu1 %v6140_v5  ;;  %v6557_v5 = vld [vmem:[#allocation10 + $0x444] sm:$0xf0]  ;;  %v7639_v7 = vld [vmem:[#allocation10 + $0x5d4] sm:$0xf]  ;;  %v6821_v42 = vld [vmem:[#allocation10 + $0x654] sm:$0xf0] }
 0x1b1   :  { %4531 = vmatpush.bf16.msra.mxu2 %v6236_v53  ;;  %v6560_v11 = vor.u32 %v7588_v38, %v6557_v5  ;;  %v2293_v53 = vpop.f32.mrf.mxu2  ;;  %v6497_v38 = vld [vmem:[#allocation10 + $0x3cc] sm:$0xf0]  ;;  %v7666_v5 = vld [vmem:[#allocation10 + $0x6ac] sm:$0xf] }
 0x1b2   :  { %4545 = vmatpush.bf16.msra.mxu3 %v6332_v56  ;;  %v2294_v12 = vadd.f32 %v2293_v53, %v408_v47  ;;  %v6428_v56 = vor.u32 %v7555_v50, %v6425_v43  ;;  %v7612_v50 = vld [vmem:[#allocation10 + $0x4fc] sm:$0xf]  ;;  %v6653_v43 = vld [vmem:[#allocation10 + $0x504] sm:$0xf0]  ;;  %v7678_v22 = vld [vmem:[#allocation10 + $0x70c] sm:$0xf] }
 0x1b3   :  { %4504 = vmatpush.bf16.msra.mxu0 %v6032_v35  ;;  %v6533_v35 = vld [vmem:[#allocation10 + $0x414] sm:$0xf0] }
 0x1b4   :  { %4518 = vmatpush.bf16.msra.mxu1 %v6128_v55  ;;  %v2292_v55 = vadd.f32 %v2291_v29, %v408_v47  ;;  %v6536_v45 = vor.u32 %v7582_v0, %v6533_v35  ;;  %v2308_v36 = vadd.f32 %v2307_v34, %v2294_v12  ;;  %v6665_v47 = vld [vmem:[#allocation10 + $0x51c] sm:$0xf0]  ;;  %v7663_v0 = vld [vmem:[#allocation10 + $0x694] sm:$0xf] }
 0x1b5   :  { %4532 = vmatpush.bf16.msra.mxu2 %v6224_v59  ;;  %v7687_v12 = vld [vmem:[#allocation10 + $0x754] sm:$0xf] }
 0x1b6   :  { %4546 = vmatpush.bf16.msra.mxu3 %v6320_v52  ;;  %v2306_v59 = vadd.f32 %v2305_v28, %v2292_v55  ;;  %v6668_v55 = vor.u32 %v7615_v23, %v6665_v47 }
 0x1b7   :  { %4505 = vmatpush.bf16.msra.mxu0 %v6020_v19  ;;  %v2319_v37 = vpop.f32.mrf.mxu0 }
 0x1b8   :  { %4519 = vmatpush.bf16.msra.mxu1 %v6116_v13  ;;  %v2333_v44 = vpop.f32.mrf.mxu1  ;;  %v2320_v62 = vadd.f32 %v2319_v37, %v2306_v59  ;;  %v6524_v13 = vor.u32 %v7579_v49, %v6521_v57  ;;  %v6773_v49 = vld [vmem:[#allocation10 + $0x5f4] sm:$0xf0] }
 0x1b9   :  { %4533 = vmatpush.bf16.msra.mxu2 %v6212_v15  ;;  %v2334_v4 = vadd.f32 %v2333_v44, %v409_v51  ;;  %v6677_v15 = vld [vmem:[#allocation10 + $0x534] sm:$0xf0]  ;;  %v6857_v44 = vld [vmem:[#allocation10 + $0x69c] sm:$0xf0] }
 0x1ba   :  { %4506 = vmatmul.bf16.vlgmr.msra.gmra.mxu0 %v8126_v14  ;;  %4547 = vmatpush.bf16.msra.mxu3 %v6308_v24  ;;  %v2376_v52 = vmax.f32 %v2320_v62, 0.0  ;;  %v7660_v62 = vld [vmem:[#allocation10 + $0x67c] sm:$0xf] }
 0x1bb   :  { %4554 = vmatpush.bf16.msrb.mxu0 %v6488_v6  ;;  %4520 = vmatmul.bf16.vlgmr.msra.gmra.mxu1 %v8128_v32 }
 0x1bc   :  { %4568 = vmatpush.bf16.msrb.mxu1 %v6584_v10 }
 0x1bf   :  { %4555 = vmatpush.bf16.msrb.mxu0 %v6476_v17  ;;  %v2347_v19 = vpop.f32.mrf.mxu2  ;;  %v2321_v10 = vpop.f32.mrf.mxu0  ;;  %v7549_v17 = vld [vmem:[#allocation10 + $0x304] sm:$0xf] }
 0x1c0   :  { %4569 = vmatpush.bf16.msrb.mxu1 %v6572_v18  ;;  %v2322_v1 = vadd.f32 %v2321_v10, %v2308_v36  ;;  %v2335_v28 = vpop.f32.mrf.mxu1  ;;  %v6401_v18 = vld [vmem:[#allocation10 + $0x30c] sm:$0xf0]  ;;  %v2348_v3 = vadd.f32 %v2347_v19, %v2334_v4  ;;  %v6656_v19 = vor.u32 %v7612_v50, %v6653_v43  ;;  %v6941_v4 = vld [vmem:[#allocation10 + $0x744] sm:$0xf0]  ;;  %v7630_v50 = vld [vmem:[#allocation10 + $0x58c] sm:$0xf] }
 0x1c1   :  { %v2361_v6 = vpop.f32.mrf.mxu3  ;;  %v2336_v48 = vadd.f32 %v2335_v28, %v409_v51  ;;  %v7642_v51 = vld [vmem:[#allocation10 + $0x5ec] sm:$0xf]  ;;  %v6833_v28 = vld [vmem:[#allocation10 + $0x66c] sm:$0xf0]  ;;  %v6725_v43 = vld [vmem:[#allocation10 + $0x594] sm:$0xf0] }
 0x1c2   :  { %v2388_v29 = vmax.f32 %v2322_v1, 0.0  ;;  %v2362_v31 = vadd.f32 %v2361_v6, %v2348_v3  ;;  %v6776_v10 = vor.u32 %v7642_v51, %v6773_v49  ;;  %v6761_v1 = vld [vmem:[#allocation10 + $0x5dc] sm:$0xf0]  ;;  %v6629_v3 = vld [vmem:[#allocation10 + $0x4d4] sm:$0xf0] }
 0x1c3   :  { %4556 = vmatpush.bf16.msrb.mxu0 %v6464_v39  ;;  %v6680_v39 = vor.u32 %v7618_v8, %v6677_v15  ;;  %v6944_v15 = vor.u32 %v7684_v58, %v6941_v4  ;;  %v6593_v58 = vld [vmem:[#allocation10 + $0x48c] sm:$0xf0]  ;;  %v7627_v4 = vld [vmem:[#allocation10 + $0x574] sm:$0xf] }
 0x1c4   :  { %4570 = vmatpush.bf16.msrb.mxu1 %v6560_v11  ;;  %v8203_v24 = vpack.c.bf16 %v2388_v29, %v2376_v52  ;;  %v6869_v11 = vld [vmem:[#allocation10 + $0x6b4] sm:$0xf0]  ;;  %v2377_v57 = vmax.f32 %v2362_v31, 0.0  ;;  %v7657_v52 = vld [vmem:[#allocation10 + $0x664] sm:$0xf]  ;;  %v6644_v29 = vor.u32 %v7609_v60, %v6641_v2 }
 0x1c5   :  { %v6872_v37 = vor.u32 %v7666_v5, %v6869_v11  ;;  %v6836_v5 = vor.u32 %v7657_v52, %v6833_v28  ;;  %v7654_v11 = vld [vmem:[#allocation10 + $0x64c] sm:$0xf]  ;;  %v6737_v31 = vld [vmem:[#allocation10 + $0x5ac] sm:$0xf0]  ;;  %v7669_v52 = vld [vmem:[#allocation10 + $0x6c4] sm:$0xf] }
 0x1c6   :  { %4478 = vmatmul.bf16.vlgmr.msrb.gmra.mxu2 %v8203_v24 }
 0x1c7   :  { %4557 = vmatpush.bf16.msrb.mxu0 %v6452_v26  ;;  %v2349_v53 = vpop.f32.mrf.mxu2  ;;  %v6404_v26 = vor.u32 %v7549_v17, %v6401_v18  ;;  %4582 = vmatpush.bf16.msrb.mxu2 %v6680_v39  ;;  %v6764_v17 = vor.u32 %v7639_v7, %v6761_v1  ;;  %v7606_v18 = vld [vmem:[#allocation10 + $0x4cc] sm:$0xf]  ;;  %v7061_v1 = vld [vmem:[#allocation10 + $0x834] sm:$0xf0] }
 0x1c8   :  { %4571 = vmatpush.bf16.msrb.mxu1 %v6548_v30  ;;  %v6500_v30 = vor.u32 %v7573_v63, %v6497_v38  ;;  %v2350_v34 = vadd.f32 %v2349_v53, %v2336_v48  ;;  %v7636_v63 = vld [vmem:[#allocation10 + $0x5bc] sm:$0xf]  ;;  %v6749_v38 = vld [vmem:[#allocation10 + $0x5c4] sm:$0xf0]  ;;  %v6917_v48 = vld [vmem:[#allocation10 + $0x714] sm:$0xf0]  ;;  %v6632_v23 = vor.u32 %v7606_v18, %v6629_v3 }
 0x1c9   :  { %v2363_v35 = vpop.f32.mrf.mxu3  ;;  %v6752_v47 = vor.u32 %v7636_v63, %v6749_v38  ;;  %v7603_v53 = vld [vmem:[#allocation10 + $0x4b4] sm:$0xf]  ;;  %v7714_v7 = vld [vmem:[#allocation10 + $0x82c] sm:$0xf]  ;;  %v7476_v18 = vld [vmem:[#allocation10 + $0xb8] sm:$0xf0] }
 0x1ca   :  { %v7064_v3 = vor.u32 %v7714_v7, %v7061_v1  ;;  %v6701_v63 = vld [vmem:[#allocation10 + $0x564] sm:$0xf0]  ;;  %v6203_v38 = vld [vmem:[#allocation10 + $0x170] sm:$0xf]  ;;  %v7491_v1 = vld [vmem:[#allocation10 + $0x130] sm:$0xf0] }
 0x1cb   :  { %4558 = vmatpush.bf16.msrb.mxu0 %v6440_v46  ;;  %v6953_v46 = vld [vmem:[#allocation10 + $0x75c] sm:$0xf0]  ;;  %4583 = vmatpush.bf16.msrb.mxu2 %v6668_v55  ;;  %v6167_v7 = vld [vmem:[#allocation10 + $0x128] sm:$0xf] }
 0x1cc   :  { %4572 = vmatpush.bf16.msrb.mxu1 %v6536_v45  ;;  %v2364_v45 = vadd.f32 %v2363_v35, %v2350_v34  ;;  %v6956_v36 = vor.u32 %v7687_v12, %v6953_v46  ;;  %v6824_v34 = vor.u32 %v7654_v11, %v6821_v42  ;;  %v7675_v35 = vld [vmem:[#allocation10 + $0x6f4] sm:$0xf]  ;;  %v6905_v55 = vld [vmem:[#allocation10 + $0x6fc] sm:$0xf0]  ;;  %v7600_v46 = vld [vmem:[#allocation10 + $0x49c] sm:$0xf] }
 0x1cd   :  { %v6908_v49 = vor.u32 %v7675_v35, %v6905_v55  ;;  %v7711_v42 = vld [vmem:[#allocation10 + $0x814] sm:$0xf]  ;;  %v7037_v35 = vld [vmem:[#allocation10 + $0x804] sm:$0xf0]  ;;  %v7738_v55 = vld [vmem:[#allocation10 + $0x8ec] sm:$0xf] }
 0x1ce   :  { %v2389_v59 = vmax.f32 %v2364_v45, 0.0  ;;  %v6605_v45 = vld [vmem:[#allocation10 + $0x4a4] sm:$0xf0] }
 0x1cf   :  { %4559 = vmatpush.bf16.msrb.mxu0 %v6428_v56  ;;  %v6860_v56 = vor.u32 %v7663_v0, %v6857_v44  ;;  %4584 = vmatpush.bf16.msrb.mxu2 %v6656_v19  ;;  %v6809_v0 = vld [vmem:[#allocation10 + $0x63c] sm:$0xf0]  ;;  %v6728_v19 = vor.u32 %v7630_v50, %v6725_v43  ;;  %v7470_v43 = vld [vmem:[#allocation10 + $0x88] sm:$0xf0] }
 0x1d0   :  { %4573 = vmatpush.bf16.msrb.mxu1 %v6524_v13  ;;  %v6845_v13 = vld [vmem:[#allocation10 + $0x684] sm:$0xf0]  ;;  %v8206_v6 = vpack.c.bf16 %v2389_v59, %v2377_v57  ;;  %v7648_v57 = vld [vmem:[#allocation10 + $0x61c] sm:$0xf]  ;;  %v6083_v50 = vld [vmem:[#allocation10 + $0x80] sm:$0xf] }
 0x1d1   :  { %v6848_v8 = vor.u32 %v7660_v62, %v6845_v13  ;;  %v6797_v59 = vld [vmem:[#allocation10 + $0x624] sm:$0xf0]  ;;  %v6608_v62 = vor.u32 %v7600_v46, %v6605_v45  ;;  %v7597_v13 = vld [vmem:[#allocation10 + $0x484] sm:$0xf] }
 0x1d2   :  { %4492 = vmatmul.bf16.vlgmr.msrb.gmra.mxu3 %v8206_v6  ;;  %v6800_v60 = vor.u32 %v7648_v57, %v6797_v59  ;;  %v6596_v28 = vor.u32 %v7597_v13, %v6593_v58  ;;  %v6179_v57 = vld [vmem:[#allocation10 + $0x140] sm:$0xf]  ;;  %v7494_v59 = vld [vmem:[#allocation10 + $0x148] sm:$0xf0]  ;;  %v6084_v13 = vor.u32 %v7470_v43, %v6083_v50 }
 0x1d3   :  { %4560 = vmatpush.bf16.msrb.mxu0 %v6416_v25  ;;  %v7681_v25 = vld [vmem:[#allocation10 + $0x724] sm:$0xf]  ;;  %4596 = vmatpush.bf16.msrb.mxu3 %v6776_v10  ;;  %v6713_v10 = vld [vmem:[#allocation10 + $0x57c] sm:$0xf0]  ;;  %v6180_v58 = vor.u32 %v7494_v59, %v6179_v57  ;;  %v7482_v43 = vld [vmem:[#allocation10 + $0xe8] sm:$0xf0] }
 0x1d4   :  { %4574 = vmatpush.bf16.msrb.mxu1 %v6512_v54  ;;  %v6929_v54 = vld [vmem:[#allocation10 + $0x72c] sm:$0xf0]  ;;  %4585 = vmatpush.bf16.msrb.mxu2 %v6644_v29  ;;  %v6131_v50 = vld [vmem:[#allocation10 + $0xe0] sm:$0xf]  ;;  %v7723_v57 = vld [vmem:[#allocation10 + $0x874] sm:$0xf] }
 0x1d5   :  { %v6932_v39 = vor.u32 %v7681_v25, %v6929_v54  ;;  %v6881_v29 = vld [vmem:[#allocation10 + $0x6cc] sm:$0xf0]  ;;  %v6716_v25 = vor.u32 %v7627_v4, %v6713_v10  ;;  %v7624_v54 = vld [vmem:[#allocation10 + $0x55c] sm:$0xf]  ;;  %v6071_v4 = vld [vmem:[#allocation10 + $0x68] sm:$0xf] }
 0x1d6   :  { %4534 = vmatmul.bf16.vlgmr.msra.gmra.mxu2 %v8130_v33  ;;  %v6884_v11 = vor.u32 %v7669_v52, %v6881_v29  ;;  %v7467_v10 = vld [vmem:[#allocation10 + $0x70] sm:$0xf0]  ;;  %v7732_v52 = vld [vmem:[#allocation10 + $0x8bc] sm:$0xf]  ;;  %v7133_v29 = vld [vmem:[#allocation10 + $0x8c4] sm:$0xf0] }
 0x1d7   :  { %4561 = vmatpush.bf16.msrb.mxu0 %v6404_v26  ;;  %4597 = vmatpush.bf16.msrb.mxu3 %v6764_v17  ;;  %v6617_v26 = vld [vmem:[#allocation10 + $0x4bc] sm:$0xf0]  ;;  %v6107_v17 = vld [vmem:[#allocation10 + $0xb0] sm:$0xf] }
 0x1d8   :  { %4575 = vmatpush.bf16.msrb.mxu1 %v6500_v30  ;;  %v7633_v30 = vld [vmem:[#allocation10 + $0x5a4] sm:$0xf]  ;;  %4586 = vmatpush.bf16.msrb.mxu2 %v6632_v23  ;;  %v6620_v44 = vor.u32 %v7603_v53, %v6617_v26  ;;  %v6689_v26 = vld [vmem:[#allocation10 + $0x54c] sm:$0xf0]  ;;  %v7097_v59 = vld [vmem:[#allocation10 + $0x87c] sm:$0xf0] }
 0x1d9   :  { %v6740_v12 = vor.u32 %v7633_v30, %v6737_v31  ;;  %v7621_v23 = vld [vmem:[#allocation10 + $0x544] sm:$0xf]  ;;  %v6095_v30 = vld [vmem:[#allocation10 + $0x98] sm:$0xf] }
 0x1da   :  { %4562 = vmatmul.bf16.vlgmr.msrb.gmra.mxu0 %v8177_v40  ;;  %v7473_v31 = vld [vmem:[#allocation10 + $0xa0] sm:$0xf0]  ;;  %v6692_v46 = vor.u32 %v7621_v23, %v6689_v26  ;;  %v6047_v23 = vld [vmem:[#allocation10 + $0x38] sm:$0xf] }
 0x1db   :  { %4610 = vmatpush.bf16.msra.mxu0 %v6872_v37  ;;  %4576 = vmatmul.bf16.vlgmr.msrb.gmra.mxu1 %v8179_v20  ;;  %v6920_v37 = vor.u32 %v7678_v22, %v6917_v48  ;;  %v7049_v22 = vld [vmem:[#allocation10 + $0x81c] sm:$0xf0]  ;;  %v6108_v48 = vor.u32 %v7476_v18, %v6107_v17  ;;  %v7464_v17 = vld [vmem:[#allocation10 + $0x58] sm:$0xf0] }
 0x1dc   :  { %4624 = vmatpush.bf16.msra.mxu1 %v6968_v41  ;;  %v7651_v41 = vld [vmem:[#allocation10 + $0x634] sm:$0xf]  ;;  %4598 = vmatpush.bf16.msrb.mxu3 %v6752_v47  ;;  %v6704_v47 = vor.u32 %v7624_v54, %v6701_v63  ;;  %v6059_v54 = vld [vmem:[#allocation10 + $0x50] sm:$0xf] }
 0x1dd   :  { %v6812_v51 = vor.u32 %v7651_v41, %v6809_v0  ;;  %4587 = vmatpush.bf16.msrb.mxu2 %v6620_v44  ;;  %v7497_v41 = vld [vmem:[#allocation10 + $0x160] sm:$0xf0]  ;;  %v7708_v0 = vld [vmem:[#allocation10 + $0x7fc] sm:$0xf]  ;;  %v7157_v44 = vld [vmem:[#allocation10 + $0x8f4] sm:$0xf0] }
 0x1de   :  { %v6155_v63 = vld [vmem:[#allocation10 + $0x110] sm:$0xf] }
 0x1df   :  { %4611 = vmatpush.bf16.msra.mxu0 %v6860_v56  ;;  %v7672_v56 = vld [vmem:[#allocation10 + $0x6dc] sm:$0xf] }
 0x1e0   :  { %4625 = vmatpush.bf16.msra.mxu1 %v6956_v36  ;;  %v6893_v36 = vld [vmem:[#allocation10 + $0x6e4] sm:$0xf0]  ;;  %4599 = vmatpush.bf16.msrb.mxu3 %v6740_v12  ;;  %v6096_v12 = vor.u32 %v7473_v31, %v6095_v30  ;;  %v6143_v30 = vld [vmem:[#allocation10 + $0xf8] sm:$0xf]  ;;  %v7485_v31 = vld [vmem:[#allocation10 + $0x100] sm:$0xf0] }
 0x1e1   :  { %v6896_v2 = vor.u32 %v7672_v56, %v6893_v36  ;;  %4588 = vmatpush.bf16.msrb.mxu2 %v6608_v62  ;;  %v7705_v56 = vld [vmem:[#allocation10 + $0x7e4] sm:$0xf]  ;;  %v7025_v36 = vld [vmem:[#allocation10 + $0x7ec] sm:$0xf0]  ;;  %v7735_v62 = vld [vmem:[#allocation10 + $0x8d4] sm:$0xf] }
 0x1e2   :  { %4548 = vmatmul.bf16.vlgmr.msra.gmra.mxu3 %v8132_v27 }
 0x1e3   :  { %4612 = vmatpush.bf16.msra.mxu0 %v6848_v8  ;;  %v7645_v8 = vld [vmem:[#allocation10 + $0x604] sm:$0xf] }
 0x1e4   :  { %4626 = vmatpush.bf16.msra.mxu1 %v6944_v15  ;;  %v6785_v15 = vld [vmem:[#allocation10 + $0x60c] sm:$0xf0]  ;;  %4600 = vmatpush.bf16.msrb.mxu3 %v6728_v19  ;;  %v7145_v19 = vld [vmem:[#allocation10 + $0x8dc] sm:$0xf0] }
 0x1e5   :  { %4589 = vmatpush.bf16.msrb.mxu2 %v6596_v28  ;;  %v6072_v28 = vor.u32 %v7467_v10, %v6071_v4  ;;  %v6119_v4 = vld [vmem:[#allocation10 + $0xc8] sm:$0xf] }
 0x1e7   :  { %4613 = vmatpush.bf16.msra.mxu0 %v6836_v5  ;;  %v7500_v5 = vld [vmem:[#allocation10 + $0x178] sm:$0xf0] }
 0x1e8   :  { %4627 = vmatpush.bf16.msra.mxu1 %v6932_v39  ;;  %v6788_v39 = vor.u32 %v7645_v8, %v6785_v15  ;;  %4601 = vmatpush.bf16.msrb.mxu3 %v6716_v25  ;;  %v6204_v53 = vor.u32 %v7500_v5, %v6203_v38  ;;  %v7702_v8 = vld [vmem:[#allocation10 + $0x7cc] sm:$0xf]  ;;  %v7013_v15 = vld [vmem:[#allocation10 + $0x7d4] sm:$0xf0]  ;;  %v6168_v25 = vor.u32 %v7491_v1, %v6167_v7  ;;  %v7488_v38 = vld [vmem:[#allocation10 + $0x118] sm:$0xf0] }
 0x1e9   :  { %4638 = vmatpush.bf16.msra.mxu2 %v7064_v3  ;;  %v7016_v18 = vor.u32 %v7702_v8, %v7013_v15  ;;  %v7136_v3 = vor.u32 %v7732_v52, %v7133_v29  ;;  %v7699_v5 = vld [vmem:[#allocation10 + $0x7b4] sm:$0xf]  ;;  %v7720_v7 = vld [vmem:[#allocation10 + $0x85c] sm:$0xf]  ;;  %v7085_v1 = vld [vmem:[#allocation10 + $0x864] sm:$0xf0] }
 0x1ea   :  { %4590 = vmatmul.bf16.vlgmr.msrb.gmra.mxu2 %v8181_v16  ;;  %v6491_v15 = vld [vmem:[#allocation10 + $0x3b0] sm:$0xf]  ;;  %v7572_v52 = vld [vmem:[#allocation10 + $0x3b8] sm:$0xf0] }
 0x1eb   :  { %4614 = vmatpush.bf16.msra.mxu0 %v6824_v34  ;;  %v7052_v34 = vor.u32 %v7711_v42, %v7049_v22  ;;  %v7121_v42 = vld [vmem:[#allocation10 + $0x8ac] sm:$0xf0]  ;;  %v6060_v22 = vor.u32 %v7464_v17, %v6059_v54  ;;  %v6287_v54 = vld [vmem:[#allocation10 + $0x218] sm:$0xf]  ;;  %v7521_v17 = vld [vmem:[#allocation10 + $0x220] sm:$0xf0] }
 0x1ec   :  { %4628 = vmatpush.bf16.msra.mxu1 %v6920_v37  ;;  %v6191_v37 = vld [vmem:[#allocation10 + $0x158] sm:$0xf]  ;;  %4602 = vmatpush.bf16.msrb.mxu3 %v6704_v47  ;;  %v7461_v47 = vld [vmem:[#allocation10 + $0x40] sm:$0xf0]  ;;  %v6587_v29 = vld [vmem:[#allocation10 + $0x470] sm:$0xf] }
 0x1ed   :  { %v6192_v45 = vor.u32 %v7497_v41, %v6191_v37  ;;  %4639 = vmatpush.bf16.msra.mxu2 %v7052_v34  ;;  %v7696_v34 = vld [vmem:[#allocation10 + $0x79c] sm:$0xf]  ;;  %v6989_v37 = vld [vmem:[#allocation10 + $0x7a4] sm:$0xf0]  ;;  %v7726_v41 = vld [vmem:[#allocation10 + $0x88c] sm:$0xf] }
 0x1ef   :  { %4615 = vmatpush.bf16.msra.mxu0 %v6812_v51  ;;  %v7040_v51 = vor.u32 %v7708_v0, %v7037_v35  ;;  %v7109_v0 = vld [vmem:[#allocation10 + $0x894] sm:$0xf0]  ;;  %v6048_v35 = vor.u32 %v7461_v47, %v6047_v23  ;;  %v7593_v23 = vld [vmem:[#allocation10 + $0x460] sm:$0xf0]  ;;  %v6275_v47 = vld [vmem:[#allocation10 + $0x200] sm:$0xf] }
 0x1f0   :  { %4629 = vmatpush.bf16.msra.mxu1 %v6908_v49  ;;  %v7160_v49 = vor.u32 %v7738_v55, %v7157_v44  ;;  %4603 = vmatpush.bf16.msrb.mxu3 %v6692_v46  ;;  %v6144_v55 = vor.u32 %v7485_v31, %v6143_v30  ;;  %v6035_v44 = vld [vmem:[#allocation10 + $0x20] sm:$0xf]  ;;  %v6992_v46 = vor.u32 %v7696_v34, %v6989_v37  ;;  %v7548_v30 = vld [vmem:[#allocation10 + $0x2f8] sm:$0xf0] }
 0x1f1   :  { %4640 = vmatpush.bf16.msra.mxu2 %v7040_v51  ;;  %v7693_v51 = vld [vmem:[#allocation10 + $0x784] sm:$0xf] }
 0x1f3   :  { %4616 = vmatpush.bf16.msra.mxu0 %v6800_v60  ;;  %v7028_v60 = vor.u32 %v7705_v56, %v7025_v36  ;;  %4604 = vmatmul.bf16.vlgmr.msrb.gmra.mxu3 %v8184_v21  ;;  %v6299_v36 = vld [vmem:[#allocation10 + $0x230] sm:$0xf] }
 0x1f4   :  { %4630 = vmatpush.bf16.msra.mxu1 %v6896_v2  ;;  %4652 = vmatpush.bf16.msra.mxu3 %v7160_v49  ;;  %v7148_v2 = vor.u32 %v7735_v62, %v7145_v19  ;;  %v6977_v49 = vld [vmem:[#allocation10 + $0x78c] sm:$0xf0]  ;;  %v7524_v62 = vld [vmem:[#allocation10 + $0x238] sm:$0xf0]  ;;  %v6132_v19 = vor.u32 %v7482_v43, %v6131_v50  ;;  %v6383_v50 = vld [vmem:[#allocation10 + $0x2d8] sm:$0xf] }
 0x1f5   :  { %4641 = vmatpush.bf16.msra.mxu2 %v7028_v60  ;;  %v6980_v10 = vor.u32 %v7693_v51, %v6977_v49  ;;  %v7100_v60 = vor.u32 %v7723_v57, %v7097_v59  ;;  %v6300_v8 = vor.u32 %v7524_v62, %v6299_v36  ;;  %v7545_v43 = vld [vmem:[#allocation10 + $0x2e0] sm:$0xf0]  ;;  %v6455_v59 = vld [vmem:[#allocation10 + $0x368] sm:$0xf]  ;;  %v7587_v62 = vld [vmem:[#allocation10 + $0x430] sm:$0xf0] }
 0x1f6   :  { %v6551_v36 = vld [vmem:[#allocation10 + $0x428] sm:$0xf] }
 0x1f7   :  { %4617 = vmatpush.bf16.msra.mxu0 %v6788_v39  ;;  %v7001_v39 = vld [vmem:[#allocation10 + $0x7bc] sm:$0xf0] }
 0x1f8   :  { %4631 = vmatpush.bf16.msra.mxu1 %v6884_v11  ;;  %4653 = vmatpush.bf16.msra.mxu3 %v7148_v2  ;;  %v7729_v11 = vld [vmem:[#allocation10 + $0x8a4] sm:$0xf]  ;;  %v7479_v2 = vld [vmem:[#allocation10 + $0xd0] sm:$0xf0] }
 0x1f9   :  { %4642 = vmatpush.bf16.msra.mxu2 %v7016_v18  ;;  %v7124_v26 = vor.u32 %v7729_v11, %v7121_v42  ;;  %v6120_v18 = vor.u32 %v7479_v2, %v6119_v4  ;;  %v6288_v11 = vor.u32 %v7521_v17, %v6287_v54  ;;  %v6479_v42 = vld [vmem:[#allocation10 + $0x398] sm:$0xf]  ;;  %v6443_v2 = vld [vmem:[#allocation10 + $0x350] sm:$0xf] }
 0x1fa   :  { %4618 = vmatmul.bf16.vlgmr.msra.gmra.mxu0 %v8192_v9 }
 0x1fb   :  { %4666 = vmatpush.bf16.msrb.mxu0 %v6108_v48  ;;  %4632 = vmatmul.bf16.vlgmr.msra.gmra.mxu1 %v8196_v61  ;;  %v6156_v48 = vor.u32 %v7488_v38, %v6155_v63  ;;  %v6492_v63 = vor.u32 %v7572_v52, %v6491_v15  ;;  %v7717_v38 = vld [vmem:[#allocation10 + $0x844] sm:$0xf]  ;;  %v7584_v15 = vld [vmem:[#allocation10 + $0x418] sm:$0xf0]  ;;  %v6239_v52 = vld [vmem:[#allocation10 + $0x1b8] sm:$0xf] }
 0x1fc   :  { %4680 = vmatpush.bf16.msrb.mxu1 %v6204_v53  ;;  %4654 = vmatpush.bf16.msra.mxu3 %v7136_v3  ;;  %v7004_v53 = vor.u32 %v7699_v5, %v7001_v39  ;;  %v7088_v3 = vor.u32 %v7720_v7, %v7085_v1  ;;  %v7073_v5 = vld [vmem:[#allocation10 + $0x84c] sm:$0xf0]  ;;  %v7560_v7 = vld [vmem:[#allocation10 + $0x358] sm:$0xf0] }
 0x1fd   :  { %v7076_v31 = vor.u32 %v7717_v38, %v7073_v5  ;;  %v6539_v1 = vld [vmem:[#allocation10 + $0x410] sm:$0xf]  ;;  %v6444_v54 = vor.u32 %v7560_v7, %v6443_v2  ;;  %v6527_v38 = vld [vmem:[#allocation10 + $0x3f8] sm:$0xf]  ;;  %v6311_v7 = vld [vmem:[#allocation10 + $0x248] sm:$0xf] }
 0x1fe   :  { %4643 = vmatpush.bf16.msra.mxu2 %v7004_v53  ;;  %v7518_v53 = vld [vmem:[#allocation10 + $0x208] sm:$0xf0]  ;;  %v6540_v17 = vor.u32 %v7584_v15, %v6539_v1  ;;  %v7527_v15 = vld [vmem:[#allocation10 + $0x250] sm:$0xf0] }
 0x1ff   :  { %4667 = vmatpush.bf16.msrb.mxu0 %v6096_v12  ;;  %v7458_v12 = vld [vmem:[#allocation10 + $0x28] sm:$0xf0] }
 0x200   :  { %4681 = vmatpush.bf16.msrb.mxu1 %v6192_v45  ;;  %4655 = vmatpush.bf16.msra.mxu3 %v7124_v26  ;;  %v7112_v45 = vor.u32 %v7726_v41, %v7109_v0  ;;  %v6036_v56 = vor.u32 %v7458_v12, %v6035_v44  ;;  %v6395_v26 = vld [vmem:[#allocation10 + $0x2f0] sm:$0xf]  ;;  %v6276_v41 = vor.u32 %v7518_v53, %v6275_v47  ;;  %v6467_v0 = vld [vmem:[#allocation10 + $0x380] sm:$0xf]  ;;  %v7590_v12 = vld [vmem:[#allocation10 + $0x448] sm:$0xf0] }
 0x201   :  { %v6396_v44 = vor.u32 %v7548_v30, %v6395_v26  ;;  %v6419_v47 = vld [vmem:[#allocation10 + $0x320] sm:$0xf]  ;;  %v7554_v30 = vld [vmem:[#allocation10 + $0x328] sm:$0xf0] }
 0x202   :  { %4644 = vmatpush.bf16.msra.mxu2 %v6992_v46  ;;  %v6263_v46 = vld [vmem:[#allocation10 + $0x1e8] sm:$0xf] }
 0x203   :  { %4668 = vmatpush.bf16.msrb.mxu0 %v6084_v13  ;;  %v6023_v13 = vld [vmem:[#allocation10 + $0x8] sm:$0xf] }
 0x204   :  { %4682 = vmatpush.bf16.msrb.mxu1 %v6180_v58  ;;  %v7455_v58 = vld [vmem:[#allocation10 + $0x10] sm:$0xf0]  ;;  %4656 = vmatpush.bf16.msra.mxu3 %v7112_v45 }
 0x205   :  { %v7515_v45 = vld [vmem:[#allocation10 + $0x1f0] sm:$0xf0] }
 0x206   :  { %4645 = vmatpush.bf16.msra.mxu2 %v6980_v10  ;;  %v6264_v57 = vor.u32 %v7515_v45, %v6263_v46  ;;  %v6552_v10 = vor.u32 %v7587_v62, %v6551_v36  ;;  %v6420_v46 = vor.u32 %v7554_v30, %v6419_v47  ;;  %v6407_v45 = vld [vmem:[#allocation10 + $0x308] sm:$0xf]  ;;  %v6323_v36 = vld [vmem:[#allocation10 + $0x260] sm:$0xf]  ;;  %v7668_v62 = vld [vmem:[#allocation10 + $0x6b8] sm:$0xf0] }
 0x207   :  { %4669 = vmatpush.bf16.msrb.mxu0 %v6072_v28  ;;  %v6024_v28 = vor.u32 %v7455_v58, %v6023_v13  ;;  %v6371_v13 = vld [vmem:[#allocation10 + $0x2c0] sm:$0xf]  ;;  %v7542_v58 = vld [vmem:[#allocation10 + $0x2c8] sm:$0xf0]  ;;  %v6767_v30 = vld [vmem:[#allocation10 + $0x5d8] sm:$0xf] }
 0x208   :  { %4683 = vmatpush.bf16.msrb.mxu1 %v6168_v25  ;;  %v7596_v25 = vld [vmem:[#allocation10 + $0x478] sm:$0xf0]  ;;  %4657 = vmatpush.bf16.msra.mxu3 %v7100_v60  ;;  %v7686_v47 = vld [vmem:[#allocation10 + $0x748] sm:$0xf0] }
 0x209   :  { %v6588_v39 = vor.u32 %v7596_v25, %v6587_v29  ;;  %4646 = vmatmul.bf16.vlgmr.msra.gmra.mxu2 %v8203_v24  ;;  %v7509_v29 = vld [vmem:[#allocation10 + $0x1c0] sm:$0xf0]  ;;  %v7539_v25 = vld [vmem:[#allocation10 + $0x2b0] sm:$0xf0] }
 0x20a   :  { %4694 = vmatpush.bf16.msrb.mxu2 %v6300_v8  ;;  %v6372_v8 = vor.u32 %v7542_v58, %v6371_v13  ;;  %v7692_v13 = vld [vmem:[#allocation10 + $0x778] sm:$0xf0] }
 0x20b   :  { %4670 = vmatpush.bf16.msrb.mxu0 %v6060_v22  ;;  %v7569_v22 = vld [vmem:[#allocation10 + $0x3a0] sm:$0xf0] }
 0x20c   :  { %4684 = vmatpush.bf16.msrb.mxu1 %v6156_v48  ;;  %v6575_v48 = vld [vmem:[#allocation10 + $0x458] sm:$0xf]  ;;  %4658 = vmatpush.bf16.msra.mxu3 %v7088_v3  ;;  %v6480_v34 = vor.u32 %v7569_v22, %v6479_v42  ;;  %v7506_v42 = vld [vmem:[#allocation10 + $0x1a8] sm:$0xf0]  ;;  %v6347_v22 = vld [vmem:[#allocation10 + $0x290] sm:$0xf] }
 0x20d   :  { %v6576_v37 = vor.u32 %v7593_v23, %v6575_v48  ;;  %v6431_v3 = vld [vmem:[#allocation10 + $0x338] sm:$0xf]  ;;  %v7536_v48 = vld [vmem:[#allocation10 + $0x298] sm:$0xf0] }
 0x20e   :  { %4695 = vmatpush.bf16.msrb.mxu2 %v6288_v11  ;;  %v6227_v11 = vld [vmem:[#allocation10 + $0x1a0] sm:$0xf] }
 0x20f   :  { %4671 = vmatpush.bf16.msrb.mxu0 %v6048_v35  ;;  %v7566_v35 = vld [vmem:[#allocation10 + $0x388] sm:$0xf0]  ;;  %v6228_v26 = vor.u32 %v7506_v42, %v6227_v11  ;;  %v6851_v11 = vld [vmem:[#allocation10 + $0x680] sm:$0xf] }
 0x210   :  { %4685 = vmatpush.bf16.msrb.mxu1 %v6144_v55  ;;  %v6563_v55 = vld [vmem:[#allocation10 + $0x440] sm:$0xf]  ;;  %4659 = vmatpush.bf16.msra.mxu3 %v7076_v31  ;;  %v6468_v51 = vor.u32 %v7566_v35, %v6467_v0  ;;  %v7503_v0 = vld [vmem:[#allocation10 + $0x190] sm:$0xf0]  ;;  %v6335_v35 = vld [vmem:[#allocation10 + $0x278] sm:$0xf] }
 0x211   :  { %v6564_v49 = vor.u32 %v7590_v12, %v6563_v55  ;;  %v6515_v31 = vld [vmem:[#allocation10 + $0x3e0] sm:$0xf]  ;;  %v7533_v55 = vld [vmem:[#allocation10 + $0x280] sm:$0xf0]  ;;  %v7620_v12 = vld [vmem:[#allocation10 + $0x538] sm:$0xf0] }
 0x212   :  { %4696 = vmatpush.bf16.msrb.mxu2 %v6276_v41  ;;  %v6215_v41 = vld [vmem:[#allocation10 + $0x188] sm:$0xf]  ;;  %v7662_v42 = vld [vmem:[#allocation10 + $0x688] sm:$0xf0] }
 0x213   :  { %4672 = vmatpush.bf16.msrb.mxu0 %v6036_v56  ;;  %v7563_v56 = vld [vmem:[#allocation10 + $0x370] sm:$0xf0]  ;;  %4660 = vmatmul.bf16.vlgmr.msra.gmra.mxu3 %v8206_v6 }
 0x214   :  { %4686 = vmatpush.bf16.msrb.mxu1 %v6132_v19  ;;  %4708 = vmatpush.bf16.msrb.mxu3 %v6396_v44  ;;  %v7512_v19 = vld [vmem:[#allocation10 + $0x1d8] sm:$0xf0]  ;;  %v6456_v4 = vor.u32 %v7563_v56, %v6455_v59  ;;  %v6683_v44 = vld [vmem:[#allocation10 + $0x530] sm:$0xf]  ;;  %v6336_v59 = vor.u32 %v7533_v55, %v6335_v35  ;;  %v7659_v35 = vld [vmem:[#allocation10 + $0x670] sm:$0xf0] }
 0x215   :  { %v6684_v56 = vor.u32 %v7620_v12, %v6683_v44  ;;  %v6935_v12 = vld [vmem:[#allocation10 + $0x728] sm:$0xf] }
 0x216   :  { %4697 = vmatpush.bf16.msrb.mxu2 %v6264_v57  ;;  %v7575_v57 = vld [vmem:[#allocation10 + $0x3d0] sm:$0xf0] }
 0x217   :  { %4673 = vmatpush.bf16.msrb.mxu0 %v6024_v28  ;;  %v6359_v28 = vld [vmem:[#allocation10 + $0x2a8] sm:$0xf] }
 0x218   :  { %4687 = vmatpush.bf16.msrb.mxu1 %v6120_v18  ;;  %v6240_v18 = vor.u32 %v7509_v29, %v6239_v52  ;;  %v6360_v5 = vor.u32 %v7539_v25, %v6359_v28  ;;  %v6863_v52 = vld [vmem:[#allocation10 + $0x698] sm:$0xf]  ;;  %v7665_v29 = vld [vmem:[#allocation10 + $0x6a0] sm:$0xf0] }
 0x219   :  { %v6959_v25 = vld [vmem:[#allocation10 + $0x758] sm:$0xf] }
 0x21a   :  { %4674 = vmatmul.bf16.vlgmr.msrb.gmra.mxu0 %v8126_v14  ;;  %v6384_v14 = vor.u32 %v7545_v43, %v6383_v50  ;;  %v6216_v43 = vor.u32 %v7503_v0, %v6215_v41  ;;  %v6839_v0 = vld [vmem:[#allocation10 + $0x668] sm:$0xf] }
 0x21b   :  { %4722 = vmatpush.bf16.msra.mxu0 %v6492_v63  ;;  %4688 = vmatmul.bf16.vlgmr.msrb.gmra.mxu1 %v8128_v32  ;;  %v6251_v32 = vld [vmem:[#allocation10 + $0x1d0] sm:$0xf]  ;;  %v7557_v63 = vld [vmem:[#allocation10 + $0x340] sm:$0xf0] }
 0x21c   :  { %4736 = vmatpush.bf16.msra.mxu1 %v6588_v39  ;;  %v6252_v60 = vor.u32 %v7512_v19, %v6251_v32  ;;  %4709 = vmatpush.bf16.msrb.mxu3 %v6384_v14  ;;  %v7581_v39 = vld [vmem:[#allocation10 + $0x400] sm:$0xf0]  ;;  %v6432_v23 = vor.u32 %v7557_v63, %v6431_v3  ;;  %v6875_v14 = vld [vmem:[#allocation10 + $0x6b0] sm:$0xf]  ;;  %v7530_v32 = vld [vmem:[#allocation10 + $0x268] sm:$0xf0] }
 0x21d   :  { %v6528_v53 = vor.u32 %v7581_v39, %v6527_v38  ;;  %v6971_v19 = vld [vmem:[#allocation10 + $0x770] sm:$0xf]  ;;  %v6876_v2 = vor.u32 %v7668_v62, %v6875_v14  ;;  %v6324_v1 = vor.u32 %v7530_v32, %v6323_v36  ;;  %v7644_v63 = vld [vmem:[#allocation10 + $0x5f8] sm:$0xf0]  ;;  %v6864_v38 = vor.u32 %v7665_v29, %v6863_v52 }
 0x21e   :  { %4698 = vmatpush.bf16.msrb.mxu2 %v6252_v60  ;;  %v6779_v3 = vld [vmem:[#allocation10 + $0x5f0] sm:$0xf]  ;;  %v7680_v32 = vld [vmem:[#allocation10 + $0x718] sm:$0xf0] }
 0x21f   :  { %4723 = vmatpush.bf16.msra.mxu0 %v6480_v34  ;;  %v7578_v34 = vld [vmem:[#allocation10 + $0x3e8] sm:$0xf0]  ;;  %v6923_v62 = vld [vmem:[#allocation10 + $0x710] sm:$0xf] }
 0x220   :  { %4737 = vmatpush.bf16.msra.mxu1 %v6576_v37  ;;  %4710 = vmatpush.bf16.msrb.mxu3 %v6372_v8  ;;  %v6348_v37 = vor.u32 %v7536_v48, %v6347_v22  ;;  %v6516_v50 = vor.u32 %v7578_v34, %v6515_v31  ;;  %v6972_v8 = vor.u32 %v7692_v13, %v6971_v19  ;;  %v8222_v22 = vpop.f32.mrf.mxu0  ;;  %v7641_v31 = vld [vmem:[#allocation10 + $0x5e0] sm:$0xf0]  ;;  %v8226_v34 = vpop.f32.mrf.mxu1  ;;  %v6623_v19 = vld [vmem:[#allocation10 + $0x4b8] sm:$0xf] }
 0x221   :  { %v6768_v44 = vor.u32 %v7641_v31, %v6767_v30  ;;  %v7605_v13 = vld [vmem:[#allocation10 + $0x4c0] sm:$0xf0]  ;;  %v6719_v30 = vld [vmem:[#allocation10 + $0x578] sm:$0xf] }
 0x222   :  { %4699 = vmatpush.bf16.msrb.mxu2 %v6240_v18  ;;  %v7614_v18 = vld [vmem:[#allocation10 + $0x508] sm:$0xf0]  ;;  %v6624_v52 = vor.u32 %v7605_v13, %v6623_v19  ;;  %v7629_v31 = vld [vmem:[#allocation10 + $0x580] sm:$0xf0] }
 0x223   :  { %4724 = vmatpush.bf16.msra.mxu0 %v6468_v51  ;;  %v7551_v51 = vld [vmem:[#allocation10 + $0x310] sm:$0xf0] }
 0x224   :  { %4738 = vmatpush.bf16.msra.mxu1 %v6564_v49  ;;  %4711 = vmatpush.bf16.msrb.mxu3 %v6360_v5  ;;  %v6503_v49 = vld [vmem:[#allocation10 + $0x3c8] sm:$0xf]  ;;  %v6408_v58 = vor.u32 %v7551_v51, %v6407_v45  ;;  %v6312_v5 = vor.u32 %v7527_v15, %v6311_v7  ;;  %v7608_v45 = vld [vmem:[#allocation10 + $0x4d8] sm:$0xf0]  ;;  %v6840_v51 = vor.u32 %v7659_v35, %v6839_v0  ;;  %v7067_v0 = vld [vmem:[#allocation10 + $0x830] sm:$0xf] }
 0x225   :  { %v6504_v60 = vor.u32 %v7575_v57, %v6503_v49  ;;  %v8231_v49 = vld [vmem:[#allocation12] sm:$0x7]  ;;  %v6924_v7 = vor.u32 %v7680_v32, %v6923_v62  ;;  %v7716_v35 = vld [vmem:[#allocation10 + $0x838] sm:$0xf0]  ;;  %v7055_v62 = vld [vmem:[#allocation10 + $0x818] sm:$0xf] }
 0x226   :  { %4700 = vmatpush.bf16.msrb.mxu2 %v6228_v26  ;;  %v7611_v26 = vld [vmem:[#allocation10 + $0x4f0] sm:$0xf0]  ;;  %v7713_v32 = vld [vmem:[#allocation10 + $0x820] sm:$0xf0] }
 0x227   :  { %4725 = vmatpush.bf16.msra.mxu0 %v6456_v4  ;;  %v6671_v4 = vld [vmem:[#allocation10 + $0x518] sm:$0xf] }
 0x228   :  { %4739 = vmatpush.bf16.msra.mxu1 %v6552_v10  ;;  %4712 = vmatpush.bf16.msrb.mxu3 %v6348_v37  ;;  %v7617_v10 = vld [vmem:[#allocation10 + $0x520] sm:$0xf0]  ;;  %v6852_v37 = vor.u32 %v7662_v42, %v6851_v11  ;;  %v8238_v15 = vpop.f32.mrf.mxu1  ;;  %v7650_v11 = vld [vmem:[#allocation10 + $0x628] sm:$0xf0] }
 0x229   :  { %v6672_v28 = vor.u32 %v7617_v10, %v6671_v4  ;;  %v7635_v4 = vld [vmem:[#allocation10 + $0x5b0] sm:$0xf0]  ;;  %v8233_v10 = vpop.f32.mrf.mxu3 }
 0x22a   :  { %4701 = vmatpush.bf16.msrb.mxu2 %v6216_v43  ;;  %v7638_v43 = vld [vmem:[#allocation10 + $0x5c8] sm:$0xf0] }
 0x22b   :  { %4726 = vmatpush.bf16.msra.mxu0 %v6444_v54  ;;  %v7689_v54 = vld [vmem:[#allocation10 + $0x760] sm:$0xf0] }
 0x22c   :  { %4740 = vmatpush.bf16.msra.mxu1 %v6540_v17  ;;  %4713 = vmatpush.bf16.msrb.mxu3 %v6336_v59  ;;  %v6659_v17 = vld [vmem:[#allocation10 + $0x500] sm:$0xf]  ;;  %v6960_v39 = vor.u32 %v7689_v54, %v6959_v25  ;;  %v6827_v59 = vld [vmem:[#allocation10 + $0x650] sm:$0xf]  ;;  %v7677_v25 = vld [vmem:[#allocation10 + $0x700] sm:$0xf0] }
 0x22d   :  { %4702 = vmatmul.bf16.vlgmr.msrb.gmra.mxu2 %v8130_v33  ;;  %v6660_v48 = vor.u32 %v7614_v18, %v6659_v17  ;;  %v6780_v33 = vor.u32 %v7644_v63, %v6779_v3  ;;  %v6611_v54 = vld [vmem:[#allocation10 + $0x4a0] sm:$0xf]  ;;  %v7602_v17 = vld [vmem:[#allocation10 + $0x4a8] sm:$0xf0]  ;;  %v6731_v18 = vld [vmem:[#allocation10 + $0x590] sm:$0xf] }
 0x22e   :  { %4750 = vmatpush.bf16.msra.mxu2 %v6684_v56  ;;  %v7656_v56 = vld [vmem:[#allocation10 + $0x658] sm:$0xf0]  ;;  %v6612_v42 = vor.u32 %v7602_v17, %v6611_v54 }
 0x22f   :  { %4727 = vmatpush.bf16.msra.mxu0 %v6432_v23  ;;  %v6947_v23 = vld [vmem:[#allocation10 + $0x740] sm:$0xf]  ;;  %v7632_v3 = vld [vmem:[#allocation10 + $0x598] sm:$0xf0] }
 0x230   :  { %4741 = vmatpush.bf16.msra.mxu1 %v6528_v53  ;;  %4714 = vmatpush.bf16.msrb.mxu3 %v6324_v1  ;;  %v6647_v53 = vld [vmem:[#allocation10 + $0x4e8] sm:$0xf]  ;;  %v6948_v41 = vor.u32 %v7686_v47, %v6947_v23  ;;  %v6815_v1 = vld [vmem:[#allocation10 + $0x638] sm:$0xf]  ;;  %v7674_v23 = vld [vmem:[#allocation10 + $0x6e8] sm:$0xf0] }
 0x231   :  { %v6648_v55 = vor.u32 %v7611_v26, %v6647_v53  ;;  %v6599_v47 = vld [vmem:[#allocation10 + $0x488] sm:$0xf]  ;;  %v7599_v26 = vld [vmem:[#allocation10 + $0x490] sm:$0xf0] }
 0x232   :  { %4751 = vmatpush.bf16.msra.mxu2 %v6672_v28  ;;  %v6911_v28 = vld [vmem:[#allocation10 + $0x6f8] sm:$0xf] }
 0x233   :  { %4728 = vmatpush.bf16.msra.mxu0 %v6420_v46  ;;  %v6635_v46 = vld [vmem:[#allocation10 + $0x4d0] sm:$0xf] }
 0x234   :  { %4742 = vmatpush.bf16.msra.mxu1 %v6516_v50  ;;  %4715 = vmatpush.bf16.msrb.mxu3 %v6312_v5  ;;  %v6755_v50 = vld [vmem:[#allocation10 + $0x5c0] sm:$0xf]  ;;  %v6636_v36 = vor.u32 %v7608_v45, %v6635_v46  ;;  %v6912_v5 = vor.u32 %v7677_v25, %v6911_v28  ;;  %v4409_v46 = vpop.f32.mrf.mxu1  ;;  %v6600_v45 = vor.u32 %v7599_v26, %v6599_v47 }
 0x235   :  { %v6756_v14 = vor.u32 %v7638_v43, %v6755_v50  ;;  %v6720_v50 = vor.u32 %v7629_v31, %v6719_v30  ;;  %v6887_v43 = vld [vmem:[#allocation10 + $0x6c8] sm:$0xf]  ;;  %v7139_v47 = vld [vmem:[#allocation10 + $0x8c0] sm:$0xf] }
 0x236   :  { %4752 = vmatpush.bf16.msra.mxu2 %v6660_v48  ;;  %v6732_v48 = vor.u32 %v7632_v3, %v6731_v18  ;;  %v7031_v3 = vld [vmem:[#allocation10 + $0x7e8] sm:$0xf] }
 0x237   :  { %4729 = vmatpush.bf16.msra.mxu0 %v6408_v58  ;;  %4716 = vmatmul.bf16.vlgmr.msrb.gmra.mxu3 %v8132_v27  ;;  %v6743_v58 = vld [vmem:[#allocation10 + $0x5a8] sm:$0xf]  ;;  %v8235_v27 = vpop.f32.mrf.mxu0 }
 0x238   :  { %4743 = vmatpush.bf16.msra.mxu1 %v6504_v60  ;;  %4764 = vmatpush.bf16.msra.mxu3 %v6780_v33  ;;  %v6828_v60 = vor.u32 %v7656_v56, %v6827_v59  ;;  %v6744_v29 = vor.u32 %v7635_v4, %v6743_v58  ;;  %v6899_v33 = vld [vmem:[#allocation10 + $0x6e0] sm:$0xf]  ;;  %v7626_v56 = vld [vmem:[#allocation10 + $0x568] sm:$0xf0] }
 0x239   :  { %v6707_v59 = vld [vmem:[#allocation10 + $0x560] sm:$0xf] }
 0x23a   :  { %4730 = vmatmul.bf16.vlgmr.msra.gmra.mxu0 %v8177_v40  ;;  %v8228_v40 = vpop.f32.mrf.mxu2  ;;  %4753 = vmatpush.bf16.msra.mxu2 %v6648_v55  ;;  %v6900_v55 = vor.u32 %v7674_v23, %v6899_v33  ;;  %v6708_v4 = vor.u32 %v7626_v56, %v6707_v59  ;;  %v7019_v33 = vld [vmem:[#allocation10 + $0x7d0] sm:$0xf]  ;;  %v7704_v23 = vld [vmem:[#allocation10 + $0x7d8] sm:$0xf0] }
 0x23b   :  { %4778 = vmatpush.bf16.msrb.mxu0 %v6876_v2  ;;  %4744 = vmatmul.bf16.vlgmr.msra.gmra.mxu1 %v8179_v20  ;;  %v7683_v20 = vld [vmem:[#allocation10 + $0x730] sm:$0xf0]  ;;  %v2788_v2 = vperm.slane %v8231_v49, 0  ;;  %v7020_v30 = vor.u32 %v7704_v23, %v7019_v33  ;;  %v2789_v33 = vperm.slane %v8231_v49, 1 }
 0x23c   :  { %4792 = vmatpush.bf16.msrb.mxu1 %v6972_v8  ;;  %v6936_v57 = vor.u32 %v7683_v20, %v6935_v12  ;;  %4765 = vmatpush.bf16.msra.mxu3 %v6768_v44  ;;  %v7653_v8 = vld [vmem:[#allocation10 + $0x640] sm:$0xf0]  ;;  %v6791_v44 = vld [vmem:[#allocation10 + $0x608] sm:$0xf]  ;;  %v7647_v12 = vld [vmem:[#allocation10 + $0x610] sm:$0xf0]  ;;  %v4383_v20 = vpop.f32.mrf.mxu3 }
 0x23d   :  { %v4340_v53 = vadd.f32 %v8222_v22, %v2788_v2  ;;  %v7671_v22 = vld [vmem:[#allocation10 + $0x6d0] sm:$0xf0]  ;;  %v4342_v58 = vadd.f32 %v8235_v27, %v2788_v2 }
 0x23e   :  { %4754 = vmatpush.bf16.msra.mxu2 %v6636_v36  ;;  %v6888_v13 = vor.u32 %v7671_v22, %v6887_v43  ;;  %v6995_v43 = vld [vmem:[#allocation10 + $0x7a0] sm:$0xf]  ;;  %v7698_v22 = vld [vmem:[#allocation10 + $0x7a8] sm:$0xf0] }
 0x23f   :  { %4779 = vmatpush.bf16.msrb.mxu0 %v6864_v38  ;;  %v6816_v38 = vor.u32 %v7653_v8, %v6815_v1  ;;  %v7043_v1 = vld [vmem:[#allocation10 + $0x800] sm:$0xf]  ;;  %v7710_v8 = vld [vmem:[#allocation10 + $0x808] sm:$0xf0]  ;;  %v4356_v28 = vadd.f32 %v8238_v15, %v4342_v58  ;;  %v7695_v58 = vld [vmem:[#allocation10 + $0x790] sm:$0xf0] }
 0x240   :  { %4793 = vmatpush.bf16.msrb.mxu1 %v6960_v39  ;;  %4766 = vmatpush.bf16.msra.mxu3 %v6756_v14  ;;  %v6803_v39 = vld [vmem:[#allocation10 + $0x620] sm:$0xf]  ;;  %v6792_v14 = vor.u32 %v7647_v12, %v6791_v44  ;;  %v7044_v17 = vor.u32 %v7710_v8, %v7043_v1  ;;  %v7731_v44 = vld [vmem:[#allocation10 + $0x8b0] sm:$0xf0] }
 0x242   :  { %v8240_v63 = vpop.f32.mrf.mxu2  ;;  %4755 = vmatpush.bf16.msra.mxu2 %v6624_v52  ;;  %v7163_v52 = vld [vmem:[#allocation10 + $0x8f0] sm:$0xf] }
 0x243   :  { %4780 = vmatpush.bf16.msrb.mxu0 %v6852_v37  ;;  %v4395_v37 = vpop.f32.mrf.mxu0 }
 0x244   :  { %4794 = vmatpush.bf16.msrb.mxu1 %v6948_v41  ;;  %4767 = vmatpush.bf16.msra.mxu3 %v6744_v29  ;;  %v6804_v41 = vor.u32 %v7650_v11, %v6803_v39  ;;  %v7740_v29 = vld [vmem:[#allocation10 + $0x8f8] sm:$0xf0]  ;;  %v4437_v2 = vpop.f32.mrf.mxu3  ;;  %v7737_v39 = vld [vmem:[#allocation10 + $0x8e0] sm:$0xf0] }
 0x245   :  { %v7164_v18 = vor.u32 %v7740_v29, %v7163_v52 }
 0x246   :  { %4756 = vmatpush.bf16.msra.mxu2 %v6612_v42 }
 0x247   :  { %4781 = vmatpush.bf16.msrb.mxu0 %v6840_v51  ;;  %v4354_v51 = vadd.f32 %v8226_v34, %v4340_v53  ;;  %v7056_v34 = vor.u32 %v7713_v32, %v7055_v62  ;;  %v7734_v53 = vld [vmem:[#allocation10 + $0x8c8] sm:$0xf0]  ;;  %v6983_v32 = vld [vmem:[#allocation10 + $0x788] sm:$0xf] }
 0x248   :  { %4795 = vmatpush.bf16.msrb.mxu1 %v6936_v57  ;;  %4768 = vmatpush.bf16.msra.mxu3 %v6732_v48  ;;  %v7068_v57 = vor.u32 %v7716_v35, %v7067_v0  ;;  %v7140_v31 = vor.u32 %v7734_v53, %v7139_v47  ;;  %v7701_v35 = vld [vmem:[#allocation10 + $0x7c0] sm:$0xf0]  ;;  %v6984_v52 = vor.u32 %v7695_v58, %v6983_v32 }
 0x249   :  { %v4368_v19 = vadd.f32 %v8228_v40, %v4354_v51  ;;  %v7115_v51 = vld [vmem:[#allocation10 + $0x890] sm:$0xf] }
 0x24a   :  { %v4423_v36 = vpop.f32.mrf.mxu2  ;;  %4757 = vmatpush.bf16.msra.mxu2 %v6600_v45 }
 0x24b   :  { %4782 = vmatpush.bf16.msrb.mxu0 %v6828_v60  ;;  %v6695_v60 = vld [vmem:[#allocation10 + $0x548] sm:$0xf]  ;;  %v4382_v40 = vadd.f32 %v8233_v10, %v4368_v19  ;;  %v4397_v27 = vpop.f32.mrf.mxu0  ;;  %v7151_v10 = vld [vmem:[#allocation10 + $0x8d8] sm:$0xf] }
 0x24c   :  { %4796 = vmatpush.bf16.msrb.mxu1 %v6924_v7  ;;  %4769 = vmatpush.bf16.msra.mxu3 %v6720_v50  ;;  %v7623_v7 = vld [vmem:[#allocation10 + $0x550] sm:$0xf0]  ;;  %v7152_v48 = vor.u32 %v7737_v39, %v7151_v10 }
 0x24d   :  { %4758 = vmatmul.bf16.vlgmr.msra.gmra.mxu2 %v8181_v16  ;;  %v6696_v25 = vor.u32 %v7623_v7, %v6695_v60  ;;  %v4396_v54 = vadd.f32 %v4395_v37, %v4382_v40  ;;  %v7707_v16 = vld [vmem:[#allocation10 + $0x7f0] sm:$0xf0]  ;;  %v7007_v37 = vld [vmem:[#allocation10 + $0x7b8] sm:$0xf] }
 0x24e   :  { %4806 = vmatpush.bf16.msrb.mxu2 %v7068_v57  ;;  %v7032_v42 = vor.u32 %v7707_v16, %v7031_v3  ;;  %v7008_v50 = vor.u32 %v7701_v35, %v7007_v37  ;;  %v7728_v57 = vld [vmem:[#allocation10 + $0x898] sm:$0xf0]  ;;  %v7719_v3 = vld [vmem:[#allocation10 + $0x850] sm:$0xf0] }
 0x24f   :  { %4783 = vmatpush.bf16.msrb.mxu0 %v6816_v38  ;;  %v4370_v38 = vadd.f32 %v8240_v63, %v4356_v28  ;;  %v4410_v11 = vadd.f32 %v4409_v46, %v4396_v54  ;;  %v7116_v62 = vor.u32 %v7728_v57, %v7115_v51  ;;  %v7091_v28 = vld [vmem:[#allocation10 + $0x860] sm:$0xf] }
 0x250   :  { %4797 = vmatpush.bf16.msrb.mxu1 %v6912_v5  ;;  %4770 = vmatpush.bf16.msra.mxu3 %v6708_v4  ;;  %v4411_v5 = vpop.f32.mrf.mxu1  ;;  %v7103_v4 = vld [vmem:[#allocation10 + $0x878] sm:$0xf] }
 0x251   :  { %v4424_v26 = vadd.f32 %v4423_v36, %v4410_v11 }
 0x252   :  { %4807 = vmatpush.bf16.msrb.mxu2 %v7056_v34  ;;  %v4425_v15 = vpop.f32.mrf.mxu2  ;;  %v7725_v34 = vld [vmem:[#allocation10 + $0x880] sm:$0xf0] }
 0x253   :  { %4784 = vmatpush.bf16.msrb.mxu0 %v6804_v41  ;;  %v4439_v41 = vpop.f32.mrf.mxu3  ;;  %v4438_v12 = vadd.f32 %v4437_v2, %v4424_v26  ;;  %v7104_v29 = vor.u32 %v7725_v34, %v7103_v4 }
 0x254   :  { %4798 = vmatpush.bf16.msrb.mxu1 %v6900_v55  ;;  %4771 = vmatpush.bf16.msra.mxu3 %v6696_v25  ;;  %v7127_v55 = vld [vmem:[#allocation10 + $0x8a8] sm:$0xf] }
 0x256   :  { %4808 = vmatpush.bf16.msrb.mxu2 %v7044_v17 }
 0x257   :  { %4785 = vmatpush.bf16.msrb.mxu0 %v6792_v14  ;;  %4772 = vmatmul.bf16.vlgmr.msra.gmra.mxu3 %v8184_v21  ;;  %v7128_v21 = vor.u32 %v7731_v44, %v7127_v55  ;;  %v6996_v14 = vor.u32 %v7698_v22, %v6995_v43 }
 0x258   :  { %4799 = vmatpush.bf16.msrb.mxu1 %v6888_v13  ;;  %4820 = vmatpush.bf16.msrb.mxu3 %v7164_v18  ;;  %v4465_v0 = vpop.f32.mrf.mxu1  ;;  %v7079_v18 = vld [vmem:[#allocation10 + $0x848] sm:$0xf] }
 0x25a   :  { %4786 = vmatmul.bf16.vlgmr.msrb.gmra.mxu0 %v8192_v9  ;;  %v4384_v9 = vadd.f32 %v4383_v20, %v4370_v38  ;;  %4809 = vmatpush.bf16.msrb.mxu2 %v7032_v42  ;;  %v4479_v46 = vpop.f32.mrf.mxu2 }
 0x25b   :  { %4800 = vmatmul.bf16.vlgmr.msrb.gmra.mxu1 %v8196_v61  ;;  %v4451_v61 = vpop.f32.mrf.mxu0  ;;  %v4493_v13 = vpop.f32.mrf.mxu3 }
 0x25c   :  { %v4398_v63 = vadd.f32 %v4397_v27, %v4384_v9  ;;  %4821 = vmatpush.bf16.msrb.mxu3 %v7152_v48  ;;  %v4452_v45 = vadd.f32 %v4451_v61, %v4438_v12  ;;  %v7722_v27 = vld [vmem:[#allocation10 + $0x868] sm:$0xf0] }
 0x25d   :  { %v7092_v54 = vor.u32 %v7722_v27, %v7091_v28  ;;  %v2790_v27 = vperm.slane %v8231_v49, 2 }
 0x25e   :  { %v4412_v20 = vadd.f32 %v4411_v5, %v4398_v63  ;;  %4810 = vmatpush.bf16.msrb.mxu2 %v7020_v30  ;;  %v4466_v56 = vadd.f32 %v4465_v0, %v4452_v45  ;;  %v7080_v5 = vor.u32 %v7719_v3, %v7079_v18 }
 0x260   :  { %4822 = vmatpush.bf16.msrb.mxu3 %v7140_v31  ;;  %v4426_v59 = vadd.f32 %v4425_v15, %v4412_v20  ;;  %v4480_v36 = vadd.f32 %v4479_v46, %v4466_v56  ;;  %v4467_v1 = vpop.f32.mrf.mxu1 }
 0x262   :  { %4811 = vmatpush.bf16.msrb.mxu2 %v7008_v50  ;;  %v4440_v60 = vadd.f32 %v4439_v41, %v4426_v59  ;;  %v4494_v7 = vadd.f32 %v4493_v13, %v4480_v36  ;;  %v4481_v40 = vpop.f32.mrf.mxu2 }
 0x263   :  { %v4453_v19 = vpop.f32.mrf.mxu0  ;;  %v4495_v17 = vpop.f32.mrf.mxu3 }
 0x264   :  { %4823 = vmatpush.bf16.msrb.mxu3 %v7128_v21  ;;  %v4454_v8 = vadd.f32 %v4453_v19, %v4440_v60  ;;  %4834 = vst [vmem:[#allocation13] sm:$0xff] %v4494_v7 }
 0x266   :  { %4812 = vmatpush.bf16.msrb.mxu2 %v6996_v14  ;;  %v4468_v2 = vadd.f32 %v4467_v1, %v4454_v8 }
 0x268   :  { %4824 = vmatpush.bf16.msrb.mxu3 %v7116_v62  ;;  %v4482_v25 = vadd.f32 %v4481_v40, %v4468_v2  ;;  %v4521_v10 = vpop.f32.mrf.mxu1 }
 0x26a   :  { %4813 = vmatpush.bf16.msrb.mxu2 %v6984_v52  ;;  %v4496_v38 = vadd.f32 %v4495_v17, %v4482_v25  ;;  %v4535_v39 = vpop.f32.mrf.mxu2 }
 0x26b   :  { %v4507_v16 = vpop.f32.mrf.mxu0  ;;  %v4549_v15 = vpop.f32.mrf.mxu3 }
 0x26c   :  { %4825 = vmatpush.bf16.msrb.mxu3 %v7104_v29  ;;  %4837 = vst [vmem:[#allocation13 + $0x18] sm:$0xff] %v4496_v38  ;;  %v4508_v9 = vadd.f32 %v4507_v16, %v2789_v33 }
 0x26d   :  { %4814 = vmatmul.bf16.vlgmr.msrb.gmra.mxu2 %v8203_v24 }
 0x26e   :  { %v4522_v53 = vadd.f32 %v4521_v10, %v4508_v9 }
 0x270   :  { %4826 = vmatpush.bf16.msrb.mxu3 %v7092_v54  ;;  %v4523_v42 = vpop.f32.mrf.mxu1  ;;  %v4536_v24 = vadd.f32 %v4535_v39, %v4522_v53 }
 0x272   :  { %v4537_v48 = vpop.f32.mrf.mxu2  ;;  %v4550_v61 = vadd.f32 %v4549_v15, %v4536_v24 }
 0x273   :  { %v4509_v11 = vpop.f32.mrf.mxu0  ;;  %v4551_v47 = vpop.f32.mrf.mxu3 }
 0x274   :  { %4827 = vmatpush.bf16.msrb.mxu3 %v7080_v5  ;;  %v4510_v30 = vadd.f32 %v4509_v11, %v2789_v33 }
 0x276   :  { %v4524_v31 = vadd.f32 %v4523_v42, %v4510_v30 }
 0x277   :  { %4828 = vmatmul.bf16.vlgmr.msrb.gmra.mxu3 %v8206_v6 }
 0x278   :  { %v4577_v26 = vpop.f32.mrf.mxu1  ;;  %v4538_v6 = vadd.f32 %v4537_v48, %v4524_v31 }
 0x27a   :  { %v4591_v63 = vpop.f32.mrf.mxu2  ;;  %v4552_v35 = vadd.f32 %v4551_v47, %v4538_v6 }
 0x27b   :  { %v4563_v23 = vpop.f32.mrf.mxu0  ;;  %v4605_v0 = vpop.f32.mrf.mxu3 }
 0x27c   :  { %v4564_v37 = vadd.f32 %v4563_v23, %v4550_v61 }
 0x27e   :  { %v4578_v55 = vadd.f32 %v4577_v26, %v4564_v37 }
 0x280   :  { %v4579_v44 = vpop.f32.mrf.mxu1  ;;  %v4592_v20 = vadd.f32 %v4591_v63, %v4578_v55 }
 0x282   :  { %v4593_v12 = vpop.f32.mrf.mxu2  ;;  %v4606_v45 = vadd.f32 %v4605_v0, %v4592_v20 }
 0x283   :  { %v4565_v41 = vpop.f32.mrf.mxu0  ;;  %v4607_v21 = vpop.f32.mrf.mxu3 }
 0x284   :  { %v4566_v46 = vadd.f32 %v4565_v41, %v4552_v35 }
 0x286   :  { %v4580_v43 = vadd.f32 %v4579_v44, %v4566_v46 }
 0x288   :  { %v4633_v51 = vpop.f32.mrf.mxu1  ;;  %v4594_v59 = vadd.f32 %v4593_v12, %v4580_v43 }
 0x28a   :  { %v4608_v56 = vadd.f32 %v4607_v21, %v4594_v59 }
 0x28b   :  { %v4619_v50 = vpop.f32.mrf.mxu0 }
 0x28c   :  { %v4620_v22 = vadd.f32 %v4619_v50, %v4606_v45  ;;  %v4647_v57 = vpop.f32.mrf.mxu2 }
 0x28e   :  { %v4634_v36 = vadd.f32 %v4633_v51, %v4620_v22 }
 0x290   :  { %v4648_v14 = vadd.f32 %v4647_v57, %v4634_v36  ;;  %v4635_v58 = vpop.f32.mrf.mxu1 }
 0x293   :  { %v4621_v62 = vpop.f32.mrf.mxu0 }
 0x294   :  { %v4622_v19 = vadd.f32 %v4621_v62, %v4608_v56  ;;  %v4649_v4 = vpop.f32.mrf.mxu2 }
 0x296   :  { %v4661_v32 = vpop.f32.mrf.mxu3  ;;  %v4636_v34 = vadd.f32 %v4635_v58, %v4622_v19 }
 0x297   :  { %v4662_v13 = vadd.f32 %v4661_v32, %v4648_v14 }
 0x298   :  { %v4650_v60 = vadd.f32 %v4649_v4, %v4636_v34  ;;  %v4689_v52 = vpop.f32.mrf.mxu1 }
 0x299   :  { %4835 = vst [vmem:[#allocation13 + $0x8] sm:$0xff] %v4662_v13 }
 0x29b   :  { %v4675_v8 = vpop.f32.mrf.mxu0 }
 0x29c   :  { %v4676_v54 = vadd.f32 %v4675_v8, %v2790_v27 }
 0x29e   :  { %v4663_v7 = vpop.f32.mrf.mxu3  ;;  %v4690_v18 = vadd.f32 %v4689_v52, %v4676_v54 }
 0x29f   :  { %v4664_v1 = vadd.f32 %v4663_v7, %v4650_v60 }
 0x2a0   :  { %v4691_v2 = vpop.f32.mrf.mxu1 }
 0x2a1   :  { %4838 = vst [vmem:[#allocation13 + $0x20] sm:$0xff] %v4664_v1 }
 0x2a3   :  { %v4677_v40 = vpop.f32.mrf.mxu0 }
 0x2a4   :  { %v4678_v10 = vadd.f32 %v4677_v40, %v2790_v27 }
 0x2a6   :  { %v4692_v15 = vadd.f32 %v4691_v2, %v4678_v10 }
 0x2b0   :  { %v4703_v29 = vpop.f32.mrf.mxu2 }
 0x2b1   :  { %v4704_v38 = vadd.f32 %v4703_v29, %v4690_v18 }
 0x2b7   :  { %v4731_v17 = vpop.f32.mrf.mxu0 }
 0x2b8   :  { %v4705_v25 = vpop.f32.mrf.mxu2  ;;  %v4745_v5 = vpop.f32.mrf.mxu1 }
 0x2b9   :  { %v4706_v33 = vadd.f32 %v4705_v25, %v4692_v15 }
 0x2ba   :  { %v4717_v28 = vpop.f32.mrf.mxu3 }
 0x2bb   :  { %v4718_v39 = vadd.f32 %v4717_v28, %v4704_v38 }
 0x2bd   :  { %v4732_v11 = vadd.f32 %v4731_v17, %v4718_v39 }
 0x2bf   :  { %v4733_v42 = vpop.f32.mrf.mxu0  ;;  %v4746_v23 = vadd.f32 %v4745_v5, %v4732_v11 }
 0x2c0   :  { %v4747_v47 = vpop.f32.mrf.mxu1 }
 0x2c2   :  { %v4719_v3 = vpop.f32.mrf.mxu3 }
 0x2c3   :  { %v4720_v9 = vadd.f32 %v4719_v3, %v4706_v33 }
 0x2c5   :  { %v4734_v24 = vadd.f32 %v4733_v42, %v4720_v9 }
 0x2c7   :  { %v4748_v30 = vadd.f32 %v4747_v47, %v4734_v24 }
 0x2d0   :  { %v4759_v16 = vpop.f32.mrf.mxu2 }
 0x2d1   :  { %v4760_v53 = vadd.f32 %v4759_v16, %v4746_v23 }
 0x2d7   :  { %v4787_v63 = vpop.f32.mrf.mxu0 }
 0x2d8   :  { %v4761_v49 = vpop.f32.mrf.mxu2  ;;  %v4801_v37 = vpop.f32.mrf.mxu1 }
 0x2d9   :  { %v4762_v0 = vadd.f32 %v4761_v49, %v4748_v30 }
 0x2da   :  { %v4773_v48 = vpop.f32.mrf.mxu3 }
 0x2db   :  { %v4774_v26 = vadd.f32 %v4773_v48, %v4760_v53 }
 0x2dd   :  { %v4788_v31 = vadd.f32 %v4787_v63, %v4774_v26 }
 0x2df   :  { %v4802_v35 = vadd.f32 %v4801_v37, %v4788_v31  ;;  %v4789_v44 = vpop.f32.mrf.mxu0 }
 0x2e0   :  { %v4803_v45 = vpop.f32.mrf.mxu1 }
 0x2e2   :  { %v4775_v61 = vpop.f32.mrf.mxu3 }
 0x2e3   :  { %v4776_v6 = vadd.f32 %v4775_v61, %v4762_v0 }
 0x2e5   :  { %v4790_v20 = vadd.f32 %v4789_v44, %v4776_v6 }
 0x2e7   :  { %v4804_v21 = vadd.f32 %v4803_v45, %v4790_v20 }
 0x2f0   :  { %v4815_v41 = vpop.f32.mrf.mxu2 }
 0x2f1   :  { %v4816_v55 = vadd.f32 %v4815_v41, %v4802_v35 }
 0x2f8   :  { %v4817_v50 = vpop.f32.mrf.mxu2 }
 0x2f9   :  { %v4818_v43 = vadd.f32 %v4817_v50, %v4804_v21 }
 0x2fa   :  { %v4829_v12 = vpop.f32.mrf.mxu3 }
 0x2fb   :  { %v4830_v46 = vadd.f32 %v4829_v12, %v4816_v55 }
 0x2fd   :  { %4836 = vst [vmem:[#allocation13 + $0x10] sm:$0xff] %v4830_v46 }
 0x302   :  { %v4831_v22 = vpop.f32.mrf.mxu3 }
 0x303   :  { %v4832_v51 = vadd.f32 %v4831_v22, %v4818_v43 }
 0x305   :  { %4839 = vst [vmem:[#allocation13 + $0x28] sm:$0xff] %v4832_v51 }
 0x306   :  { %4852 = dma.vmem_to_hbm [thread:$0]  %s4845_s5, 768, %s4847_s25, [#allocation6], %s7912_s16, %s7912_s16, %s7913_s17  }
 0x307   :  { %7903 = dma.done.wait [#allocation6], 768  }
 0x308   :  { %7904 = vsyncadd [#allocation6], 4294966528 }
 0x309   :  { %4857 = vsyncpa [#allocation5], 1 }
 0x30a   :  { %4858 = vsyncpa [#allocation8], 1 }
 0x30b   :  { %4859 = vsyncpa [#allocation11], 1 }
 0x30c   :  { %4860 = vsyncpa [#allocation6], 1 }

</bundles_post_ra>
